<compile_context>
chip_gen: v6e
topology: v6e:2x2x1
jax: 0.10.0
libtpu: 0.0.40
codegen_flags: <defaults>
</compile_context>

<pallas_src>
import functools

import jax
import jax.numpy as jnp
from jax import lax
from jax.experimental import pallas as pl
from jax.experimental.pallas import tpu as pltpu

EPS = 1e-5
CONV_DTYPE = jnp.bfloat16      # MXU-native matmul dtype; accumulation stays f32
STORE_DTYPE = jnp.bfloat16     # dtype of the y1/y2 intermediates that round-trip HBM


def _pad_hw1(a):
    """Zero-pad a (H, W, C) activation by 1 on both spatial dims, in VMEM (value-land)."""
    H, W, C = a.shape
    zr = jnp.zeros((1, W, C), a.dtype)
    a = jnp.concatenate([zr, a, zr], axis=0)            # (H+2, W,   C)
    zc = jnp.zeros((H + 2, 1, C), a.dtype)
    return jnp.concatenate([zc, a, zc], axis=1)          # (H+2, W+2, C)


def _conv3x3(a_hwc, w_ref):
    """3x3 'same' conv as 3 accumulated MXU matmuls of K=3*Cin (one per ky tap row).

    a_hwc : (H, W, Cin) activation, CONV_DTYPE
    w_ref : (3, 3*Cin, Cout) weights, [ky][kx-major, Cin-minor][Cout], CONV_DTYPE
    returns (H*W, Cout) float32
    """
    H, W, Cin = a_hwc.shape
    Cout = w_ref.shape[2]
    ap = _pad_hw1(a_hwc)                                 # (H+2, W+2, Cin)
    acc = jnp.zeros((H * W, Cout), jnp.float32)
    for ky in range(3):                                  # unrolled, 3 iterations
        row = ap[ky:ky + H]                              # (H, W+2, Cin)
        taps = jnp.concatenate(
            [row[:, kx:kx + W, :] for kx in range(3)], axis=-1)   # (H, W, 3*Cin)
        acc = acc + lax.dot_general(
            taps.reshape(H * W, 3 * Cin), w_ref[ky],
            dimension_numbers=(((1,), (0,)), ((), ())),
            preferred_element_type=jnp.float32)
    return acc


def _store_y_and_stats(y_flat, y_ref, s_ref):
    """Store conv output lane-dense as (Cout, H*W) bf16 plus one-shot f32 BN partials."""
    ssum = jnp.sum(y_flat, axis=0, keepdims=True)              # (1, Cout) f32
    ssq = jnp.sum(y_flat * y_flat, axis=0, keepdims=True)      # (1, Cout) f32
    s_ref[0] = jnp.concatenate([ssum, ssq], axis=0)            # single (2, Cout) store
    y_ref[0] = y_flat.T.astype(y_ref.dtype)                    # (Cout, H*W) lane-dense bf16


def _conv1_kernel(x_ref, w1_ref, y1_ref, s1_ref, *, H, W):
    # x_ref : (1, Cin, H*W)   native NCHW image, spatially flattened (lane-dense load)
    # w1_ref: (3, 3*Cin, Cout) bf16
    # y1_ref: (1, Cout, H*W)  bf16 conv1 output (pre-BN), lane-dense
    # s1_ref: (1, 2, Cout)    f32 [sum, sumsq] partials for BN1
    C = x_ref.shape[1]
    x_hwc = x_ref[0].T.reshape(H, W, C).astype(CONV_DTYPE)     # channels-last in VMEM
    y = _conv3x3(x_hwc, w1_ref)                                # (H*W, Cout) f32
    _store_y_and_stats(y, y1_ref, s1_ref)


def _conv2_kernel(y1_ref, scale1_ref, bias1_ref, w2_ref, y2_ref, s2_ref, *, H, W):
    # BN1 folded to per-channel scale/bias, applied in the lane-dense (C, HW) layout,
    # ReLU, conv2, and BN2 partial stats.
    C = y1_ref.shape[1]
    a_chw = y1_ref[0].astype(jnp.float32) * scale1_ref[...] + bias1_ref[...]   # (C, HW)
    a_chw = jnp.maximum(a_chw, 0.0)
    a_hwc = a_chw.T.reshape(H, W, C).astype(CONV_DTYPE)        # channels-last in VMEM
    y = _conv3x3(a_hwc, w2_ref)
    _store_y_and_stats(y, y2_ref, s2_ref)


def _finalize_kernel(y2_ref, scale2_ref, bias2_ref, x_ref, out_ref):
    # BN2 (folded) + residual add + ReLU, entirely in the lane-dense (C, H*W) layout.
    a = y2_ref[0].astype(jnp.float32) * scale2_ref[...] + bias2_ref[...]       # (C, HW)
    out_ref[0] = jnp.maximum(a + x_ref[0], 0.0)


def _vmem_limit_bytes():
    # Never request the entire physical VMEM (v7x has only 64 MiB per TensorCore):
    # cap at 3/4 of capacity and at most 64 MiB.
    cap = None
    try:
        cap = getattr(pltpu.get_tpu_info(), "vmem_capacity_bytes", None)
    except Exception:
        cap = None
    if not cap:
        cap = 64 * 1024 * 1024      # conservative fallback -> 48 MiB, safe on all generations
    return int(min(64 * 1024 * 1024, cap * 3 // 4))


def basic_block_pallas(x_nchw, w1_oihw, g1, b1, w2_oihw, g2, b2):
    """Forward pass of BasicBlock (stride=1, dilation=1, no downsample => inplanes == planes).

    x_nchw: (N, C, H, W) f32;  w*_oihw: (C, C, 3, 3);  g*/b*: (C,) BatchNorm affine.
    BatchNorm uses batch statistics (training-mode forward of a fresh module), biased var.
    """
    N, C, H, W = x_nchw.shape
    assert w1_oihw.shape[0] == C and w2_oihw.shape[0] == C, \
        "residual path requires inplanes == planes (stride=1, no downsample)"
    HW = H * W
    Cout = C

    x_flat = x_nchw.reshape(N, C, HW)        # free row-major view; no wrapper HBM pass

    def prep_w(w):
        # (O, I, 3, 3) -> (3, 3*I, O): [ky][kx-major, Cin-minor][Cout], bf16 (halves DMA,
        # makes the in-kernel matmul operand already MXU-native).
        O, I = w.shape[0], w.shape[1]
        return jnp.transpose(w, (2, 3, 1, 0)).reshape(3, 3 * I, O).astype(CONV_DTYPE)

    w1k, w2k = prep_w(w1_oihw), prep_w(w2_oihw)

    cparams = pltpu.CompilerParams(
        dimension_semantics=("parallel",),       # megacore split on v7x; no-op on v5e/v6e
        vmem_limit_bytes=_vmem_limit_bytes())

    count = jnp.float32(N * H * W)

    def stats_to_affine(s, gamma, beta):
        # s: (N, 2, C) per-image [sum, sumsq]  ->  BN folded into per-channel scale/bias.
        total = jnp.sum(s, axis=0)                           # tiny (2, C) reduce
        mean = total[0] / count
        var = jnp.maximum(total[1] / count - mean * mean, 0.0)   # biased var, clamped >= 0
        scale = gamma * lax.rsqrt(var + EPS)
        bias = beta - mean * scale
        return (scale.reshape(C, 1).astype(jnp.float32),
                bias.reshape(C, 1).astype(jnp.float32))

    # ---- pass 1: conv1 + BN1 partial stats --------------------------------------------
    y1, s1 = pl.pallas_call(
        functools.partial(_conv1_kernel, H=H, W=W),
        grid=(N,),
        in_specs=[pl.BlockSpec((1, C, HW), lambda n: (n, 0, 0)),
                  pl.BlockSpec((3, 3 * C, Cout), lambda n: (0, 0, 0))],
        out_specs=[pl.BlockSpec((1, Cout, HW), lambda n: (n, 0, 0)),
                   pl.BlockSpec((1, 2, Cout), lambda n: (n, 0, 0))],
        out_shape=[jax.ShapeDtypeStruct((N, Cout, HW), STORE_DTYPE),
                   jax.ShapeDtypeStruct((N, 2, Cout), jnp.float32)],
        compiler_params=cparams,
    )(x_flat, w1k)
    scale1, bias1 = stats_to_affine(s1, g1, b1)

    # ---- pass 2: BN1 + ReLU + conv2 + BN2 partial stats --------------------------------
    y2, s2 = pl.pallas_call(
        functools.partial(_conv2_kernel, H=H, W=W),
        grid=(N,),
        in_specs=[pl.BlockSpec((1, C, HW), lambda n: (n, 0, 0)),
                  pl.BlockSpec((C, 1), lambda n: (0, 0)),
                  pl.BlockSpec((C, 1), lambda n: (0, 0)),
                  pl.BlockSpec((3, 3 * C, Cout), lambda n: (0, 0, 0))],
        out_specs=[pl.BlockSpec((1, Cout, HW), lambda n: (n, 0, 0)),
                   pl.BlockSpec((1, 2, Cout), lambda n: (n, 0, 0))],
        out_shape=[jax.ShapeDtypeStruct((N, Cout, HW), STORE_DTYPE),
                   jax.ShapeDtypeStruct((N, 2, Cout), jnp.float32)],
        compiler_params=cparams,
    )(y1, scale1, bias1, w2k)
    scale2, bias2 = stats_to_affine(s2, g2, b2)

    # ---- pass 3: BN2 + residual + ReLU, lane-dense native-NCHW store -------------------
    out_flat = pl.pallas_call(
        _finalize_kernel,
        grid=(N,),
        in_specs=[pl.BlockSpec((1, C, HW), lambda n: (n, 0, 0)),
                  pl.BlockSpec((C, 1), lambda n: (0, 0)),
                  pl.BlockSpec((C, 1), lambda n: (0, 0)),
                  pl.BlockSpec((1, C, HW), lambda n: (n, 0, 0))],
        out_specs=pl.BlockSpec((1, C, HW), lambda n: (n, 0, 0)),
        out_shape=jax.ShapeDtypeStruct((N, C, HW), jnp.float32),
        compiler_params=cparams,
    )(y2, scale2, bias2, x_flat)

    return out_flat.reshape(N, C, H, W)      # free reshape back to NCHW


def basic_block_ref(x, w1, g1, b1, w2, g2, b2):
    """Plain-JAX f32 reference of the PyTorch forward (training-mode BatchNorm)."""
    def conv(x, w):
        return lax.conv_general_dilated(
            x, w, window_strides=(1, 1), padding=((1, 1), (1, 1)),
            dimension_numbers=('NCHW', 'OIHW', 'NCHW'))

    def bn(x, g, b):
        mean = jnp.mean(x, axis=(0, 2, 3), keepdims=True)
        var = jnp.mean((x - mean) ** 2, axis=(0, 2, 3), keepdims=True)
        return (x - mean) * lax.rsqrt(var + EPS) * g.reshape(1, -1, 1, 1) \
            + b.reshape(1, -1, 1, 1)

    out = jax.nn.relu(bn(conv(x, w1), g1, b1))
    out = bn(conv(out, w2), g2, b2)
    return jax.nn.relu(out + x)


if __name__ == "__main__":
    key = jax.random.PRNGKey(0)
    k_x, k_w1, k_w2 = jax.random.split(key, 3)

    N, C, H, W = 2, 8, 16, 16        # inplanes == planes (residual path), stride=1
    x = jax.random.normal(k_x, (N, C, H, W), dtype=jnp.float32)
    w1 = jax.random.normal(k_w1, (C, C, 3, 3), dtype=jnp.float32) * 0.1
    w2 = jax.random.normal(k_w2, (C, C, 3, 3), dtype=jnp.float32) * 0.1
    # BatchNorm2d default init: gamma=1, beta=0
    g1 = jnp.ones((C,), jnp.float32)
    b1 = jnp.zeros((C,), jnp.float32)
    g2 = jnp.ones((C,), jnp.float32)
    b2 = jnp.zeros((C,), jnp.float32)

    fwd = jax.jit(basic_block_pallas)
    out = jax.block_until_ready(fwd(x, w1, g1, b1, w2, g2, b2))

    ref = basic_block_ref(x, w1, g1, b1, w2, g2, b2)
    assert out.shape == ref.shape == (N, C, H, W)
    # bf16 matmul inputs + bf16 intermediates (f32 accumulation/statistics): loosen tolerance.
    err = float(jnp.max(jnp.abs(out - ref)))
    assert err < 1e-1, err

    print("KERNEL_OK")
</pallas_src>

<mosaic_0001>
module attributes {stable_mosaic.version = 11 : i64} {
  func.func @_conv1_kernel(%arg0: i32, %arg1: memref<1x8x256xf32, #tpu.memory_space<vmem>>, %arg2: memref<3x24x8xbf16, #tpu.memory_space<vmem>>, %arg3: memref<1x8x256xbf16, #tpu.memory_space<vmem>>, %arg4: memref<1x2x8xf32, #tpu.memory_space<vmem>>) attributes {dimension_semantics = [#tpu.dimension_semantics<parallel>], iteration_bounds = array<i64: 2>, scalar_prefetch = 0 : i64, scratch_operands = 0 : i64, tpu.core_type = #tpu.core_type<tc>, window_params = [{transform_indices = @transform_0, window_bounds = array<i64: 1, 8, 256>}, {pipeline_mode = #tpu.pipeline_mode<synchronous>, transform_indices = @transform_1, window_bounds = array<i64: 3, 24, 8>}, {transform_indices = @transform_2, window_bounds = array<i64: 1, 8, 256>}, {transform_indices = @transform_3, window_bounds = array<i64: 1, 2, 8>}]} {
    %c0 = arith.constant 0 : index
    %c0_0 = arith.constant 0 : index
    %c0_1 = arith.constant 0 : index
    %0 = vector.load %arg1[%c0, %c0_0, %c0_1] : memref<1x8x256xf32, #tpu.memory_space<vmem>>, vector<1x8x256xf32>
    %1 = vector.shape_cast %0 : vector<1x8x256xf32> to vector<8x256xf32>
    %2 = tpu.transpose %1, [1, 0] : vector<8x256xf32> -> vector<256x8xf32>
    %3 = vector.shape_cast %2 : vector<256x8xf32> to vector<16x16x8xf32>
    %4 = arith.truncf %3 : vector<16x16x8xf32> to vector<16x16x8xbf16>
    %cst = arith.constant 0.000000e+00 : bf16
    %5 = vector.broadcast %cst : bf16 to vector<1x16x8xbf16>
    %6 = tpu.concatenate %5, %4, %5 in 0 : vector<1x16x8xbf16>, vector<16x16x8xbf16>, vector<1x16x8xbf16> -> vector<18x16x8xbf16>
    %cst_2 = arith.constant 0.000000e+00 : bf16
    %7 = vector.broadcast %cst_2 : bf16 to vector<18x1x8xbf16>
    %8 = tpu.concatenate %7, %6, %7 in 1 : vector<18x1x8xbf16>, vector<18x16x8xbf16>, vector<18x1x8xbf16> -> vector<18x18x8xbf16>
    %cst_3 = arith.constant 0.000000e+00 : f32
    %9 = vector.broadcast %cst_3 : f32 to vector<256x8xf32>
    %10 = vector.extract_strided_slice %8 {offsets = [0, 0, 0], sizes = [16, 18, 8], strides = [1, 1, 1]} : vector<18x18x8xbf16> to vector<16x18x8xbf16>
    %11 = vector.extract_strided_slice %10 {offsets = [0, 0, 0], sizes = [16, 16, 8], strides = [1, 1, 1]} : vector<16x18x8xbf16> to vector<16x16x8xbf16>
    %12 = vector.extract_strided_slice %10 {offsets = [0, 1, 0], sizes = [16, 16, 8], strides = [1, 1, 1]} : vector<16x18x8xbf16> to vector<16x16x8xbf16>
    %13 = vector.extract_strided_slice %10 {offsets = [0, 2, 0], sizes = [16, 16, 8], strides = [1, 1, 1]} : vector<16x18x8xbf16> to vector<16x16x8xbf16>
    %14 = tpu.concatenate %11, %12, %13 in 2 : vector<16x16x8xbf16>, vector<16x16x8xbf16>, vector<16x16x8xbf16> -> vector<16x16x24xbf16>
    %15 = vector.shape_cast %14 : vector<16x16x24xbf16> to vector<256x24xbf16>
    %c0_4 = arith.constant 0 : index
    %c0_5 = arith.constant 0 : index
    %c0_6 = arith.constant 0 : index
    %16 = vector.load %arg2[%c0_4, %c0_5, %c0_6] : memref<3x24x8xbf16, #tpu.memory_space<vmem>>, vector<1x24x8xbf16>
    %17 = vector.shape_cast %16 : vector<1x24x8xbf16> to vector<24x8xbf16>
    %cst_7 = arith.constant dense<0.000000e+00> : vector<256x8xf32>
    %18 = tpu.matmul %15, %17, %cst_7 {dimension_numbers = #tpu.dot_dimension_numbers<[1], [0], [0], [1], [0, 0, 1, 1], [], []>} : vector<256x24xbf16>, vector<24x8xbf16>, vector<256x8xf32> -> vector<256x8xf32>
    %19 = arith.addf %9, %18 : vector<256x8xf32>
    %20 = vector.extract_strided_slice %8 {offsets = [1, 0, 0], sizes = [16, 18, 8], strides = [1, 1, 1]} : vector<18x18x8xbf16> to vector<16x18x8xbf16>
    %21 = vector.extract_strided_slice %20 {offsets = [0, 0, 0], sizes = [16, 16, 8], strides = [1, 1, 1]} : vector<16x18x8xbf16> to vector<16x16x8xbf16>
    %22 = vector.extract_strided_slice %20 {offsets = [0, 1, 0], sizes = [16, 16, 8], strides = [1, 1, 1]} : vector<16x18x8xbf16> to vector<16x16x8xbf16>
    %23 = vector.extract_strided_slice %20 {offsets = [0, 2, 0], sizes = [16, 16, 8], strides = [1, 1, 1]} : vector<16x18x8xbf16> to vector<16x16x8xbf16>
    %24 = tpu.concatenate %21, %22, %23 in 2 : vector<16x16x8xbf16>, vector<16x16x8xbf16>, vector<16x16x8xbf16> -> vector<16x16x24xbf16>
    %25 = vector.shape_cast %24 : vector<16x16x24xbf16> to vector<256x24xbf16>
    %c1 = arith.constant 1 : index
    %c0_8 = arith.constant 0 : index
    %c0_9 = arith.constant 0 : index
    %26 = vector.load %arg2[%c1, %c0_8, %c0_9] : memref<3x24x8xbf16, #tpu.memory_space<vmem>>, vector<1x24x8xbf16>
    %27 = vector.shape_cast %26 : vector<1x24x8xbf16> to vector<24x8xbf16>
    %cst_10 = arith.constant dense<0.000000e+00> : vector<256x8xf32>
    %28 = tpu.matmul %25, %27, %cst_10 {dimension_numbers = #tpu.dot_dimension_numbers<[1], [0], [0], [1], [0, 0, 1, 1], [], []>} : vector<256x24xbf16>, vector<24x8xbf16>, vector<256x8xf32> -> vector<256x8xf32>
    %29 = arith.addf %19, %28 : vector<256x8xf32>
    %30 = vector.extract_strided_slice %8 {offsets = [2, 0, 0], sizes = [16, 18, 8], strides = [1, 1, 1]} : vector<18x18x8xbf16> to vector<16x18x8xbf16>
    %31 = vector.extract_strided_slice %30 {offsets = [0, 0, 0], sizes = [16, 16, 8], strides = [1, 1, 1]} : vector<16x18x8xbf16> to vector<16x16x8xbf16>
    %32 = vector.extract_strided_slice %30 {offsets = [0, 1, 0], sizes = [16, 16, 8], strides = [1, 1, 1]} : vector<16x18x8xbf16> to vector<16x16x8xbf16>
    %33 = vector.extract_strided_slice %30 {offsets = [0, 2, 0], sizes = [16, 16, 8], strides = [1, 1, 1]} : vector<16x18x8xbf16> to vector<16x16x8xbf16>
    %34 = tpu.concatenate %31, %32, %33 in 2 : vector<16x16x8xbf16>, vector<16x16x8xbf16>, vector<16x16x8xbf16> -> vector<16x16x24xbf16>
    %35 = vector.shape_cast %34 : vector<16x16x24xbf16> to vector<256x24xbf16>
    %c2 = arith.constant 2 : index
    %c0_11 = arith.constant 0 : index
    %c0_12 = arith.constant 0 : index
    %36 = vector.load %arg2[%c2, %c0_11, %c0_12] : memref<3x24x8xbf16, #tpu.memory_space<vmem>>, vector<1x24x8xbf16>
    %37 = vector.shape_cast %36 : vector<1x24x8xbf16> to vector<24x8xbf16>
    %cst_13 = arith.constant dense<0.000000e+00> : vector<256x8xf32>
    %38 = tpu.matmul %35, %37, %cst_13 {dimension_numbers = #tpu.dot_dimension_numbers<[1], [0], [0], [1], [0, 0, 1, 1], [], []>} : vector<256x24xbf16>, vector<24x8xbf16>, vector<256x8xf32> -> vector<256x8xf32>
    %39 = arith.addf %29, %38 : vector<256x8xf32>
    %cst_14 = arith.constant dense<0.000000e+00> : vector<8xf32>
    %40 = vector.multi_reduction <add>, %39, %cst_14 [0] : vector<256x8xf32> to vector<8xf32>
    %41 = vector.shape_cast %40 : vector<8xf32> to vector<1x8xf32>
    %42 = arith.mulf %39, %39 : vector<256x8xf32>
    %cst_15 = arith.constant dense<0.000000e+00> : vector<8xf32>
    %43 = vector.multi_reduction <add>, %42, %cst_15 [0] : vector<256x8xf32> to vector<8xf32>
    %44 = vector.shape_cast %43 : vector<8xf32> to vector<1x8xf32>
    %45 = tpu.concatenate %41, %44 in 0 : vector<1x8xf32>, vector<1x8xf32> -> vector<2x8xf32>
    %c0_16 = arith.constant 0 : index
    %c0_17 = arith.constant 0 : index
    %c0_18 = arith.constant 0 : index
    %46 = vector.load %arg4[%c0_16, %c0_17, %c0_18] : memref<1x2x8xf32, #tpu.memory_space<vmem>>, vector<1x2x8xf32>
    %47 = vector.shape_cast %46 : vector<1x2x8xf32> to vector<2x8xf32>
    %48 = vector.shape_cast %45 : vector<2x8xf32> to vector<1x2x8xf32>
    tpu.vector_store %arg4[%c0_16, %c0_17, %c0_18], %48 {strides = array<i32>} : memref<1x2x8xf32, #tpu.memory_space<vmem>>, vector<1x2x8xf32>,
    %49 = tpu.transpose %39, [1, 0] : vector<256x8xf32> -> vector<8x256xf32>
    %50 = arith.truncf %49 : vector<8x256xf32> to vector<8x256xbf16>
    %c0_19 = arith.constant 0 : index
    %c0_20 = arith.constant 0 : index
    %c0_21 = arith.constant 0 : index
    %51 = vector.load %arg3[%c0_19, %c0_20, %c0_21] : memref<1x8x256xbf16, #tpu.memory_space<vmem>>, vector<1x8x256xbf16>
    %52 = vector.shape_cast %51 : vector<1x8x256xbf16> to vector<8x256xbf16>
    %53 = vector.shape_cast %50 : vector<8x256xbf16> to vector<1x8x256xbf16>
    tpu.vector_store %arg3[%c0_19, %c0_20, %c0_21], %53 {strides = array<i32>} : memref<1x8x256xbf16, #tpu.memory_space<vmem>>, vector<1x8x256xbf16>,
    return
  }
  func.func @transform_0(%arg0: i32) -> (i32, i32, i32) {
    %c0_i32 = arith.constant 0 : i32
    %c0_i32_0 = arith.constant 0 : i32
    %c0_i32_1 = arith.constant 0 : i32
    return %arg0, %c0_i32, %c0_i32_0 : i32, i32, i32
  }
  func.func @transform_1(%arg0: i32) -> (i32, i32, i32) {
    %c0_i32 = arith.constant 0 : i32
    %c0_i32_0 = arith.constant 0 : i32
    %c0_i32_1 = arith.constant 0 : i32
    %c0_i32_2 = arith.constant 0 : i32
    return %c0_i32, %c0_i32_0, %c0_i32_1 : i32, i32, i32
  }
  func.func @transform_2(%arg0: i32) -> (i32, i32, i32) {
    %c0_i32 = arith.constant 0 : i32
    %c0_i32_0 = arith.constant 0 : i32
    %c0_i32_1 = arith.constant 0 : i32
    return %arg0, %c0_i32, %c0_i32_0 : i32, i32, i32
  }
  func.func @transform_3(%arg0: i32) -> (i32, i32, i32) {
    %c0_i32 = arith.constant 0 : i32
    %c0_i32_0 = arith.constant 0 : i32
    %c0_i32_1 = arith.constant 0 : i32
    return %arg0, %c0_i32, %c0_i32_0 : i32, i32, i32
  }
}

module attributes {stable_mosaic.version = 11 : i64} {
  func.func @_finalize_kernel(%arg0: i32, %arg1: memref<1x8x256xbf16, #tpu.memory_space<vmem>>, %arg2: memref<8x1xf32, #tpu.memory_space<vmem>>, %arg3: memref<8x1xf32, #tpu.memory_space<vmem>>, %arg4: memref<1x8x256xf32, #tpu.memory_space<vmem>>, %arg5: memref<1x8x256xf32, #tpu.memory_space<vmem>>) attributes {dimension_semantics = [#tpu.dimension_semantics<parallel>], iteration_bounds = array<i64: 2>, scalar_prefetch = 0 : i64, scratch_operands = 0 : i64, tpu.core_type = #tpu.core_type<tc>, window_params = [{transform_indices = @transform_0, window_bounds = array<i64: 1, 8, 256>}, {pipeline_mode = #tpu.pipeline_mode<synchronous>, transform_indices = @transform_1, window_bounds = array<i64: 8, 1>}, {pipeline_mode = #tpu.pipeline_mode<synchronous>, transform_indices = @transform_2, window_bounds = array<i64: 8, 1>}, {transform_indices = @transform_3, window_bounds = array<i64: 1, 8, 256>}, {transform_indices = @transform_4, window_bounds = array<i64: 1, 8, 256>}]} {
    %c0 = arith.constant 0 : index
    %c0_0 = arith.constant 0 : index
    %c0_1 = arith.constant 0 : index
    %0 = vector.load %arg1[%c0, %c0_0, %c0_1] : memref<1x8x256xbf16, #tpu.memory_space<vmem>>, vector<1x8x256xbf16>
    %1 = vector.shape_cast %0 : vector<1x8x256xbf16> to vector<8x256xbf16>
    %2 = arith.extf %1 : vector<8x256xbf16> to vector<8x256xf32>
    %c0_2 = arith.constant 0 : index
    %c0_3 = arith.constant 0 : index
    %3 = vector.load %arg2[%c0_2, %c0_3] : memref<8x1xf32, #tpu.memory_space<vmem>>, vector<8x1xf32>
    %4 = vector.broadcast %3 : vector<8x1xf32> to vector<8x256xf32>
    %5 = arith.mulf %2, %4 : vector<8x256xf32>
    %c0_4 = arith.constant 0 : index
    %c0_5 = arith.constant 0 : index
    %6 = vector.load %arg3[%c0_4, %c0_5] : memref<8x1xf32, #tpu.memory_space<vmem>>, vector<8x1xf32>
    %7 = vector.broadcast %6 : vector<8x1xf32> to vector<8x256xf32>
    %8 = arith.addf %5, %7 : vector<8x256xf32>
    %c0_6 = arith.constant 0 : index
    %c0_7 = arith.constant 0 : index
    %c0_8 = arith.constant 0 : index
    %9 = vector.load %arg4[%c0_6, %c0_7, %c0_8] : memref<1x8x256xf32, #tpu.memory_space<vmem>>, vector<1x8x256xf32>
    %10 = vector.shape_cast %9 : vector<1x8x256xf32> to vector<8x256xf32>
    %11 = arith.addf %8, %10 : vector<8x256xf32>
    %cst = arith.constant 0.000000e+00 : f32
    %12 = vector.broadcast %cst : f32 to vector<8x256xf32>
    %13 = arith.maximumf %11, %12 : vector<8x256xf32>
    %c0_9 = arith.constant 0 : index
    %c0_10 = arith.constant 0 : index
    %c0_11 = arith.constant 0 : index
    %14 = vector.load %arg5[%c0_9, %c0_10, %c0_11] : memref<1x8x256xf32, #tpu.memory_space<vmem>>, vector<1x8x256xf32>
    %15 = vector.shape_cast %14 : vector<1x8x256xf32> to vector<8x256xf32>
    %16 = vector.shape_cast %13 : vector<8x256xf32> to vector<1x8x256xf32>
    tpu.vector_store %arg5[%c0_9, %c0_10, %c0_11], %16 {strides = array<i32>} : memref<1x8x256xf32, #tpu.memory_space<vmem>>, vector<1x8x256xf32>,
    return
  }
  func.func @transform_0(%arg0: i32) -> (i32, i32, i32) {
    %c0_i32 = arith.constant 0 : i32
    %c0_i32_0 = arith.constant 0 : i32
    %c0_i32_1 = arith.constant 0 : i32
    return %arg0, %c0_i32, %c0_i32_0 : i32, i32, i32
  }
  func.func @transform_1(%arg0: i32) -> (i32, i32) {
    %c0_i32 = arith.constant 0 : i32
    %c0_i32_0 = arith.constant 0 : i32
    %c0_i32_1 = arith.constant 0 : i32
    return %c0_i32, %c0_i32_0 : i32, i32
  }
  func.func @transform_2(%arg0: i32) -> (i32, i32) {
    %c0_i32 = arith.constant 0 : i32
    %c0_i32_0 = arith.constant 0 : i32
    %c0_i32_1 = arith.constant 0 : i32
    return %c0_i32, %c0_i32_0 : i32, i32
  }
  func.func @transform_3(%arg0: i32) -> (i32, i32, i32) {
    %c0_i32 = arith.constant 0 : i32
    %c0_i32_0 = arith.constant 0 : i32
    %c0_i32_1 = arith.constant 0 : i32
    return %arg0, %c0_i32, %c0_i32_0 : i32, i32, i32
  }
  func.func @transform_4(%arg0: i32) -> (i32, i32, i32) {
    %c0_i32 = arith.constant 0 : i32
    %c0_i32_0 = arith.constant 0 : i32
    %c0_i32_1 = arith.constant 0 : i32
    return %arg0, %c0_i32, %c0_i32_0 : i32, i32, i32
  }
}

module attributes {stable_mosaic.version = 11 : i64} {
  func.func @_conv2_kernel(%arg0: i32, %arg1: memref<1x8x256xbf16, #tpu.memory_space<vmem>>, %arg2: memref<8x1xf32, #tpu.memory_space<vmem>>, %arg3: memref<8x1xf32, #tpu.memory_space<vmem>>, %arg4: memref<3x24x8xbf16, #tpu.memory_space<vmem>>, %arg5: memref<1x8x256xbf16, #tpu.memory_space<vmem>>, %arg6: memref<1x2x8xf32, #tpu.memory_space<vmem>>) attributes {dimension_semantics = [#tpu.dimension_semantics<parallel>], iteration_bounds = array<i64: 2>, scalar_prefetch = 0 : i64, scratch_operands = 0 : i64, tpu.core_type = #tpu.core_type<tc>, window_params = [{transform_indices = @transform_0, window_bounds = array<i64: 1, 8, 256>}, {pipeline_mode = #tpu.pipeline_mode<synchronous>, transform_indices = @transform_1, window_bounds = array<i64: 8, 1>}, {pipeline_mode = #tpu.pipeline_mode<synchronous>, transform_indices = @transform_2, window_bounds = array<i64: 8, 1>}, {pipeline_mode = #tpu.pipeline_mode<synchronous>, transform_indices = @transform_3, window_bounds = array<i64: 3, 24, 8>}, {transform_indices = @transform_4, window_bounds = array<i64: 1, 8, 256>}, {transform_indices = @transform_5, window_bounds = array<i64: 1, 2, 8>}]} {
    %c0 = arith.constant 0 : index
    %c0_0 = arith.constant 0 : index
    %c0_1 = arith.constant 0 : index
    %0 = vector.load %arg1[%c0, %c0_0, %c0_1] : memref<1x8x256xbf16, #tpu.memory_space<vmem>>, vector<1x8x256xbf16>
    %1 = vector.shape_cast %0 : vector<1x8x256xbf16> to vector<8x256xbf16>
    %2 = arith.extf %1 : vector<8x256xbf16> to vector<8x256xf32>
    %c0_2 = arith.constant 0 : index
    %c0_3 = arith.constant 0 : index
    %3 = vector.load %arg2[%c0_2, %c0_3] : memref<8x1xf32, #tpu.memory_space<vmem>>, vector<8x1xf32>
    %4 = vector.broadcast %3 : vector<8x1xf32> to vector<8x256xf32>
    %5 = arith.mulf %2, %4 : vector<8x256xf32>
    %c0_4 = arith.constant 0 : index
    %c0_5 = arith.constant 0 : index
    %6 = vector.load %arg3[%c0_4, %c0_5] : memref<8x1xf32, #tpu.memory_space<vmem>>, vector<8x1xf32>
    %7 = vector.broadcast %6 : vector<8x1xf32> to vector<8x256xf32>
    %8 = arith.addf %5, %7 : vector<8x256xf32>
    %cst = arith.constant 0.000000e+00 : f32
    %9 = vector.broadcast %cst : f32 to vector<8x256xf32>
    %10 = arith.maximumf %8, %9 : vector<8x256xf32>
    %11 = tpu.transpose %10, [1, 0] : vector<8x256xf32> -> vector<256x8xf32>
    %12 = vector.shape_cast %11 : vector<256x8xf32> to vector<16x16x8xf32>
    %13 = arith.truncf %12 : vector<16x16x8xf32> to vector<16x16x8xbf16>
    %cst_6 = arith.constant 0.000000e+00 : bf16
    %14 = vector.broadcast %cst_6 : bf16 to vector<1x16x8xbf16>
    %15 = tpu.concatenate %14, %13, %14 in 0 : vector<1x16x8xbf16>, vector<16x16x8xbf16>, vector<1x16x8xbf16> -> vector<18x16x8xbf16>
    %cst_7 = arith.constant 0.000000e+00 : bf16
    %16 = vector.broadcast %cst_7 : bf16 to vector<18x1x8xbf16>
    %17 = tpu.concatenate %16, %15, %16 in 1 : vector<18x1x8xbf16>, vector<18x16x8xbf16>, vector<18x1x8xbf16> -> vector<18x18x8xbf16>
    %cst_8 = arith.constant 0.000000e+00 : f32
    %18 = vector.broadcast %cst_8 : f32 to vector<256x8xf32>
    %19 = vector.extract_strided_slice %17 {offsets = [0, 0, 0], sizes = [16, 18, 8], strides = [1, 1, 1]} : vector<18x18x8xbf16> to vector<16x18x8xbf16>
    %20 = vector.extract_strided_slice %19 {offsets = [0, 0, 0], sizes = [16, 16, 8], strides = [1, 1, 1]} : vector<16x18x8xbf16> to vector<16x16x8xbf16>
    %21 = vector.extract_strided_slice %19 {offsets = [0, 1, 0], sizes = [16, 16, 8], strides = [1, 1, 1]} : vector<16x18x8xbf16> to vector<16x16x8xbf16>
    %22 = vector.extract_strided_slice %19 {offsets = [0, 2, 0], sizes = [16, 16, 8], strides = [1, 1, 1]} : vector<16x18x8xbf16> to vector<16x16x8xbf16>
    %23 = tpu.concatenate %20, %21, %22 in 2 : vector<16x16x8xbf16>, vector<16x16x8xbf16>, vector<16x16x8xbf16> -> vector<16x16x24xbf16>
    %24 = vector.shape_cast %23 : vector<16x16x24xbf16> to vector<256x24xbf16>
    %c0_9 = arith.constant 0 : index
    %c0_10 = arith.constant 0 : index
    %c0_11 = arith.constant 0 : index
    %25 = vector.load %arg4[%c0_9, %c0_10, %c0_11] : memref<3x24x8xbf16, #tpu.memory_space<vmem>>, vector<1x24x8xbf16>
    %26 = vector.shape_cast %25 : vector<1x24x8xbf16> to vector<24x8xbf16>
    %cst_12 = arith.constant dense<0.000000e+00> : vector<256x8xf32>
    %27 = tpu.matmul %24, %26, %cst_12 {dimension_numbers = #tpu.dot_dimension_numbers<[1], [0], [0], [1], [0, 0, 1, 1], [], []>} : vector<256x24xbf16>, vector<24x8xbf16>, vector<256x8xf32> -> vector<256x8xf32>
    %28 = arith.addf %18, %27 : vector<256x8xf32>
    %29 = vector.extract_strided_slice %17 {offsets = [1, 0, 0], sizes = [16, 18, 8], strides = [1, 1, 1]} : vector<18x18x8xbf16> to vector<16x18x8xbf16>
    %30 = vector.extract_strided_slice %29 {offsets = [0, 0, 0], sizes = [16, 16, 8], strides = [1, 1, 1]} : vector<16x18x8xbf16> to vector<16x16x8xbf16>
    %31 = vector.extract_strided_slice %29 {offsets = [0, 1, 0], sizes = [16, 16, 8], strides = [1, 1, 1]} : vector<16x18x8xbf16> to vector<16x16x8xbf16>
    %32 = vector.extract_strided_slice %29 {offsets = [0, 2, 0], sizes = [16, 16, 8], strides = [1, 1, 1]} : vector<16x18x8xbf16> to vector<16x16x8xbf16>
    %33 = tpu.concatenate %30, %31, %32 in 2 : vector<16x16x8xbf16>, vector<16x16x8xbf16>, vector<16x16x8xbf16> -> vector<16x16x24xbf16>
    %34 = vector.shape_cast %33 : vector<16x16x24xbf16> to vector<256x24xbf16>
    %c1 = arith.constant 1 : index
    %c0_13 = arith.constant 0 : index
    %c0_14 = arith.constant 0 : index
    %35 = vector.load %arg4[%c1, %c0_13, %c0_14] : memref<3x24x8xbf16, #tpu.memory_space<vmem>>, vector<1x24x8xbf16>
    %36 = vector.shape_cast %35 : vector<1x24x8xbf16> to vector<24x8xbf16>
    %cst_15 = arith.constant dense<0.000000e+00> : vector<256x8xf32>
    %37 = tpu.matmul %34, %36, %cst_15 {dimension_numbers = #tpu.dot_dimension_numbers<[1], [0], [0], [1], [0, 0, 1, 1], [], []>} : vector<256x24xbf16>, vector<24x8xbf16>, vector<256x8xf32> -> vector<256x8xf32>
    %38 = arith.addf %28, %37 : vector<256x8xf32>
    %39 = vector.extract_strided_slice %17 {offsets = [2, 0, 0], sizes = [16, 18, 8], strides = [1, 1, 1]} : vector<18x18x8xbf16> to vector<16x18x8xbf16>
    %40 = vector.extract_strided_slice %39 {offsets = [0, 0, 0], sizes = [16, 16, 8], strides = [1, 1, 1]} : vector<16x18x8xbf16> to vector<16x16x8xbf16>
    %41 = vector.extract_strided_slice %39 {offsets = [0, 1, 0], sizes = [16, 16, 8], strides = [1, 1, 1]} : vector<16x18x8xbf16> to vector<16x16x8xbf16>
    %42 = vector.extract_strided_slice %39 {offsets = [0, 2, 0], sizes = [16, 16, 8], strides = [1, 1, 1]} : vector<16x18x8xbf16> to vector<16x16x8xbf16>
    %43 = tpu.concatenate %40, %41, %42 in 2 : vector<16x16x8xbf16>, vector<16x16x8xbf16>, vector<16x16x8xbf16> -> vector<16x16x24xbf16>
    %44 = vector.shape_cast %43 : vector<16x16x24xbf16> to vector<256x24xbf16>
    %c2 = arith.constant 2 : index
    %c0_16 = arith.constant 0 : index
    %c0_17 = arith.constant 0 : index
    %45 = vector.load %arg4[%c2, %c0_16, %c0_17] : memref<3x24x8xbf16, #tpu.memory_space<vmem>>, vector<1x24x8xbf16>
    %46 = vector.shape_cast %45 : vector<1x24x8xbf16> to vector<24x8xbf16>
    %cst_18 = arith.constant dense<0.000000e+00> : vector<256x8xf32>
    %47 = tpu.matmul %44, %46, %cst_18 {dimension_numbers = #tpu.dot_dimension_numbers<[1], [0], [0], [1], [0, 0, 1, 1], [], []>} : vector<256x24xbf16>, vector<24x8xbf16>, vector<256x8xf32> -> vector<256x8xf32>
    %48 = arith.addf %38, %47 : vector<256x8xf32>
    %cst_19 = arith.constant dense<0.000000e+00> : vector<8xf32>
    %49 = vector.multi_reduction <add>, %48, %cst_19 [0] : vector<256x8xf32> to vector<8xf32>
    %50 = vector.shape_cast %49 : vector<8xf32> to vector<1x8xf32>
    %51 = arith.mulf %48, %48 : vector<256x8xf32>
    %cst_20 = arith.constant dense<0.000000e+00> : vector<8xf32>
    %52 = vector.multi_reduction <add>, %51, %cst_20 [0] : vector<256x8xf32> to vector<8xf32>
    %53 = vector.shape_cast %52 : vector<8xf32> to vector<1x8xf32>
    %54 = tpu.concatenate %50, %53 in 0 : vector<1x8xf32>, vector<1x8xf32> -> vector<2x8xf32>
    %c0_21 = arith.constant 0 : index
    %c0_22 = arith.constant 0 : index
    %c0_23 = arith.constant 0 : index
    %55 = vector.load %arg6[%c0_21, %c0_22, %c0_23] : memref<1x2x8xf32, #tpu.memory_space<vmem>>, vector<1x2x8xf32>
    %56 = vector.shape_cast %55 : vector<1x2x8xf32> to vector<2x8xf32>
    %57 = vector.shape_cast %54 : vector<2x8xf32> to vector<1x2x8xf32>
    tpu.vector_store %arg6[%c0_21, %c0_22, %c0_23], %57 {strides = array<i32>} : memref<1x2x8xf32, #tpu.memory_space<vmem>>, vector<1x2x8xf32>,
    %58 = tpu.transpose %48, [1, 0] : vector<256x8xf32> -> vector<8x256xf32>
    %59 = arith.truncf %58 : vector<8x256xf32> to vector<8x256xbf16>
    %c0_24 = arith.constant 0 : index
    %c0_25 = arith.constant 0 : index
    %c0_26 = arith.constant 0 : index
    %60 = vector.load %arg5[%c0_24, %c0_25, %c0_26] : memref<1x8x256xbf16, #tpu.memory_space<vmem>>, vector<1x8x256xbf16>
    %61 = vector.shape_cast %60 : vector<1x8x256xbf16> to vector<8x256xbf16>
    %62 = vector.shape_cast %59 : vector<8x256xbf16> to vector<1x8x256xbf16>
    tpu.vector_store %arg5[%c0_24, %c0_25, %c0_26], %62 {strides = array<i32>} : memref<1x8x256xbf16, #tpu.memory_space<vmem>>, vector<1x8x256xbf16>,
    return
  }
  func.func @transform_0(%arg0: i32) -> (i32, i32, i32) {
    %c0_i32 = arith.constant 0 : i32
    %c0_i32_0 = arith.constant 0 : i32
    %c0_i32_1 = arith.constant 0 : i32
    return %arg0, %c0_i32, %c0_i32_0 : i32, i32, i32
  }
  func.func @transform_1(%arg0: i32) -> (i32, i32) {
    %c0_i32 = arith.constant 0 : i32
    %c0_i32_0 = arith.constant 0 : i32
    %c0_i32_1 = arith.constant 0 : i32
    return %c0_i32, %c0_i32_0 : i32, i32
  }
  func.func @transform_2(%arg0: i32) -> (i32, i32) {
    %c0_i32 = arith.constant 0 : i32
    %c0_i32_0 = arith.constant 0 : i32
    %c0_i32_1 = arith.constant 0 : i32
    return %c0_i32, %c0_i32_0 : i32, i32
  }
  func.func @transform_3(%arg0: i32) -> (i32, i32, i32) {
    %c0_i32 = arith.constant 0 : i32
    %c0_i32_0 = arith.constant 0 : i32
    %c0_i32_1 = arith.constant 0 : i32
    %c0_i32_2 = arith.constant 0 : i32
    return %c0_i32, %c0_i32_0, %c0_i32_1 : i32, i32, i32
  }
  func.func @transform_4(%arg0: i32) -> (i32, i32, i32) {
    %c0_i32 = arith.constant 0 : i32
    %c0_i32_0 = arith.constant 0 : i32
    %c0_i32_1 = arith.constant 0 : i32
    return %arg0, %c0_i32, %c0_i32_0 : i32, i32, i32
  }
  func.func @transform_5(%arg0: i32) -> (i32, i32, i32) {
    %c0_i32 = arith.constant 0 : i32
    %c0_i32_0 = arith.constant 0 : i32
    %c0_i32_1 = arith.constant 0 : i32
    return %arg0, %c0_i32, %c0_i32_0 : i32, i32, i32
  }
}

</mosaic_0001>

<bundles_post_ra>
// kernel: basic_block_pallas.5
= control target key start
LH: loop header
LB: loop body
LE: loop exit
PB: predicated region body
PF: predicated region fallthrough
CT: control target
= control target key end

     0   :  { %s372_s15 = smov 0   ;;  %s398_s0 = inlined_call_operand.vmem [shape: bf16[2,8,256], index: 0, kind: input, shape index: {}]   ;;  %s399_s1 = inlined_call_operand.vmem [shape: f32[8,1], index: 1, kind: input, shape index: {}]   ;;  %s400_s2 = inlined_call_operand.vmem [shape: f32[8,1], index: 2, kind: input, shape index: {}]   ;;  %s401_s3 = inlined_call_operand.vmem [shape: f32[2,8,256], index: 3, kind: input, shape index: {}]   ;;  %s402_s4 = inlined_call_operand.vmem [shape: f32[2,8,256], index: 4, kind: output, shape index: {}]  }
   0x1 LB: > { %s312_s16 = sadd.s32 4294967295, %s344_s15   ;;  %p316_p0 = scmp.ge.s32.totalorder %s344_s15, 1  ;;  %s344_s15 = sphi %s372_s15, %s14_s15  }
   0x2   : > { %p172_p1 = scmp.lt.s32.totalorder %s344_s15, 3 }
   0x4   : > { %p173_p2 = pnand %p316_p0, %p172_p1 }
   0x5   : > { %p203_p3 = scmp.lt.s32.totalorder (!%p173_p2), %s312_s16, 1 }
   0x6   : > { %176 = sbr.rel (%p173_p2) target bundleno = 148 (0x94), region = 36 }
   0xb   : > { %v221_v0 = vld [vmem:[%s399_s1] sm:$0xff]  ;;  %v346_v1 = vmov 0   ;;  %s404_s16 = smov (!%p203_p3, %s312_s16), 1 }
   0xc   : > { %337 = vset.pattern.permute.xlu0 %v346_v1  ;;  %v229_v2 = vld [vmem:[%s400_s2] sm:$0xff]  ;;  %s325_s21 = sshll.u32 %s404_s16, 3  ;;  %s326_s25 = sshll.u32 %s404_s16, 4 }
   0xd   : > { %224 = vperm.xlu0 %337, %v221_v0   ;;  %s207_s24 = scalar_lea.vmem %s398_s0, %s325_s21  ;;  %s212_s28 = scalar_lea.vmem %s401_s3, %s326_s25 }
   0xe   : > { %v218_v3 = vld [vmem:[%s207_s24] sm:$0xff]  ;;  %v238_v11 = vld [vmem:[%s212_s28 + $0x8] sm:$0xff]  ;;  %s217_s5 = scalar_lea.vmem %s402_s4, %s326_s25 }
   0xf   : > { %v219_v4 = vunpack.c.l.bf16 %v218_v3  ;;  %v220_v5 = vunpack.c.h.bf16 %v218_v3  ;;  %v237_v10 = vld [vmem:[%s212_s28] sm:$0xff] }
  0x11   : > { %232 = vperm.xlu0 %337, %v229_v2  }
  0x88   : > { %v225_v6 = vpop.permute.xlu0 %224 }
  0x89   : > { %v227_v7 = vmul.f32 %v225_v6, %v219_v4  ;;  %v228_v8 = vmul.f32 %v225_v6, %v220_v5 }
  0x8c   : > { %v233_v9 = vpop.permute.xlu0 %232 }
  0x8d   : > { %v235_v12 = vadd.f32 %v233_v9, %v227_v7  ;;  %v236_v13 = vadd.f32 %v233_v9, %v228_v8 }
  0x8f   : > { %v239_v14 = vadd.f32 %v237_v10, %v235_v12  ;;  %v240_v15 = vadd.f32 %v238_v11, %v236_v13 }
  0x91   : > { %v241_v16 = vmax.f32 %v239_v14, 0.0  ;;  %v242_v17 = vmax.f32 %v240_v15, 0.0 }
  0x93   : > { %243 = vst [vmem:[%s217_s5] sm:$0xff] %v241_v16  ;;  %244 = vst [vmem:[%s217_s5 + $0x8] sm:$0xff] %v242_v17 }
  0x94 PF: > { %s14_s15 = sadd.s32 1, %s344_s15  }
  0x95   : > { %p11_p4 = scmp.ge.s32.totalorder %s14_s15, 4  }
  0x97   :  { %13 = sbr.rel (!%p11_p4) target bundleno = 1 (0x1), region = 69 }

// kernel: basic_block_pallas.3
= control target key start
LH: loop header
LB: loop body
LE: loop exit
PB: predicated region body
PF: predicated region fallthrough
CT: control target
= control target key end

     0   :  { %s2229_s12 = smov 0   ;;  %s3005_s0 = inlined_call_operand.vmem [shape: f32[2,8,256], index: 0, kind: input, shape index: {}]   ;;  %s3006_s1 = inlined_call_operand.vmem [shape: bf16[3,24,8], index: 1, kind: input, shape index: {}]   ;;  %s3007_s2 = inlined_call_operand.vmem [shape: bf16[2,8,256], index: 2, kind: output, shape index: {0}]   ;;  %s3008_s3 = inlined_call_operand.vmem [shape: f32[2,2,8], index: 3, kind: output, shape index: {1}]  }
   0x1 LB: > { %s1815_s13 = sadd.s32 4294967295, %s2204_s12   ;;  %p1819_p0 = scmp.ge.s32.totalorder %s2204_s12, 1  ;;  %s2204_s12 = sphi %s2229_s12, %s14_s12  }
   0x2   : > { %p140_p1 = scmp.lt.s32.totalorder %s2204_s12, 3 }
   0x4   : > { %p141_p2 = pnand %p1819_p0, %p140_p1 }
   0x5   : > { %p168_p3 = scmp.lt.s32.totalorder (!%p141_p2), %s1815_s13, 1  ;;  %s2206_s18 = smov (!%p141_p2), 16  }
   0x6   : > { %144 = sbr.rel (%p141_p2) target bundleno = 757 (0x2f5), region = 28  ;;  %s2207_s19 = smov (!%p141_p2), 8  }
   0xb   : > { %s3012_s13 = smov (!%p168_p3, %s1815_s13), 1  ;;  %vm418_vm0 = vcmask 1040384   ;;  %vm419_vm1 = vsmask.f32 256  ;;  %vm712_vm3 = vcmask 1046528   ;;  %vm933_vm5 = vcmask 1043456  }
   0xc   : > { %s1888_s14 = sshll.u32 %s3012_s13, 4  ;;  %vm2244_vm2 = vmand %vm418_vm0, %vm419_vm1  ;;  %vm455_vm4 = vsmask.f32 7424  ;;  %vm793_vm6 = vcmask 64512   ;;  %vm826_vm7 = vcmask 130048   ;;  %vm900_vm8 = vcmask 195584  }
   0xd   : > { %s172_s17 = scalar_lea.vmem %s3005_s0, %s1888_s14  ;;  %s1824_s5 = sshll.u32 %s3012_s13, 1  ;;  %vm1654_vm9 = vcmask 58368  }
   0xe   : > { %v183_v0 = vld [vmem:[%s172_s17] sm:$0xff]  ;;  %v184_v1 = vld [vmem:[%s172_s17 + $0x8] sm:$0xff]  ;;  %s181_s8 = scalar_lea.vmem %s3008_s3, %s1824_s5  ;;  %s1889_s9 = sshll.u32 %s3012_s13, 3 }
   0xf   : > { %v2073_v2 = vpack.i.bf16 %v183_v0, %v184_v1  ;;  %s177_s14 = scalar_lea.vmem %s3007_s2, %s1889_s9 }
  0x11   : > { %2074 = vxpose.xlu0.b32.start.end [1/1] (short) %v2073_v2, 128 }
  0x8d   : > { %v2075_v3 = vpop.trf.xlu0 }
  0x8e   : > { %v2079_v4 = vunpack.i.h.bf16 %v2075_v3  ;;  %v2076_v5 = vunpack.i.l.bf16 %v2075_v3 }
  0x91   : > { %v2080_v6 = vpop.trf.xlu0 }
  0x92   : > { %v2084_v7 = vunpack.i.h.bf16 %v2080_v6  ;;  %v2081_v8 = vunpack.i.l.bf16 %v2080_v6 }
  0x94   : > { %v249_v9 = vpack.c.bf16 %v2084_v7, %v2079_v4  ;;  %v257_v10 = vpack.c.bf16 %v2081_v8, %v2076_v5 }
  0x95   : > { %v2085_v11 = vpop.trf.xlu0 }
  0x96   : > { %v329_v12 = vshrl.u32 %v257_v10, 16  ;;  %v273_v13 = vshrl.u32 %v249_v9, 16  ;;  %v276_v14 = vshll.u32 %v249_v9, 16  ;;  %v332_v16 = vshll.u32 %v257_v10, 16 }
  0x97   : > { %v2086_v17 = vunpack.i.l.bf16 %v2085_v11  ;;  %v2089_v21 = vunpack.i.h.bf16 %v2085_v11 }
  0x98   : > { %v331_v19 = vrot.slane %v329_v12, 7  ;;  %v275_v20 = vrot.slane %v273_v13, 7 }
  0x99   : > { %v2090_v18 = vpop.trf.xlu0 }
  0x9a   : > { %v2091_v22 = vunpack.i.l.bf16 %v2090_v18  ;;  %v2094_v23 = vunpack.i.h.bf16 %v2090_v18  ;;  %v334_v24 = vor.u32 %v332_v16, %v331_v19  ;;  %v447_v25 = vsel %vm2244_vm2, %v331_v19, 0 }
  0x9b   : > { %v278_v26 = vor.u32 %v276_v14, %v275_v20  ;;  %v741_v32 = vrot.slane %v447_v25, 1  ;;  %v439_v33 = vsel %vm2244_vm2, %v275_v20, 0  ;;  %v572_v38 = vshll.u32 %v447_v25, 16 }
  0x9c   : > { %v258_v27 = vpack.c.bf16 %v2091_v22, %v2086_v17  ;;  %v2252_v28 = vsel %vm2244_vm2, 0, %v334_v24  ;;  %v250_v34 = vpack.c.bf16 %v2094_v23, %v2089_v21  ;;  %v717_v40 = vrot.slane %v439_v33, 1 }
  0x9d   : > { %v2095_v29 = vpop.trf.xlu0  ;;  %v2256_v30 = vsel %vm2244_vm2, 0, %v278_v26  ;;  %v740_v31 = vrot.slane %v2252_v28, 1  ;;  %v567_v37 = vshll.u32 %v2252_v28, 16  ;;  %v476_v43 = vshll.u32 %v439_v33, 16 }
  0x9e   : > { %v716_v36 = vrot.slane %v2256_v30, 1  ;;  %v339_v39 = vshll.u32 %v258_v27, 16  ;;  %v471_v42 = vshll.u32 %v2256_v30, 16  ;;  %v565_v44 = vshrl.u32 %v2252_v28, 16 }
  0x9f   : > { %v742_v35 = vsel %vm712_vm3, %v740_v31, %v741_v32  ;;  %v569_v45 = vrot.slane %v567_v37, 1  ;;  %v469_v46 = vshrl.u32 %v2256_v30, 16  ;;  %v336_v48 = vshrl.u32 %v258_v27, 16 }
  0xa0   : > { %779 = vrot.lane.b32.xlu1 %v742_v35, %s2206_s18  ;;  %v473_v47 = vrot.slane %v471_v42, 1  ;;  %v280_v49 = vshrl.u32 %v250_v34, 16  ;;  %v2096_v50 = vunpack.i.l.bf16 %v2095_v29  ;;  %v718_v51 = vsel %vm712_vm3, %v716_v36, %v717_v40 }
  0xa1   : > { %v2100_v41 = vpop.trf.xlu0  ;;  %v570_v52 = vor.u32 %v569_v45, %v565_v44  ;;  %v574_v53 = vrot.slane %v572_v38, 1  ;;  %v338_v56 = vrot.slane %v336_v48, 7  ;;  %v283_v59 = vshll.u32 %v250_v34, 16 }
  0xa2   : > { %v2101_v54 = vunpack.i.l.bf16 %v2100_v41  ;;  %v474_v55 = vor.u32 %v473_v47, %v469_v46  ;;  %v282_v57 = vrot.slane %v280_v49, 7  ;;  %v478_v61 = vrot.slane %v476_v43, 1 }
  0xa3   : > { %v575_v60 = vsel %vm455_vm4, %v570_v52, %v574_v53  ;;  %v2099_v62 = vunpack.i.h.bf16 %v2095_v29  ;;  %v2104_v63 = vunpack.i.h.bf16 %v2100_v41  ;;  %v341_v0 = vor.u32 %v339_v39, %v338_v56 }
  0xa4   : > { %763 = vrot.lane.b32.xlu1 %v718_v51, %s2206_s18  ;;  %666 = vrot.lane.b32.xlu0 %v575_v60, %s2207_s19  ;;  %v448_v1 = vsel %vm2244_vm2, %v338_v56, 0  ;;  %v479_v2 = vsel %vm455_vm4, %v474_v55, %v478_v61  ;;  %v285_v3 = vor.u32 %v283_v59, %v282_v57  ;;  %v259_v4 = vpack.c.bf16 %v2101_v54, %v2096_v50 }
  0xa5   : > { %v2270_v58 = vpop.trf.xlu0  ;;  %v2280_v5 = vsel %vm2244_vm2, 0, %v341_v0  ;;  %v744_v8 = vrot.slane %v448_v1, 1  ;;  %v251_v11 = vpack.c.bf16 %v2104_v63, %v2099_v62  ;;  %v440_v12 = vsel %vm2244_vm2, %v282_v57, 0 }
  0xa6   : > { %v743_v7 = vrot.slane %v2280_v5, 1  ;;  %v2285_v9 = vsel %vm2244_vm2, 0, %v285_v3  ;;  %v579_v10 = vshll.u32 %v2280_v5, 16  ;;  %v346_v17 = vshll.u32 %v259_v4, 16 }
  0xa7   : > { %v719_v14 = vrot.slane %v2285_v9, 1  ;;  %v483_v18 = vshll.u32 %v2285_v9, 16  ;;  %v720_v20 = vrot.slane %v440_v12, 1  ;;  %v577_v21 = vshrl.u32 %v2280_v5, 16 }
  0xa8   : > { %650 = vrot.lane.b32.xlu1 %v479_v2, %s2207_s19  ;;  %v745_v13 = vsel %vm712_vm3, %v743_v7, %v744_v8  ;;  %v581_v16 = vrot.slane %v579_v10, 1  ;;  %v584_v22 = vshll.u32 %v448_v1, 16  ;;  %v343_v23 = vshrl.u32 %v259_v4, 16 }
  0xa9   : > { %v2110_v6 = vpop.trf.xlu0  ;;  %v290_v24 = vshll.u32 %v251_v11, 16  ;;  %v2106_v25 = vunpack.i.l.bf16 %v2270_v58  ;;  %v287_v26 = vshrl.u32 %v251_v11, 16  ;;  %v721_v27 = vsel %vm712_vm3, %v719_v14, %v720_v20 }
  0xaa   : > { %v582_v29 = vor.u32 %v581_v16, %v577_v21  ;;  %v485_v31 = vrot.slane %v483_v18, 1  ;;  %v345_v32 = vrot.slane %v343_v23, 7  ;;  %v2111_v33 = vunpack.i.l.bf16 %v2110_v6 }
  0xab   : > { %v289_v34 = vrot.slane %v287_v26, 7  ;;  %v586_v36 = vrot.slane %v584_v22, 1  ;;  %v481_v37 = vshrl.u32 %v2285_v9, 16  ;;  %v488_v38 = vshll.u32 %v440_v12, 16 }
  0xac   : > { %781 = vrot.lane.b32.xlu1 %v745_v13, %s2206_s18  ;;  %v348_v39 = vor.u32 %v346_v17, %v345_v32  ;;  %v2109_v40 = vunpack.i.h.bf16 %v2270_v58  ;;  %v2114_v41 = vunpack.i.h.bf16 %v2110_v6  ;;  %v449_v44 = vsel %vm2244_vm2, %v345_v32, 0 }
  0xad   : > { %v2294_v19 = vpop.trf.xlu0  ;;  %v587_v42 = vsel %vm455_vm4, %v582_v29, %v586_v36  ;;  %v486_v43 = vor.u32 %v485_v31, %v481_v37  ;;  %v260_v45 = vpack.c.bf16 %v2111_v33, %v2106_v25  ;;  %v292_v47 = vor.u32 %v290_v24, %v289_v34 }
  0xae   : > { %v2310_v46 = vsel %vm2244_vm2, 0, %v348_v39  ;;  %v490_v49 = vrot.slane %v488_v38, 1  ;;  %v747_v51 = vrot.slane %v449_v44, 1  ;;  %v441_v52 = vsel %vm2244_vm2, %v289_v34, 0 }
  0xaf   : > { %v746_v50 = vrot.slane %v2310_v46, 1  ;;  %v252_v53 = vpack.c.bf16 %v2114_v41, %v2109_v40  ;;  %v591_v55 = vshll.u32 %v2310_v46, 16  ;;  %v2322_v56 = vsel %vm2244_vm2, 0, %v292_v47 }
  0xb0   : > { %765 = vrot.lane.b32.xlu1 %v721_v27, %s2206_s18  ;;  %v491_v54 = vsel %vm455_vm4, %v486_v43, %v490_v49  ;;  %v350_v57 = vshrl.u32 %v260_v45, 16  ;;  %v723_v59 = vrot.slane %v441_v52, 1  ;;  %v596_v60 = vshll.u32 %v449_v44, 16 }
  0xb1   : > { %v2300_v35 = vpop.trf.xlu0  ;;  %v748_v61 = vsel %vm712_vm3, %v746_v50, %v747_v51  ;;  %v722_v62 = vrot.slane %v2322_v56, 1  ;;  %v589_v63 = vshrl.u32 %v2310_v46, 16  ;;  %v593_v0 = vrot.slane %v591_v55, 1 }
  0xb2   : > { %v495_v1 = vshll.u32 %v2322_v56, 16  ;;  %v294_v2 = vshrl.u32 %v252_v53, 16  ;;  %v353_v3 = vshll.u32 %v260_v45, 16  ;;  %v352_v4 = vrot.slane %v350_v57, 7 }
  0xb3   : > { %v297_v7 = vshll.u32 %v252_v53, 16  ;;  %v598_v8 = vrot.slane %v596_v60, 1  ;;  %v493_v10 = vshrl.u32 %v2322_v56, 16  ;;  %v500_v11 = vshll.u32 %v441_v52, 16 }
  0xb4   : > { %668 = vrot.lane.b32.xlu1 %v587_v42, %s2207_s19  ;;  %v724_v12 = vsel %vm712_vm3, %v722_v62, %v723_v59  ;;  %v594_v13 = vor.u32 %v593_v0, %v589_v63  ;;  %v497_v14 = vrot.slane %v495_v1, 1  ;;  %v296_v16 = vrot.slane %v294_v2, 7 }
  0xb5   : > { %v2312_v48 = vpop.trf.xlu0  ;;  %v2116_v17 = vunpack.i.l.bf16 %v2294_v19  ;;  %v2121_v18 = vunpack.i.l.bf16 %v2300_v35  ;;  %v355_v20 = vor.u32 %v353_v3, %v352_v4  ;;  %v2119_v22 = vunpack.i.h.bf16 %v2294_v19 }
  0xb6   : > { %v2124_v23 = vunpack.i.h.bf16 %v2300_v35  ;;  %v502_v24 = vrot.slane %v500_v11, 1  ;;  %v599_v25 = vsel %vm455_vm4, %v594_v13, %v598_v8  ;;  %v498_v26 = vor.u32 %v497_v14, %v493_v10 }
  0xb7   : > { %v450_v27 = vsel %vm2244_vm2, %v352_v4, 0  ;;  %v299_v29 = vor.u32 %v297_v7, %v296_v16  ;;  %v261_v31 = vpack.c.bf16 %v2121_v18, %v2116_v17  ;;  %v2348_v32 = vsel %vm2244_vm2, 0, %v355_v20 }
  0xb8   : > { %652 = vrot.lane.b32.xlu1 %v491_v54, %s2207_s19  ;;  %v749_v19 = vrot.slane %v2348_v32, 1  ;;  %v750_v34 = vrot.slane %v450_v27, 1  ;;  %v442_v35 = vsel %vm2244_vm2, %v296_v16, 0  ;;  %v503_v36 = vsel %vm455_vm4, %v498_v26, %v502_v24 }
  0xb9   : > { %v2324_v58 = vpop.trf.xlu0  ;;  %v2358_v37 = vsel %vm2244_vm2, 0, %v299_v29  ;;  %v603_v38 = vshll.u32 %v2348_v32, 16  ;;  %v253_v39 = vpack.c.bf16 %v2124_v23, %v2119_v22  ;;  %v357_v40 = vshrl.u32 %v261_v31, 16 }
  0xba   : > { %v726_v42 = vrot.slane %v442_v35, 1  ;;  %v608_v43 = vshll.u32 %v450_v27, 16  ;;  %v751_v44 = vsel %vm712_vm3, %v749_v19, %v750_v34  ;;  %v601_v45 = vshrl.u32 %v2348_v32, 16 }
  0xbb   : > { %v507_v47 = vshll.u32 %v2358_v37, 16  ;;  %v725_v49 = vrot.slane %v2358_v37, 1  ;;  %v605_v50 = vrot.slane %v603_v38, 1  ;;  %v360_v53 = vshll.u32 %v261_v31, 16 }
  0xbc   : > { %783 = vrot.lane.b32.xlu1 %v748_v61, %s2206_s18  ;;  %v359_v54 = vrot.slane %v357_v40, 7  ;;  %v301_v55 = vshrl.u32 %v253_v39, 16  ;;  %v304_v57 = vshll.u32 %v253_v39, 16  ;;  %v2126_v59 = vunpack.i.l.bf16 %v2312_v48 }
  0xbd   : > { %v2331_v6 = vpop.trf.xlu0  ;;  %v2208_v60 = vmov 0   ;;  %v2131_v62 = vunpack.i.l.bf16 %v2324_v58  ;;  %v505_v63 = vshrl.u32 %v2358_v37, 16  ;;  %v509_v0 = vrot.slane %v507_v47, 1 }
  0xbe   : > { %v268_v61 = vrot.slane %v2208_v60, 7  ;;  %v512_v1 = vshll.u32 %v442_v35, 16  ;;  %v727_v2 = vsel %vm712_vm3, %v725_v49, %v726_v42  ;;  %v606_v3 = vor.u32 %v605_v50, %v601_v45 }
  0xbf   : > { %v610_v4 = vrot.slane %v608_v43, 1  ;;  %v2139_v8 = vunpack.i.h.bf16 %v2331_v6  ;;  %v362_v11 = vor.u32 %v360_v53, %v359_v54  ;;  %v2129_v13 = vunpack.i.h.bf16 %v2312_v48 }
  0xc0   : > { %767 = vrot.lane.b32.xlu1 %v724_v12, %s2206_s18  ;;  %v303_v12 = vrot.slane %v301_v55, 7  ;;  %v2134_v14 = vunpack.i.h.bf16 %v2324_v58  ;;  %v2382_v16 = vsel %vm2244_vm2, 0, %v268_v61  ;;  %v2386_v17 = vsel %vm2244_vm2, %v268_v61, 0 }
  0xc1   : > { %v2338_v21 = vpop.trf.xlu0  ;;  %v2388_v18 = vpack.c.bf16 %v2131_v62, %v2126_v59  ;;  %v510_v20 = vor.u32 %v509_v0, %v505_v63  ;;  %v514_v22 = vrot.slane %v512_v1, 1  ;;  %v457_v23 = vshrl.u32 %v2382_v16, 16 }
  0xc2   : > { %v2144_v10 = vunpack.i.h.bf16 %v2338_v21  ;;  %v611_v24 = vsel %vm455_vm4, %v606_v3, %v610_v4  ;;  %v451_v48 = vsel %vm2244_vm2, %v359_v54, 0  ;;  %v2397_v27 = vsel %vm2244_vm2, 0, %v362_v11 }
  0xc3   : > { %v306_v29 = vor.u32 %v304_v57, %v303_v12  ;;  %v459_v31 = vshll.u32 %v2382_v16, 16  ;;  %v254_v19 = vpack.c.bf16 %v2134_v14, %v2129_v13  ;;  %v367_v34 = vshll.u32 %v2388_v18, 16 }
  0xc4   : > { %670 = vrot.lane.b32.xlu1 %v599_v25, %s2207_s19  ;;  %v255_v26 = vpack.c.bf16 %v2144_v10, %v2139_v8  ;;  %v2136_v35 = vunpack.i.l.bf16 %v2331_v6  ;;  %v515_v38 = vsel %vm455_vm4, %v510_v20, %v514_v22  ;;  %v753_v40 = vrot.slane %v451_v48, 1 }
  0xc5   : > { %v2350_v33 = vpop.trf.xlu0  ;;  %v443_v42 = vsel %vm2244_vm2, %v303_v12, 0  ;;  %v752_v43 = vrot.slane %v2397_v27, 1  ;;  %v2414_v6 = vsel %vm2244_vm2, 0, %v306_v29  ;;  %v364_v49 = vshrl.u32 %v2388_v18, 16 }
  0xc6   : > { %v2146_v51 = vunpack.i.l.bf16 %v2350_v33  ;;  %v318_v39 = vshll.u32 %v255_v26, 16  ;;  %v729_v53 = vrot.slane %v443_v42, 1  ;;  %v620_v54 = vshll.u32 %v451_v48, 16 }
  0xc7   : > { %v728_v57 = vrot.slane %v2414_v6, 1  ;;  %v613_v59 = vshrl.u32 %v2397_v27, 16  ;;  %v754_v62 = vsel %vm712_vm3, %v752_v43, %v753_v40  ;;  %v519_v0 = vshll.u32 %v2414_v6, 16 }
  0xc8   : > { %654 = vrot.lane.b32.xlu1 %v503_v36, %s2207_s19  ;;  %v308_v1 = vshrl.u32 %v254_v19, 16  ;;  %v622_v8 = vrot.slane %v620_v54, 1  ;;  %v461_v11 = vrot.slane %v459_v31, 1  ;;  %v517_v13 = vshrl.u32 %v2414_v6, 16 }
  0xc9   : > { %v2362_v41 = vpop.trf.xlu0  ;;  %v730_v12 = vsel %vm712_vm3, %v728_v57, %v729_v53  ;;  %v524_v14 = vshll.u32 %v443_v42, 16  ;;  %v521_v22 = vrot.slane %v519_v0, 1  ;;  %v2149_v43 = vunpack.i.h.bf16 %v2350_v33 }
  0xca   : > { %v2151_v52 = vunpack.i.l.bf16 %v2362_v41  ;;  %v2154_v33 = vunpack.i.h.bf16 %v2362_v41 }
  0xcb   : > { %v526_v31 = vrot.slane %v524_v14, 1 }
  0xcc   : > { %785 = vrot.lane.b32.xlu1 %v751_v44, %s2206_s18  ;;  %v264_v7 = vpack.c.bf16 %v2151_v52, %v2146_v51  ;;  %v615_v44 = vshll.u32 %v2397_v27, 16  ;;  %v315_v51 = vshrl.u32 %v255_v26, 16  ;;  %v2141_v52 = vunpack.i.l.bf16 %v2338_v21 }
  0xcd   : > { %v366_v21 = vrot.slane %v364_v49, 7  ;;  %v464_v26 = vshll.u32 %v2386_v17, 16  ;;  %v2192_v49 = vld [vmem:[%s3006_s1 + $0x14] ss:$0 sps:$4 sm:$0xff]  }
  0xce   : > { %v381_v58 = vshll.u32 %v264_v7, 16  ;;  %v378_v25 = vshrl.u32 %v264_v7, 16  ;;  %v317_v61 = vrot.slane %v315_v51, 7  ;;  %v617_v63 = vrot.slane %v615_v44, 1  ;;  %2058 = vmatprep.subr.msk.bf16.mxu1 %vm933_vm5, %v2192_v49  ;;  %2057 = vmatprep.subr.msk.bf16.mxu0 %vm933_vm5, %v2192_v49 }
  0xcf   : > { %v311_v7 = vshll.u32 %v254_v19, 16  ;;  %v452_v19 = vsel %vm2244_vm2, %v366_v21, 0  ;;  %v466_v42 = vrot.slane %v464_v26, 1  ;;  %v935_v41 = vsel %vm933_vm5, %v2192_v49, 0 }
  0xd0   : > { %769 = vrot.lane.b32.xlu1 %v727_v2, %s2206_s18  ;;  %v380_v36 = vrot.slane %v378_v25, 7  ;;  %v320_v3 = vor.u32 %v318_v39, %v317_v61  ;;  %v2432_v4 = vsel %vm2244_vm2, %v317_v61, 0  ;;  %v618_v20 = vor.u32 %v617_v63, %v613_v59  ;;  %v2193_v59 = vld [vmem:[%s3006_s1 + $0xc] sm:$0xff]   ;;  %2055 = vmatpush3.bf16.msra.mxu1 %v935_v41 }
  0xd1   : > { %v735_v10 = vrot.slane %v2432_v4, 1  ;;  %v369_v25 = vor.u32 %v367_v34, %v366_v21  ;;  %v632_v61 = vshll.u32 %v452_v19, 16  ;;  %1946 = vmatpush3.bf16.msra.mxu0 %v935_v41  ;;  %2054 = vmatprep.subr.bf16.mxu1 %v2193_v59  ;;  %v548_v49 = vshll.u32 %v2432_v4, 16 }
  0xd2   : > { %v383_v45 = vor.u32 %v381_v58, %v380_v36  ;;  %v2409_v47 = vsel %vm2244_vm2, %v380_v36, 0  ;;  %v2440_v18 = vsel %vm2244_vm2, 0, %v320_v3  ;;  %v263_v58 = vpack.c.bf16 %v2141_v52, %v2136_v35  ;;  %1947 = vmatprep.subr.bf16.mxu0 %v2193_v59 }
  0xd3   : > { %v879_v50 = vrot.slane %v2409_v47, 1  ;;  %v734_v48 = vrot.slane %v2440_v18, 1  ;;  %v623_v36 = vsel %vm455_vm4, %v618_v20, %v622_v8  ;;  %v462_v35 = vor.u32 %v461_v11, %v457_v23  ;;  %v2493_v8 = vld [vmem:[%s3006_s1 + $0x20] ss:$0 sps:$4 sm:$0xff]  }
  0xd4   : > { %672 = vrot.lane.b32.xlu1 %v611_v24, %s2207_s19  ;;  %v2421_v55 = vsel %vm2244_vm2, 0, %v383_v45  ;;  %v310_v24 = vrot.slane %v308_v1, 7  ;;  %v2455_v34 = vsel %vm2244_vm2, 0, %v369_v25  ;;  %v371_v40 = vshrl.u32 %v263_v58, 16  ;;  %2056 = vmatpush3.bf16.msra.mxu1 %v2193_v59 }
  0xd5   : > { %v878_v60 = vrot.slane %v2421_v55, 1  ;;  %v736_v29 = vsel %vm712_vm3, %v734_v48, %v735_v10  ;;  %v755_v44 = vrot.slane %v2455_v34, 1  ;;  %v756_v45 = vrot.slane %v452_v19, 1  ;;  %1948 = vmatpush3.bf16.msra.mxu0 %v2193_v59 }
  0xd6   : > { %v313_v39 = vor.u32 %v311_v7, %v310_v24  ;;  %v627_v51 = vshll.u32 %v2455_v34, 16  ;;  %v467_v52 = vsel %vm455_vm4, %v462_v35, %v466_v42  ;;  %v374_v53 = vshll.u32 %v263_v58, 16  ;;  %v2488_v7 = vld [vmem:[%s3006_s1 + $0x8] ss:$0 sps:$4 sm:$0xff]   ;;  %2060 = vmatprep.subr.msk.bf16.mxu0 %vm933_vm5, %v2493_v8 }
  0xd7   : > { %v880_v2 = vsel %vm712_vm3, %v878_v60, %v879_v50  ;;  %v444_v54 = vsel %vm2244_vm2, %v310_v24, 0  ;;  %v373_v57 = vrot.slane %v371_v40, 7  ;;  %v625_v60 = vshrl.u32 %v2455_v34, 16  ;;  %2059 = vmatprep.subr.msk.bf16.mxu1 %vm933_vm5, %v2488_v7 }
  0xd8   : > { %656 = vrot.lane.b32.xlu1 %v515_v38, %s2207_s19  ;;  %881 = vrot.lane.b32.xlu0 %v880_v2, %s2206_s18  ;;  %v522_v38 = vor.u32 %v521_v22, %v517_v13  ;;  %v2465_v23 = vsel %vm2244_vm2, 0, %v313_v39  ;;  %v757_v63 = vsel %vm712_vm3, %v755_v44, %v756_v45  ;;  %v732_v1 = vrot.slane %v444_v54, 1 }
  0xd9   : > { %v731_v0 = vrot.slane %v2465_v23, 1  ;;  %v629_v21 = vrot.slane %v627_v51, 1  ;;  %v256_v2 = vpack.c.bf16 %v2154_v33, %v2149_v43  ;;  %v376_v3 = vor.u32 %v374_v53, %v373_v57 }
  0xda   : > { %v527_v50 = vsel %vm455_vm4, %v522_v38, %v526_v31  ;;  %v529_v10 = vshrl.u32 %v2465_v23, 16  ;;  %v634_v20 = vrot.slane %v632_v61, 1  ;;  %v453_v26 = vsel %vm2244_vm2, %v373_v57, 0 }
  0xdb   : > { %v733_v13 = vsel %vm712_vm3, %v731_v0, %v732_v1  ;;  %v630_v14 = vor.u32 %v629_v21, %v625_v60  ;;  %v322_v22 = vshrl.u32 %v256_v2, 16  ;;  %v2500_v24 = vsel %vm2244_vm2, 0, %v376_v3 }
  0xdc   : > { %787 = vrot.lane.b32.xlu1 %v754_v62, %s2206_s18  ;;  %775 = vrot.lane.b32.xlu0 %v736_v29, %s2206_s18  ;;  %v531_v62 = vshll.u32 %v2465_v23, 16  ;;  %v639_v29 = vshll.u32 %v2500_v24, 16  ;;  %v325_v31 = vshll.u32 %v256_v2, 16  ;;  %v759_v38 = vrot.slane %v453_v26, 1 }
  0xdd   : > { %v635_v25 = vsel %vm455_vm4, %v630_v14, %v634_v20  ;;  %v324_v19 = vrot.slane %v322_v22, 7  ;;  %v644_v39 = vshll.u32 %v453_v26, 16  ;;  %v758_v35 = vrot.slane %v2500_v24, 1 }
  0xde   : > { %v533_v11 = vrot.slane %v531_v62, 1  ;;  %v637_v40 = vshrl.u32 %v2500_v24, 16  ;;  %v641_v42 = vrot.slane %v639_v29, 1  ;;  %v543_v43 = vshll.u32 %v2440_v18, 16 }
  0xdf   : > { %v327_v44 = vor.u32 %v325_v31, %v324_v19  ;;  %v541_v45 = vshrl.u32 %v2440_v18, 16  ;;  %v760_v51 = vsel %vm712_vm3, %v758_v35, %v759_v38  ;;  %v646_v53 = vrot.slane %v644_v39, 1 }
  0xe0   : > { %771 = vrot.lane.b32.xlu1 %v730_v12, %s2206_s18  ;;  %648 = vrot.lane.b32.xlu0 %v467_v52, %s2207_s19  ;;  %v536_v12 = vshll.u32 %v444_v54, 16  ;;  %v534_v48 = vor.u32 %v533_v11, %v529_v10  ;;  %v642_v52 = vor.u32 %v641_v42, %v637_v40  ;;  %v545_v33 = vrot.slane %v543_v43, 1  ;;  %v2196_v43 = vld [vmem:[%s3006_s1] sm:$0xff]  }
  0xe1   : > { %v2523_v54 = vsel %vm2244_vm2, 0, %v327_v44  ;;  %v863_v57 = vshrl.u32 %v2421_v55, 16  ;;  %v870_v60 = vshll.u32 %v2409_v47, 16  ;;  %v550_v62 = vrot.slane %v548_v49, 1 }
  0xe2   : > { %v538_v58 = vrot.slane %v536_v12, 1  ;;  %v647_v4 = vsel %vm455_vm4, %v642_v52, %v646_v53  ;;  %v546_v61 = vor.u32 %v545_v33, %v541_v45  ;;  %v555_v41 = vshll.u32 %v2523_v54, 16 }
  0xe3   : > { %v872_v1 = vrot.slane %v870_v60, 1  ;;  %v553_v2 = vshrl.u32 %v2523_v54, 16  ;;  %v737_v15 = vrot.slane %v2523_v54, 1  ;;  %v713_v20 = vrot.slane %v2382_v16, 1 }
  0xe4   : > { %674 = vrot.lane.b32.xlu1 %v623_v36, %s2207_s19  ;;  %v539_v36 = vsel %vm455_vm4, %v534_v48, %v538_v58  ;;  %v551_v21 = vsel %vm455_vm4, %v546_v61, %v550_v62  ;;  %v557_v3 = vrot.slane %v555_v41, 1  ;;  %v714_v22 = vrot.slane %v2386_v17, 1 }
  0xe5   : > { %v1110_v42 = vsel %vm933_vm5, %v2488_v7, 0  ;;  %v2197_v7 = vld [vmem:[%s3006_s1 + $0x18] sm:$0xff]  }
  0xe6   : > { %v558_v11 = vor.u32 %v557_v3, %v553_v2  ;;  %v715_v58 = vsel %vm712_vm3, %v713_v20, %v714_v22 }
  0xe8   : > { %658 = vrot.lane.b32.xlu1 %v527_v50, %s2207_s19  ;;  %v865_v50 = vshll.u32 %v2421_v55, 16 }
  0xea   : > { %v867_v59 = vrot.slane %v865_v50, 1 }
  0xec   : > { %789 = vrot.lane.b32.xlu1 %v757_v63, %s2206_s18  ;;  %v446_v63 = vsel %vm2244_vm2, %v324_v19, 0  ;;  %v868_v0 = vor.u32 %v867_v59, %v863_v57 }
  0xed   : > { %v560_v10 = vshll.u32 %v446_v63, 16  ;;  %v738_v14 = vrot.slane %v446_v63, 1 }
  0xee   : > { %v873_v47 = vsel %vm455_vm4, %v868_v0, %v872_v1 }
  0xef   : > { %v562_v12 = vrot.slane %v560_v10, 1  ;;  %v739_v48 = vsel %vm712_vm3, %v737_v15, %v738_v14 }
  0xf0   : > { %773 = vrot.lane.b32.xlu1 %v733_v13, %s2206_s18 }
  0xf1   : > { %v563_v13 = vsel %vm455_vm4, %v558_v11, %v562_v12 }
  0xf4   : > { %676 = vrot.lane.b32.xlu1 %v635_v25, %s2207_s19 }
  0xf8   : > { %660 = vrot.lane.b32.xlu1 %v539_v36, %s2207_s19 }
  0xfc   : > { %791 = vrot.lane.b32.xlu1 %v760_v51, %s2206_s18 }
 0x100   : > { %678 = vrot.lane.b32.xlu1 %v647_v4, %s2207_s19 }
 0x104   : > { %662 = vrot.lane.b32.xlu1 %v551_v21, %s2207_s19 }
 0x108   : > { %874 = vrot.lane.b32.xlu1 %v873_v47, %s2207_s19 }
 0x10c   : > { %664 = vrot.lane.b32.xlu1 %v563_v13, %s2207_s19 }
 0x110   : > { %777 = vrot.lane.b32.xlu1 %v739_v48, %s2206_s18 }
 0x112   : > { %v780_v25 = vpop.permute.xlu1 %779 }
 0x114   : > { %761 = vrot.lane.b32.xlu1 %v715_v58, %s2206_s18 }
 0x116   : > { %v764_v26 = vpop.permute.xlu1 %763  ;;  %v667_v29 = vpop.permute.xlu0 %666 }
 0x117   : > { %v813_v31 = vsel %vm793_vm6, %v2252_v28, %v667_v29 }
 0x118   : > { %v2549_v19 = vsel %vm826_vm7, %v813_v31, %v780_v25 }
 0x119   : > { %1965 = vmatprep.mubr.msk.bf16.mxu1 %vm900_vm8, %v2549_v19 }
 0x11a   : > { %v651_v17 = vpop.permute.xlu1 %650 }
 0x11b   : > { %v797_v36 = vsel %vm793_vm6, %v2256_v30, %v651_v17 }
 0x11c   : > { %v2556_v38 = vsel %vm826_vm7, %v797_v36, %v764_v26 }
 0x11d   : > { %1949 = vmatprep.mubr.msk.bf16.mxu0 %vm900_vm8, %v2556_v38 }
 0x11e   : > { %v782_v39 = vpop.permute.xlu1 %781 }
 0x122   : > { %v766_v35 = vpop.permute.xlu1 %765 }
 0x126   : > { %v669_v40 = vpop.permute.xlu1 %668 }
 0x127   : > { %v815_v28 = vsel %vm793_vm6, %v2280_v5, %v669_v40  ;;  %v1287_v5 = vsel %vm933_vm5, %v2493_v8, 0 }
 0x128   : > { %v2568_v30 = vsel %vm826_vm7, %v815_v28, %v782_v39 }
 0x129   : > { %1966 = vmatmul.mubr.msk.bf16.vlgmr.msra.gmra.mxu1 %vm900_vm8, %v2568_v30 }
 0x12a   : > { %v653_v44 = vpop.permute.xlu1 %652  ;;  %1982 = vmatpush3.bf16.msra.mxu1 %v1110_v42 }
 0x12b   : > { %v799_v45 = vsel %vm793_vm6, %v2285_v9, %v653_v44  ;;  %1983 = vmatprep.subr.bf16.mxu1 %v2196_v43 }
 0x12c   : > { %v2580_v49 = vsel %vm826_vm7, %v799_v45, %v766_v35 }
 0x12d   : > { %1950 = vmatmul.mubr.msk.bf16.vlgmr.msra.gmra.mxu0 %vm900_vm8, %v2580_v49 }
 0x12e   : > { %v784_v50 = vpop.permute.xlu1 %783  ;;  %2018 = vmatpush3.bf16.msra.mxu0 %v1287_v5  ;;  %1984 = vmatpush3.bf16.msra.mxu1 %v2196_v43 }
 0x12f   : > { %2019 = vmatprep.subr.bf16.mxu0 %v2197_v7 }
 0x132   : > { %v768_v51 = vpop.permute.xlu1 %767  ;;  %2020 = vmatpush3.bf16.msra.mxu0 %v2197_v7 }
 0x136   : > { %v671_v9 = vpop.permute.xlu1 %670 }
 0x137   : > { %v817_v8 = vsel %vm793_vm6, %v2310_v46, %v671_v9 }
 0x138   : > { %v2587_v52 = vsel %vm826_vm7, %v817_v8, %v784_v50 }
 0x139   : > { %1969 = vmatprep.mubr.msk.bf16.mxu1 %vm900_vm8, %v2587_v52 }
 0x13a   : > { %v655_v53 = vpop.permute.xlu1 %654 }
 0x13b   : > { %v801_v33 = vsel %vm793_vm6, %v2322_v56, %v655_v53 }
 0x13c   : > { %v834_v57 = vsel %vm826_vm7, %v801_v33, %v768_v51 }
 0x13d   : > { %1953 = vmatprep.mubr.msk.bf16.mxu0 %vm900_vm8, %v834_v57 }
 0x13e   : > { %v786_v59 = vpop.permute.xlu1 %785 }
 0x142   : > { %v770_v60 = vpop.permute.xlu1 %769 }
 0x146   : > { %v673_v4 = vpop.permute.xlu1 %672 }
 0x147   : > { %v819_v46 = vsel %vm793_vm6, %v2348_v32, %v673_v4 }
 0x148   : > { %v2598_v61 = vsel %vm826_vm7, %v819_v46, %v786_v59 }
 0x149   : > { %1970 = vmatmul.mubr.msk.bf16.gmra.mxu1 %vm900_vm8, %v2598_v61 }
 0x14a   : > { %v657_v62 = vpop.permute.xlu1 %656  ;;  %v882_v20 = vpop.permute.xlu0 %881 }
 0x14b   : > { %v803_v56 = vsel %vm793_vm6, %v2358_v37, %v657_v62 }
 0x14c   : > { %v836_v41 = vsel %vm826_vm7, %v803_v56, %v770_v60 }
 0x14d   : > { %1954 = vmatmul.mubr.msk.bf16.gmra.mxu0 %vm900_vm8, %v836_v41 }
 0x14e   : > { %v788_v63 = vpop.permute.xlu1 %787  ;;  %v776_v25 = vpop.permute.xlu0 %775 }
 0x152   : > { %v772_v0 = vpop.permute.xlu1 %771  ;;  %v649_v36 = vpop.permute.xlu0 %648 }
 0x153   : > { %v795_v40 = vsel %vm793_vm6, %v2382_v16, %v649_v36 }
 0x156   : > { %v675_v1 = vpop.permute.xlu1 %674 }
 0x157   : > { %v821_v32 = vsel %vm793_vm6, %v2397_v27, %v675_v1 }
 0x158   : > { %v2609_v21 = vsel %vm826_vm7, %v821_v32, %v788_v63 }
 0x159   : > { %1973 = vmatprep.mubr.msk.bf16.mxu1 %vm900_vm8, %v2609_v21 }
 0x15a   : > { %v659_v2 = vpop.permute.xlu1 %658 }
 0x15b   : > { %v805_v37 = vsel %vm793_vm6, %v2414_v6, %v659_v2 }
 0x15c   : > { %v838_v3 = vsel %vm826_vm7, %v805_v37, %v772_v0 }
 0x15d   : > { %1957 = vmatprep.mubr.msk.bf16.mxu0 %vm900_vm8, %v838_v3 }
 0x15e   : > { %v790_v10 = vpop.permute.xlu1 %789 }
 0x162   : > { %v774_v47 = vpop.permute.xlu1 %773 }
 0x166   : > { %v677_v11 = vpop.permute.xlu1 %676 }
 0x167   : > { %v823_v27 = vsel %vm793_vm6, %v2455_v34, %v677_v11 }
 0x168   : > { %v856_v12 = vsel %vm826_vm7, %v823_v27, %v790_v10 }
 0x169   : > { %1974 = vmatmul.mubr.msk.bf16.gmra.mxu1 %vm900_vm8, %v856_v12 }
 0x16a   : > { %v661_v13 = vpop.permute.xlu1 %660 }
 0x16b   : > { %v807_v15 = vsel %vm793_vm6, %v2465_v23, %v661_v13 }
 0x16c   : > { %v840_v6 = vsel %vm826_vm7, %v807_v15, %v774_v47 }
 0x16d   : > { %1958 = vmatmul.mubr.msk.bf16.gmra.mxu0 %vm900_vm8, %v840_v6 }
 0x16e   : > { %v792_v14 = vpop.permute.xlu1 %791 }
 0x172   : > { %v679_v22 = vpop.permute.xlu1 %678 }
 0x173   : > { %v825_v48 = vsel %vm793_vm6, %v2500_v24, %v679_v22 }
 0x174   : > { %v858_v34 = vsel %vm826_vm7, %v825_v48, %v792_v14 }
 0x175   : > { %1977 = vmatprep.mubr.msk.bf16.mxu1 %vm900_vm8, %v858_v34 }
 0x176   : > { %v663_v58 = vpop.permute.xlu1 %662 }
 0x177   : > { %v809_v26 = vsel %vm793_vm6, %v2440_v18, %v663_v58 }
 0x178   : > { %v842_v23 = vsel %vm826_vm7, %v809_v26, %v776_v25 }
 0x179   : > { %1961 = vmatprep.mubr.msk.bf16.mxu0 %vm900_vm8, %v842_v23 }
 0x17a   : > { %v875_v29 = vpop.permute.xlu1 %874 }
 0x17b   : > { %v884_v31 = vsel %vm793_vm6, %v2421_v55, %v875_v29 }
 0x17c   : > { %v886_v17 = vsel %vm826_vm7, %v884_v31, %v882_v20 }
 0x17d   : > { %1978 = vmatmul.mubr.msk.bf16.gmra.mxu1 %vm900_vm8, %v886_v17 }
 0x17e   : > { %v665_v24 = vpop.permute.xlu1 %664 }
 0x17f   : > { %v811_v39 = vsel %vm793_vm6, %v2523_v54, %v665_v24 }
 0x182   : > { %v778_v35 = vpop.permute.xlu1 %777 }
 0x183   : > { %v844_v18 = vsel %vm826_vm7, %v811_v39, %v778_v35 }
 0x184   : > { %1962 = vmatmul.mubr.msk.bf16.gmra.mxu0 %vm900_vm8, %v844_v18 }
 0x185   : > { %2021 = vmatprep.mubr.msk.bf16.mxu0 %vm900_vm8, %v2580_v49 }
 0x186   : > { %v762_v55 = vpop.permute.xlu1 %761 }
 0x187   : > { %v828_v28 = vsel %vm826_vm7, %v795_v40, %v762_v55 }
 0x188   : > { %1985 = vmatprep.mubr.msk.bf16.mxu1 %vm900_vm8, %v828_v28 }
 0x189   : > { %1986 = vmatmul.mubr.msk.bf16.vlgmr.msra.gmra.mxu1 %vm900_vm8, %v2556_v38 }
 0x18a   : > { %1989 = vmatprep.mubr.msk.bf16.mxu1 %vm900_vm8, %v2580_v49 }
 0x18c   : > { %2022 = vmatmul.mubr.msk.bf16.vlgmr.msra.gmra.mxu0 %vm900_vm8, %v834_v57 }
 0x18d   : > { %2025 = vmatprep.mubr.msk.bf16.mxu0 %vm900_vm8, %v836_v41 }
 0x191   : > { %1990 = vmatmul.mubr.msk.bf16.gmra.mxu1 %vm900_vm8, %v834_v57 }
 0x192   : > { %1993 = vmatprep.mubr.msk.bf16.mxu1 %vm900_vm8, %v836_v41 }
 0x194   : > { %2026 = vmatmul.mubr.msk.bf16.gmra.mxu0 %vm900_vm8, %v838_v3 }
 0x195   : > { %2029 = vmatprep.mubr.msk.bf16.mxu0 %vm900_vm8, %v840_v6 }
 0x199   : > { %1994 = vmatmul.mubr.msk.bf16.gmra.mxu1 %vm900_vm8, %v838_v3 }
 0x19a   : > { %1997 = vmatprep.mubr.msk.bf16.mxu1 %vm900_vm8, %v840_v6 }
 0x19c   : > { %2030 = vmatmul.mubr.msk.bf16.gmra.mxu0 %vm900_vm8, %v842_v23 }
 0x19d   : > { %2033 = vmatprep.mubr.msk.bf16.mxu0 %vm900_vm8, %v844_v18 }
 0x1a1   : > { %1998 = vmatmul.mubr.msk.bf16.gmra.mxu1 %vm900_vm8, %v842_v23 }
 0x1a2   : > { %2001 = vmatprep.mubr.msk.bf16.mxu1 %vm900_vm8, %v844_v18 }
 0x1a4   : > { %2034 = vmatmul.mubr.msk.bf16.gmra.mxu0 %vm900_vm8, %v2549_v19 }
 0x1a5   : > { %2037 = vmatprep.mubr.msk.bf16.mxu0 %vm900_vm8, %v2568_v30 }
 0x1a9   : > { %2002 = vmatmul.mubr.msk.bf16.gmra.mxu1 %vm900_vm8, %v2549_v19 }
 0x1aa   : > { %2005 = vmatprep.mubr.msk.bf16.mxu1 %vm900_vm8, %v2568_v30 }
 0x1ac   : > { %2038 = vmatmul.mubr.msk.bf16.gmra.mxu0 %vm900_vm8, %v2587_v52 }
 0x1ad   : > { %2041 = vmatprep.mubr.msk.bf16.mxu0 %vm900_vm8, %v2598_v61 }
 0x1b1   : > { %2006 = vmatmul.mubr.msk.bf16.gmra.mxu1 %vm900_vm8, %v2587_v52 }
 0x1b2   : > { %2009 = vmatprep.mubr.msk.bf16.mxu1 %vm900_vm8, %v2598_v61 }
 0x1b4   : > { %2042 = vmatmul.mubr.msk.bf16.gmra.mxu0 %vm900_vm8, %v2609_v21 }
 0x1b5   : > { %2045 = vmatprep.mubr.msk.bf16.mxu0 %vm900_vm8, %v856_v12 }
 0x1b9   : > { %2010 = vmatmul.mubr.msk.bf16.gmra.mxu1 %vm900_vm8, %v2609_v21 }
 0x1ba   : > { %2013 = vmatprep.mubr.msk.bf16.mxu1 %vm900_vm8, %v856_v12 }
 0x1bc   : > { %2046 = vmatmul.mubr.msk.bf16.gmra.mxu0 %vm900_vm8, %v858_v34 }
 0x1bd   : > { %2049 = vmatprep.mubr.msk.bf16.mxu0 %vm900_vm8, %v886_v17 }
 0x1c1   : > { %2014 = vmatmul.mubr.msk.bf16.gmra.mxu1 %vm900_vm8, %v858_v34 }
 0x1c4   : > { %2050 = vmatmul.mubr.msk.bf16.gmra.mxu0 %vm900_vm8, %v828_v28 }
 0x1e9   : > { %v2689_v16 = vpop.f32.mrf.mxu1 }
 0x1eb   : > { %v2691_v54 = vpop.f32.mrf.mxu1 }
 0x1ed   : > { %v1951_v19 = vpop.f32.mrf.mxu0  ;;  %v2693_v38 = vpop.f32.mrf.mxu1 }
 0x1ef   : > { %v971_v42 = vpop.f32.mrf.mxu0  ;;  %v2695_v43 = vpop.f32.mrf.mxu1 }
 0x1f1   : > { %v1952_v44 = vpop.f32.mrf.mxu0 }
 0x1f3   : > { %v974_v5 = vpop.f32.mrf.mxu0 }
 0x209   : > { %v2697_v30 = vpop.f32.mrf.mxu1 }
 0x20b   : > { %v2699_v45 = vpop.f32.mrf.mxu1 }
 0x20d   : > { %v1955_v7 = vpop.f32.mrf.mxu0  ;;  %v2701_v49 = vpop.f32.mrf.mxu1 }
 0x20f   : > { %v987_v50 = vpop.f32.mrf.mxu0  ;;  %v2703_v51 = vpop.f32.mrf.mxu1 }
 0x211   : > { %v1956_v8 = vpop.f32.mrf.mxu0 }
 0x213   : > { %v990_v53 = vpop.f32.mrf.mxu0 }
 0x229   : > { %v2705_v9 = vpop.f32.mrf.mxu1 }
 0x22b   : > { %v2707_v52 = vpop.f32.mrf.mxu1 }
 0x22d   : > { %v2709_v33 = vpop.f32.mrf.mxu0  ;;  %v2711_v57 = vpop.f32.mrf.mxu1 }
 0x22f   : > { %v2713_v59 = vpop.f32.mrf.mxu0  ;;  %v2715_v60 = vpop.f32.mrf.mxu1 }
 0x231   : > { %v2719_v46 = vpop.f32.mrf.mxu0 }
 0x233   : > { %v2723_v62 = vpop.f32.mrf.mxu0 }
 0x23d   : > { %v2717_v4 = vpop.f32.mrf.mxu1 }
 0x23f   : > { %v2721_v61 = vpop.f32.mrf.mxu1 }
 0x241   : > { %v2725_v56 = vpop.f32.mrf.mxu1 }
 0x243   : > { %v2731_v0 = vpop.f32.mrf.mxu1 }
 0x244   : > { %v2727_v41 = vpop.f32.mrf.mxu0 }
 0x246   : > { %v2729_v63 = vpop.f32.mrf.mxu0 }
 0x248   : > { %v2733_v1 = vpop.f32.mrf.mxu0 }
 0x249   : > { %v1987_v32 = vpop.f32.mrf.mxu1 }
 0x24a   : > { %v2735_v21 = vpop.f32.mrf.mxu0  ;;  %v1155_v10 = vadd.f32 %v1987_v32, %v1951_v19 }
 0x24b   : > { %v1146_v2 = vpop.f32.mrf.mxu1 }
 0x24c   : > { %v1147_v37 = vadd.f32 %v1146_v2, %v971_v42  ;;  %v2023_v3 = vpop.f32.mrf.mxu0 }
 0x24d   : > { %v1988_v47 = vpop.f32.mrf.mxu1  ;;  %v2739_v14 = vadd.f32 %v2023_v3, %v1155_v10 }
 0x24e   : > { %v1323_v11 = vpop.f32.mrf.mxu0  ;;  %v1158_v27 = vadd.f32 %v1988_v47, %v1952_v44 }
 0x24f   : > { %v2737_v12 = vadd.f32 %v1323_v11, %v1147_v37  ;;  %v1149_v13 = vpop.f32.mrf.mxu1  ;;  %v1553_v31 = vmul.f32 %v2739_v14, %v2739_v14  ;;  %v1485_v35 = vsel %vm793_vm6, %v2739_v14, 0.0 }
 0x250   : > { %v1150_v15 = vadd.f32 %v1149_v13, %v974_v5  ;;  %v2024_v6 = vpop.f32.mrf.mxu0 }
 0x251   : > { %v1991_v20 = vpop.f32.mrf.mxu1  ;;  %v1551_v22 = vmul.f32 %v2737_v12, %v2737_v12  ;;  %v2743_v34 = vadd.f32 %v2024_v6, %v1158_v27  ;;  %v1482_v17 = vsel %vm793_vm6, %v2737_v12, 0.0  ;;  %v1586_v3 = vsel %vm793_vm6, %v1553_v31, 0.0 }
 0x252   : > { %v1326_v48 = vpop.f32.mrf.mxu0  ;;  %v1171_v26 = vadd.f32 %v1991_v20, %v1955_v7 }
 0x253   : > { %v2745_v58 = vadd.f32 %v1326_v48, %v1150_v15  ;;  %v1162_v25 = vpop.f32.mrf.mxu1  ;;  %v1583_v18 = vsel %vm793_vm6, %v1551_v22, 0.0  ;;  %v1554_v28 = vmul.f32 %v2743_v34, %v2743_v34  ;;  %v1487_v10 = vsel %vm793_vm6, %v2743_v34, 0.0 }
 0x254   : > { %v1163_v23 = vadd.f32 %v1162_v25, %v987_v50  ;;  %v2027_v29 = vpop.f32.mrf.mxu0 }
 0x255   : > { %v1483_v24 = vsel %vm793_vm6, %v2745_v58, 0.0  ;;  %v1552_v36 = vmul.f32 %v2745_v58, %v2745_v58  ;;  %v1992_v39 = vpop.f32.mrf.mxu1  ;;  %v2763_v32 = vadd.f32 %v2027_v29, %v1171_v26  ;;  %v1588_v15 = vsel %vm793_vm6, %v1554_v28, 0.0 }
 0x256   : > { %v1484_v40 = vadd.f32 %v1483_v24, %v1482_v17  ;;  %v1339_v55 = vpop.f32.mrf.mxu0  ;;  %v1174_v42 = vadd.f32 %v1992_v39, %v1956_v8 }
 0x257   : > { %v1584_v19 = vsel %vm793_vm6, %v1552_v36, 0.0  ;;  %v2761_v44 = vadd.f32 %v1339_v55, %v1163_v23  ;;  %v1165_v5 = vpop.f32.mrf.mxu1  ;;  %v1557_v48 = vmul.f32 %v2763_v32, %v2763_v32 }
 0x258   : > { %v1486_v7 = vadd.f32 %v1485_v35, %v1484_v40  ;;  %v1585_v50 = vadd.f32 %v1584_v19, %v1583_v18  ;;  %v1166_v2 = vadd.f32 %v1165_v5, %v990_v53  ;;  %v2028_v37 = vpop.f32.mrf.mxu0  ;;  %v1493_v35 = vsel %vm793_vm6, %v2763_v32, 0.0 }
 0x259   : > { %v1555_v47 = vmul.f32 %v2761_v44, %v2761_v44  ;;  %v1995_v11 = vpop.f32.mrf.mxu1  ;;  %v1489_v6 = vsel %vm793_vm6, %v2761_v44, 0.0  ;;  %v2773_v20 = vadd.f32 %v2028_v37, %v1174_v42  ;;  %v1594_v37 = vsel %vm793_vm6, %v1557_v48, 0.0 }
 0x25a   : > { %v1587_v27 = vadd.f32 %v1586_v3, %v1585_v50  ;;  %v1488_v8 = vadd.f32 %v1487_v10, %v1486_v7  ;;  %v1342_v13 = vpop.f32.mrf.mxu0  ;;  %v1187_v17 = vadd.f32 %v1995_v11, %v2709_v33 }
 0x25b   : > { %v2775_v53 = vadd.f32 %v1342_v13, %v1166_v2  ;;  %v1178_v22 = vpop.f32.mrf.mxu1  ;;  %v1590_v31 = vsel %vm793_vm6, %v1555_v47, 0.0  ;;  %v1495_v3 = vsel %vm793_vm6, %v2773_v20, 0.0 }
 0x25c   : > { %v1490_v25 = vadd.f32 %v1489_v6, %v1488_v8  ;;  %v1589_v26 = vadd.f32 %v1588_v15, %v1587_v27  ;;  %v1179_v23 = vadd.f32 %v1178_v22, %v2713_v59  ;;  %v2031_v29 = vpop.f32.mrf.mxu0  ;;  %v1558_v59 = vmul.f32 %v2773_v20, %v2773_v20 }
 0x25d   : > { %v1491_v24 = vsel %vm793_vm6, %v2775_v53, 0.0  ;;  %v1556_v36 = vmul.f32 %v2775_v53, %v2775_v53  ;;  %v1996_v39 = vpop.f32.mrf.mxu1  ;;  %v2798_v10 = vadd.f32 %v2031_v29, %v1187_v17 }
 0x25e   : > { %v1591_v18 = vadd.f32 %v1590_v31, %v1589_v26  ;;  %v1492_v40 = vadd.f32 %v1491_v24, %v1490_v25  ;;  %v1355_v55 = vpop.f32.mrf.mxu0  ;;  %v1190_v33 = vadd.f32 %v1996_v39, %v2719_v46  ;;  %v1596_v13 = vsel %vm793_vm6, %v1558_v59, 0.0 }
 0x25f   : > { %v1592_v28 = vsel %vm793_vm6, %v1556_v36, 0.0  ;;  %v2792_v19 = vadd.f32 %v1355_v55, %v1179_v23  ;;  %v1181_v42 = vpop.f32.mrf.mxu1  ;;  %v1561_v31 = vmul.f32 %v2798_v10, %v2798_v10 }
 0x260   : > { %v1494_v5 = vadd.f32 %v1493_v35, %v1492_v40  ;;  %v1593_v7 = vadd.f32 %v1592_v28, %v1591_v18  ;;  %v1182_v50 = vadd.f32 %v1181_v42, %v2723_v62  ;;  %v2032_v2 = vpop.f32.mrf.mxu0  ;;  %v1501_v35 = vsel %vm793_vm6, %v2798_v10, 0.0 }
 0x261   : > { %v1559_v47 = vmul.f32 %v2792_v19, %v2792_v19  ;;  %v1999_v11 = vpop.f32.mrf.mxu1  ;;  %v1497_v62 = vsel %vm793_vm6, %v2792_v19, 0.0  ;;  %v2805_v15 = vadd.f32 %v2032_v2, %v1190_v33 }
 0x262   : > { %v1595_v46 = vadd.f32 %v1594_v37, %v1593_v7  ;;  %v1496_v27 = vadd.f32 %v1495_v3, %v1494_v5  ;;  %v1358_v8 = vpop.f32.mrf.mxu0  ;;  %v1203_v26 = vadd.f32 %v1999_v11, %v2727_v41  ;;  %v1602_v37 = vsel %vm793_vm6, %v1561_v31, 0.0 }
 0x263   : > { %v2807_v6 = vadd.f32 %v1358_v8, %v1182_v50  ;;  %v1194_v22 = vpop.f32.mrf.mxu1  ;;  %v1598_v17 = vsel %vm793_vm6, %v1559_v47, 0.0  ;;  %v1503_v3 = vsel %vm793_vm6, %v2805_v15, 0.0 }
 0x264   : > { %v1498_v48 = vadd.f32 %v1497_v62, %v1496_v27  ;;  %v1597_v25 = vadd.f32 %v1596_v13, %v1595_v46  ;;  %v1195_v23 = vadd.f32 %v1194_v22, %v2729_v63  ;;  %v2035_v29 = vpop.f32.mrf.mxu0  ;;  %v1562_v63 = vmul.f32 %v2805_v15, %v2805_v15 }
 0x265   : > { %v1499_v24 = vsel %vm793_vm6, %v2807_v6, 0.0  ;;  %v1560_v36 = vmul.f32 %v2807_v6, %v2807_v6  ;;  %v2000_v39 = vpop.f32.mrf.mxu1  ;;  %v2826_v7 = vadd.f32 %v2035_v29, %v1203_v26 }
 0x266   : > { %v1599_v18 = vadd.f32 %v1598_v17, %v1597_v25  ;;  %v1500_v41 = vadd.f32 %v1499_v24, %v1498_v48  ;;  %v1371_v40 = vpop.f32.mrf.mxu0  ;;  %v1206_v59 = vadd.f32 %v2000_v39, %v2733_v1  ;;  %v1604_v8 = vsel %vm793_vm6, %v1562_v63, 0.0 }
 0x267   : > { %v1600_v55 = vsel %vm793_vm6, %v1560_v36, 0.0  ;;  %v2824_v28 = vadd.f32 %v1371_v40, %v1195_v23  ;;  %v1197_v33 = vpop.f32.mrf.mxu1  ;;  %v1565_v48 = vmul.f32 %v2826_v7, %v2826_v7  ;;  %v1509_v40 = vsel %vm793_vm6, %v2826_v7, 0.0 }
 0x268   : > { %v1502_v42 = vadd.f32 %v1501_v35, %v1500_v41  ;;  %v1601_v5 = vadd.f32 %v1600_v55, %v1599_v18  ;;  %v1198_v50 = vadd.f32 %v1197_v33, %v2735_v21  ;;  %v2036_v2 = vpop.f32.mrf.mxu0 }
 0x269   : > { %v1563_v47 = vmul.f32 %v2824_v28, %v2824_v28  ;;  %v2003_v11 = vpop.f32.mrf.mxu1  ;;  %v1505_v13 = vsel %vm793_vm6, %v2824_v28, 0.0  ;;  %v2837_v62 = vadd.f32 %v2036_v2, %v1206_v59  ;;  %v1610_v2 = vsel %vm793_vm6, %v1565_v48, 0.0 }
 0x26a   : > { %v1603_v1 = vadd.f32 %v1602_v37, %v1601_v5  ;;  %v1504_v46 = vadd.f32 %v1503_v3, %v1502_v42  ;;  %v1374_v27 = vpop.f32.mrf.mxu0  ;;  %v1219_v17 = vadd.f32 %v2003_v11, %v2689_v16 }
 0x26b   : > { %v2839_v21 = vadd.f32 %v1374_v27, %v1198_v50  ;;  %v1210_v22 = vpop.f32.mrf.mxu1  ;;  %v1606_v31 = vsel %vm793_vm6, %v1563_v47, 0.0  ;;  %v1511_v37 = vsel %vm793_vm6, %v2837_v62, 0.0 }
 0x26c   : > { %v1506_v25 = vadd.f32 %v1505_v13, %v1504_v46  ;;  %v1605_v26 = vadd.f32 %v1604_v8, %v1603_v1  ;;  %v1211_v23 = vadd.f32 %v1210_v22, %v2691_v54  ;;  %v2039_v29 = vpop.f32.mrf.mxu0  ;;  %v1566_v54 = vmul.f32 %v2837_v62, %v2837_v62 }
 0x26d   : > { %v1507_v24 = vsel %vm793_vm6, %v2839_v21, 0.0  ;;  %v1564_v36 = vmul.f32 %v2839_v21, %v2839_v21  ;;  %v2004_v39 = vpop.f32.mrf.mxu1  ;;  %v2860_v3 = vadd.f32 %v2039_v29, %v1219_v17 }
 0x26e   : > { %v1607_v35 = vadd.f32 %v1606_v31, %v1605_v26  ;;  %v1508_v18 = vadd.f32 %v1507_v24, %v1506_v25  ;;  %v1387_v41 = vpop.f32.mrf.mxu0  ;;  %v1222_v16 = vadd.f32 %v2004_v39, %v2693_v38  ;;  %v1612_v38 = vsel %vm793_vm6, %v1566_v54, 0.0 }
 0x26f   : > { %v1608_v63 = vsel %vm793_vm6, %v1564_v36, 0.0  ;;  %v1213_v55 = vpop.f32.mrf.mxu1  ;;  %v1466_v42 = vadd.f32 %v1387_v41, %v1211_v23  ;;  %v1569_v23 = vmul.f32 %v2860_v3, %v2860_v3 }
 0x270   : > { %v1510_v59 = vadd.f32 %v1509_v40, %v1508_v18  ;;  %v1609_v33 = vadd.f32 %v1608_v63, %v1607_v35  ;;  %v1214_v5 = vadd.f32 %v1213_v55, %v2695_v43  ;;  %v2040_v50 = vpop.f32.mrf.mxu0  ;;  %v1517_v40 = vsel %vm793_vm6, %v2860_v3, 0.0 }
 0x271   : > { %v2007_v47 = vpop.f32.mrf.mxu1  ;;  %v1567_v46 = vmul.f32 %v1466_v42, %v1466_v42  ;;  %v1513_v8 = vsel %vm793_vm6, %v1466_v42, 0.0  ;;  %v2864_v13 = vadd.f32 %v2040_v50, %v1222_v16  ;;  %v2155_v17 = vpack.i.bf16 %v1466_v42, %v2737_v12 }
 0x272   : > { %v1611_v11 = vadd.f32 %v1610_v2, %v1609_v33  ;;  %v1512_v1 = vadd.f32 %v1511_v37, %v1510_v59  ;;  %v1390_v27 = vpop.f32.mrf.mxu0  ;;  %v1235_v39 = vadd.f32 %v2007_v47, %v2697_v30  ;;  %v1618_v2 = vsel %vm793_vm6, %v1569_v23, 0.0 }
 0x273   : > { %v1226_v43 = vpop.f32.mrf.mxu1  ;;  %v1467_v48 = vadd.f32 %v1390_v27, %v1214_v5  ;;  %v1614_v29 = vsel %vm793_vm6, %v1567_v46, 0.0  ;;  %v1570_v54 = vmul.f32 %v2864_v13, %v2864_v13  ;;  %2156 = vxpose.xlu0.b32.start [1/16] (narrow) %v2155_v17, 8 }
 0x274   : > { %v1514_v22 = vadd.f32 %v1513_v8, %v1512_v1  ;;  %v1613_v25 = vadd.f32 %v1612_v38, %v1611_v11  ;;  %v2043_v26 = vpop.f32.mrf.mxu0  ;;  %v1227_v31 = vadd.f32 %v1226_v43, %v2699_v45 }
 0x275   : > { %v2008_v24 = vpop.f32.mrf.mxu1  ;;  %v1515_v35 = vsel %vm793_vm6, %v1467_v48, 0.0  ;;  %v1568_v18 = vmul.f32 %v1467_v48, %v1467_v48  ;;  %v2157_v63 = vpack.i.bf16 %v1467_v48, %v2745_v58  ;;  %v1519_v58 = vsel %vm793_vm6, %v2864_v13, 0.0 }
 0x276   : > { %v1615_v36 = vadd.f32 %v1614_v29, %v1613_v25  ;;  %v1403_v41 = vpop.f32.mrf.mxu0  ;;  %v1516_v16 = vadd.f32 %v1515_v35, %v1514_v22  ;;  %v1238_v55 = vadd.f32 %v2008_v24, %v2701_v49  ;;  %v2886_v37 = vadd.f32 %v2043_v26, %v1235_v39 }
 0x277   : > { %v1229_v45 = vpop.f32.mrf.mxu1  ;;  %v1616_v12 = vsel %vm793_vm6, %v1568_v18, 0.0  ;;  %v2880_v30 = vadd.f32 %v1403_v41, %v1227_v31  ;;  %v2159_v49 = vpack.i.bf16 %v2860_v3, %v2739_v14  ;;  %2158 = vxpose.xlu0.b32.cont [2/16] (narrow) %v2157_v63, 8  ;;  %v1620_v38 = vsel %vm793_vm6, %v1570_v54, 0.0 }
 0x278   : > { %v1230_v59 = vadd.f32 %v1229_v45, %v2703_v51  ;;  %v2044_v33 = vpop.f32.mrf.mxu0  ;;  %v1518_v42 = vadd.f32 %v1517_v40, %v1516_v16  ;;  %v1617_v5 = vadd.f32 %v1616_v12, %v1615_v36  ;;  %v1573_v29 = vmul.f32 %v2886_v37, %v2886_v37 }
 0x279   : > { %v2011_v50 = vpop.f32.mrf.mxu1  ;;  %v1571_v47 = vmul.f32 %v2880_v30, %v2880_v30  ;;  %v1521_v8 = vsel %vm793_vm6, %v2880_v30, 0.0  ;;  %v2897_v43 = vadd.f32 %v2044_v33, %v1238_v55  ;;  %v2161_v41 = vpack.i.bf16 %v2864_v13, %v2743_v34 }
 0x27a   : > { %v1406_v11 = vpop.f32.mrf.mxu0  ;;  %v1619_v1 = vadd.f32 %v1618_v2, %v1617_v5  ;;  %v1520_v51 = vadd.f32 %v1519_v58, %v1518_v42  ;;  %v1251_v22 = vadd.f32 %v2011_v50, %v2705_v9  ;;  %v1525_v40 = vsel %vm793_vm6, %v2886_v37, 0.0 }
 0x27b   : > { %v2892_v46 = vadd.f32 %v1406_v11, %v1230_v59  ;;  %v1242_v27 = vpop.f32.mrf.mxu1  ;;  %v1622_v31 = vsel %vm793_vm6, %v1571_v47, 0.0  ;;  %2160 = vxpose.xlu0.b32.cont [3/16] (narrow) %v2159_v49, 8  ;;  %v1574_v54 = vmul.f32 %v2897_v43, %v2897_v43  ;;  %v1626_v59 = vsel %vm793_vm6, %v1573_v29, 0.0 }
 0x27c   : > { %v2047_v25 = vpop.f32.mrf.mxu0  ;;  %v1522_v48 = vadd.f32 %v1521_v8, %v1520_v51  ;;  %v1621_v26 = vadd.f32 %v1620_v38, %v1619_v1  ;;  %v1243_v17 = vadd.f32 %v1242_v27, %v2707_v52  ;;  %v1527_v34 = vsel %vm793_vm6, %v2897_v43, 0.0 }
 0x27d   : > { %v1523_v14 = vsel %vm793_vm6, %v2892_v46, 0.0  ;;  %v1572_v3 = vmul.f32 %v2892_v46, %v2892_v46  ;;  %v2012_v23 = vpop.f32.mrf.mxu1  ;;  %v2918_v12 = vadd.f32 %v2047_v25, %v1251_v22  ;;  %v2163_v58 = vpack.i.bf16 %v2880_v30, %v2761_v44 }
 0x27e   : > { %v1419_v24 = vpop.f32.mrf.mxu0  ;;  %v1623_v36 = vadd.f32 %v1622_v31, %v1621_v26  ;;  %v1524_v39 = vadd.f32 %v1523_v14, %v1522_v48  ;;  %v1254_v35 = vadd.f32 %v2012_v23, %v2711_v57 }
 0x27f   : > { %v1624_v9 = vsel %vm793_vm6, %v1572_v3, 0.0  ;;  %v1245_v18 = vpop.f32.mrf.mxu1  ;;  %v2916_v63 = vadd.f32 %v1419_v24, %v1243_v17  ;;  %2162 = vxpose.xlu0.b32.cont [4/16] (narrow) %v2161_v41, 8  ;;  %v1577_v1 = vmul.f32 %v2918_v12, %v2918_v12  ;;  %v1533_v26 = vsel %vm793_vm6, %v2918_v12, 0.0 }
 0x280   : > { %v2048_v52 = vpop.f32.mrf.mxu0  ;;  %v1526_v16 = vadd.f32 %v1525_v40, %v1524_v39  ;;  %v1625_v45 = vadd.f32 %v1624_v9, %v1623_v36  ;;  %v1246_v55 = vadd.f32 %v1245_v18, %v2715_v60  ;;  %v1628_v60 = vsel %vm793_vm6, %v1574_v54, 0.0 }
 0x281   : > { %v2015_v57 = vpop.f32.mrf.mxu1  ;;  %v1575_v13 = vmul.f32 %v2916_v63, %v2916_v63  ;;  %v2926_v50 = vadd.f32 %v2048_v52, %v1254_v35  ;;  %v1529_v47 = vsel %vm793_vm6, %v2916_v63, 0.0  ;;  %v2165_v36 = vpack.i.bf16 %v2892_v46, %v2775_v53 }
 0x282   : > { %v1422_v33 = vpop.f32.mrf.mxu0  ;;  %v1627_v42 = vadd.f32 %v1626_v59, %v1625_v45  ;;  %v1528_v5 = vadd.f32 %v1527_v34, %v1526_v16  ;;  %v1267_v44 = vadd.f32 %v2015_v57, %v2717_v4  ;;  %v1634_v35 = vsel %vm793_vm6, %v1577_v1, 0.0 }
 0x283   : > { %v1258_v2 = vpop.f32.mrf.mxu1  ;;  %v2933_v11 = vadd.f32 %v1422_v33, %v1246_v55  ;;  %v1630_v22 = vsel %vm793_vm6, %v1575_v13, 0.0  ;;  %v1578_v3 = vmul.f32 %v2926_v50, %v2926_v50  ;;  %2164 = vxpose.xlu0.b32.cont [5/16] (narrow) %v2163_v58, 8  ;;  %v1535_v18 = vsel %vm793_vm6, %v2926_v50, 0.0 }
 0x284   : > { %v2051_v49 = vpop.f32.mrf.mxu0  ;;  %v1530_v51 = vadd.f32 %v1529_v47, %v1528_v5  ;;  %v1629_v27 = vadd.f32 %v1628_v60, %v1627_v42  ;;  %v1259_v38 = vadd.f32 %v1258_v2, %v2721_v61  ;;  %v2167_v45 = vpack.i.bf16 %v2886_v37, %v2763_v32 }
 0x285   : > { %v2016_v8 = vpop.f32.mrf.mxu1  ;;  %v1531_v30 = vsel %vm793_vm6, %v2933_v11, 0.0  ;;  %v1576_v25 = vmul.f32 %v2933_v11, %v2933_v11  ;;  %v2958_v41 = vadd.f32 %v2051_v49, %v1267_v44  ;;  %v1636_v16 = vsel %vm793_vm6, %v1578_v3, 0.0 }
 0x286   : > { %v1435_v48 = vpop.f32.mrf.mxu0  ;;  %v1631_v14 = vadd.f32 %v1630_v22, %v1629_v27  ;;  %v1532_v61 = vadd.f32 %v1531_v30, %v1530_v51  ;;  %v1270_v4 = vadd.f32 %v2016_v8, %v2725_v56  ;;  %v2169_v32 = vpack.i.bf16 %v2897_v43, %v2773_v20 }
 0x287   : > { %v1261_v23 = vpop.f32.mrf.mxu1  ;;  %v1632_v29 = vsel %vm793_vm6, %v1576_v25, 0.0  ;;  %v2950_v31 = vadd.f32 %v1435_v48, %v1259_v38  ;;  %2166 = vxpose.xlu0.b32.cont [6/16] (narrow) %v2165_v36, 8  ;;  %v1581_v59 = vmul.f32 %v2958_v41, %v2958_v41  ;;  %v1541_v2 = vsel %vm793_vm6, %v2958_v41, 0.0 }
 0x288   : > { %v1262_v17 = vadd.f32 %v1261_v23, %v2731_v0  ;;  %v2052_v24 = vpop.f32.mrf.mxu0  ;;  %v1534_v9 = vadd.f32 %v1533_v26, %v1532_v61  ;;  %v1633_v39 = vadd.f32 %v1632_v29, %v1631_v14  ;;  %v2171_v8 = vpack.i.bf16 %v2916_v63, %v2792_v19 }
 0x289   : > { %v1579_v56 = vmul.f32 %v2950_v31, %v2950_v31  ;;  %v1537_v53 = vsel %vm793_vm6, %v2950_v31, 0.0  ;;  %v1481_v46 = vadd.f32 %v2052_v24, %v1270_v4  ;;  %v1642_v49 = vsel %vm793_vm6, %v1581_v59, 0.0 }
 0x28a   : > { %v1438_v40 = vpop.f32.mrf.mxu0  ;;  %v1635_v54 = vadd.f32 %v1634_v35, %v1633_v39  ;;  %v1536_v52 = vadd.f32 %v1535_v18, %v1534_v9  ;;  %v2173_v20 = vpack.i.bf16 %v2933_v11, %v2807_v6  ;;  %v2175_v3 = vpack.i.bf16 %v2918_v12, %v2798_v10 }
 0x28b   : > { %v1479_v0 = vadd.f32 %v1438_v40, %v1262_v17  ;;  %v1638_v34 = vsel %vm793_vm6, %v1579_v56, 0.0  ;;  %2168 = vxpose.xlu0.b32.cont [7/16] (narrow) %v2167_v45, 8  ;;  %v1582_v58 = vmul.f32 %v1481_v46, %v1481_v46  ;;  %v1543_v1 = vsel %vm793_vm6, %v1481_v46, 0.0 }
 0x28c   : > { %v1538_v55 = vadd.f32 %v1537_v53, %v1536_v52  ;;  %v1637_v57 = vadd.f32 %v1636_v16, %v1635_v54  ;;  %v2177_v6 = vpack.i.bf16 %v2926_v50, %v2805_v15  ;;  %v2179_v10 = vpack.i.bf16 %v2950_v31, %v2824_v28 }
 0x28d   : > { %v1539_v13 = vsel %vm793_vm6, %v1479_v0, 0.0  ;;  %v1580_v33 = vmul.f32 %v1479_v0, %v1479_v0  ;;  %v1644_v38 = vsel %vm793_vm6, %v1582_v58, 0.0  ;;  %v2181_v12 = vpack.i.bf16 %v1479_v0, %v2839_v21 }
 0x28e   : > { %v1639_v42 = vadd.f32 %v1638_v34, %v1637_v57  ;;  %v1540_v5 = vadd.f32 %v1539_v13, %v1538_v55  ;;  %v2183_v4 = vpack.i.bf16 %v2958_v41, %v2826_v7  ;;  %v2185_v15 = vpack.i.bf16 %v1481_v46, %v2837_v62 }
 0x28f   : > { %v1640_v60 = vsel %vm793_vm6, %v1580_v33, 0.0  ;;  %2170 = vxpose.xlu0.b32.cont [8/16] (narrow) %v2169_v32, 8 }
 0x290   : > { %v1542_v37 = vadd.f32 %v1541_v2, %v1540_v5  ;;  %v1641_v47 = vadd.f32 %v1640_v60, %v1639_v42 }
 0x292   : > { %v1544_v51 = vadd.f32 %v1543_v1, %v1542_v37  ;;  %v1643_v27 = vadd.f32 %v1642_v49, %v1641_v47 }
 0x293   : > { %2172 = vxpose.xlu0.b32.cont [9/16] (narrow) %v2171_v8, 8 }
 0x294   : > { %v1545_v22 = vrot.slane %v1544_v51, 4  ;;  %v1645_v44 = vadd.f32 %v1644_v38, %v1643_v27 }
 0x296   : > { %v1546_v30 = vadd.f32 %v1545_v22, %v1544_v51  ;;  %v1646_v25 = vrot.slane %v1645_v44, 4 }
 0x297   : > { %2174 = vxpose.xlu0.b32.cont [10/16] (narrow) %v2173_v20, 8 }
 0x298   : > { %v1547_v43 = vrot.slane %v1546_v30, 2  ;;  %v1647_v48 = vadd.f32 %v1646_v25, %v1645_v44 }
 0x29a   : > { %v1548_v26 = vadd.f32 %v1547_v43, %v1546_v30  ;;  %v1648_v14 = vrot.slane %v1647_v48, 2 }
 0x29b   : > { %2176 = vxpose.xlu0.b32.cont [11/16] (narrow) %v2175_v3, 8 }
 0x29c   : > { %v1549_v61 = vrot.slane %v1548_v26, 1  ;;  %v1649_v23 = vadd.f32 %v1648_v14, %v1647_v48 }
 0x29e   : > { %v1650_v19 = vrot.slane %v1649_v23, 1  ;;  %v1550_v63 = vadd.f32 %v1549_v61, %v1548_v26 }
 0x29f   : > { %2178 = vxpose.xlu0.b32.cont [12/16] (narrow) %v2177_v6, 8 }
 0x2a0   : > { %v1651_v11 = vadd.f32 %v1650_v19, %v1649_v23 }
 0x2a2   : > { %v1653_v29 = vsel %vm418_vm0, %v1550_v63, %v1651_v11 }
 0x2a3   : > { %1655 = vst.msk [vmem:[%s181_s8] sm:$0x3] %vm1654_vm9, %v1653_v29  ;;  %2180 = vxpose.xlu0.b32.cont [13/16] (narrow) %v2179_v10, 8 }
 0x2a7   : > { %2182 = vxpose.xlu0.b32.cont [14/16] (narrow) %v2181_v12, 8 }
 0x2ab   : > { %2184 = vxpose.xlu0.b32.cont [15/16] (narrow) %v2183_v4, 8 }
 0x2af   : > { %2186 = vxpose.xlu0.b32.end [16/16] (narrow) %v2185_v15, 8 }
 0x2ef   : > { %v2187_v50 = vpop.trf.xlu0 }
 0x2f0   : > { %v2191_v17 = vunpack.i.h.bf16 %v2187_v50  ;;  %v2188_v24 = vunpack.i.l.bf16 %v2187_v50 }
 0x2f2   : > { %v1890_v28 = vpack.c.bf16 %v2191_v17, %v2188_v24 }
 0x2f4   : > { %1728 = vst [vmem:[%s177_s14] sm:$0xff] %v1890_v28 }
 0x2f5 PF: > { %s14_s12 = sadd.s32 1, %s2204_s12  }
 0x2f6   : > { %p11_p4 = scmp.ge.s32.totalorder %s14_s12, 4  }
 0x2f8   :  { %13 = sbr.rel (!%p11_p4) target bundleno = 1 (0x1), region = 72 }

// kernel: basic_block_pallas.4
= control target key start
LH: loop header
LB: loop body
LE: loop exit
PB: predicated region body
PF: predicated region fallthrough
CT: control target
= control target key end

     0   :  { %s2313_s18 = smov 0   ;;  %s3107_s0 = inlined_call_operand.vmem [shape: bf16[2,8,256], index: 0, kind: input, shape index: {}]   ;;  %s3108_s1 = inlined_call_operand.vmem [shape: f32[8,1], index: 1, kind: input, shape index: {}]   ;;  %s3109_s2 = inlined_call_operand.vmem [shape: f32[8,1], index: 2, kind: input, shape index: {}]   ;;  %s3110_s3 = inlined_call_operand.vmem [shape: bf16[3,24,8], index: 3, kind: input, shape index: {}]   ;;  %s3111_s4 = inlined_call_operand.vmem [shape: bf16[2,8,256], index: 4, kind: output, shape index: {0}]   ;;  %s3112_s5 = inlined_call_operand.vmem [shape: f32[2,2,8], index: 5, kind: output, shape index: {1}]  }
   0x1 LB: > { %s1888_s19 = sadd.s32 4294967295, %s2278_s18   ;;  %p1892_p0 = scmp.ge.s32.totalorder %s2278_s18, 1  ;;  %s2278_s18 = sphi %s2313_s18, %s16_s18  }
   0x2   : > { %p190_p1 = scmp.lt.s32.totalorder %s2278_s18, 3 }
   0x4   : > { %p191_p2 = pnand %p1892_p0, %p190_p1 }
   0x5   : > { %p222_p3 = scmp.lt.s32.totalorder (!%p191_p2), %s1888_s19, 1  ;;  %s2281_s28 = smov (!%p191_p2), 16  }
   0x6   : > { %194 = sbr.rel (%p191_p2) target bundleno = 876 (0x36c), region = 36  ;;  %s2282_s29 = smov (!%p191_p2), 8  }
   0xb   : > { %v240_v0 = vld [vmem:[%s3108_s1] sm:$0xff]  ;;  %v2280_v1 = vmov 0   ;;  %s3116_s19 = smov (!%p222_p3, %s1888_s19), 1  ;;  %vm491_vm0 = vcmask 1040384   ;;  %vm492_vm1 = vsmask.f32 256 }
   0xc   : > { %2146 = vset.pattern.permute.xlu0 %v2280_v1  ;;  %v248_v2 = vld [vmem:[%s3109_s2] sm:$0xff]  ;;  %s1961_s24 = sshll.u32 %s3116_s19, 3  ;;  %vm2337_vm2 = vmand %vm491_vm0, %vm492_vm1  ;;  %vm785_vm3 = vcmask 1046528   ;;  %vm528_vm4 = vsmask.f32 7424  ;;  %vm1006_vm5 = vcmask 1043456  }
   0xd   : > { %243 = vperm.xlu0 %2146, %v240_v0   ;;  %s226_s27 = scalar_lea.vmem %s3107_s0, %s1961_s24  ;;  %vm866_vm6 = vcmask 64512   ;;  %vm899_vm7 = vcmask 130048   ;;  %vm973_vm8 = vcmask 195584   ;;  %s1897_s17 = sshll.u32 %s3116_s19, 1  ;;  %vm1727_vm9 = vcmask 58368  }
   0xe   : > { %v237_v3 = vld [vmem:[%s226_s27] sm:$0xff]  ;;  %s235_s22 = scalar_lea.vmem %s3112_s5, %s1897_s17  ;;  %s231_s26 = scalar_lea.vmem %s3111_s4, %s1961_s24 }
   0xf   : > { %v238_v4 = vunpack.c.l.bf16 %v237_v3  ;;  %v239_v5 = vunpack.c.h.bf16 %v237_v3 }
  0x11   : > { %251 = vperm.xlu0 %2146, %v248_v2  }
  0x88   : > { %v244_v6 = vpop.permute.xlu0 %243 }
  0x89   : > { %v246_v7 = vmul.f32 %v244_v6, %v238_v4  ;;  %v247_v8 = vmul.f32 %v244_v6, %v239_v5 }
  0x8c   : > { %v252_v9 = vpop.permute.xlu0 %251 }
  0x8d   : > { %v254_v10 = vadd.f32 %v252_v9, %v246_v7  ;;  %v255_v11 = vadd.f32 %v252_v9, %v247_v8 }
  0x8f   : > { %v256_v12 = vmax.f32 %v254_v10, 0.0  ;;  %v257_v13 = vmax.f32 %v255_v11, 0.0 }
  0x91   : > { %v2147_v14 = vpack.i.bf16 %v256_v12, %v257_v13 }
  0x93   : > { %2148 = vxpose.xlu1.b32.start.end [1/1] (short) %v2147_v14, 128 }
 0x10f   : > { %v2149_v15 = vpop.trf.xlu1 }
 0x110   : > { %v2153_v16 = vunpack.i.h.bf16 %v2149_v15  ;;  %v2150_v17 = vunpack.i.l.bf16 %v2149_v15 }
 0x113   : > { %v2154_v18 = vpop.trf.xlu1 }
 0x114   : > { %v2158_v19 = vunpack.i.h.bf16 %v2154_v18  ;;  %v2155_v20 = vunpack.i.l.bf16 %v2154_v18 }
 0x116   : > { %v322_v21 = vpack.c.bf16 %v2158_v19, %v2153_v16  ;;  %v330_v22 = vpack.c.bf16 %v2155_v20, %v2150_v17 }
 0x117   : > { %v2159_v23 = vpop.trf.xlu1 }
 0x118   : > { %v402_v24 = vshrl.u32 %v330_v22, 16  ;;  %v346_v25 = vshrl.u32 %v322_v21, 16  ;;  %v349_v26 = vshll.u32 %v322_v21, 16  ;;  %v405_v28 = vshll.u32 %v330_v22, 16 }
 0x119   : > { %v2163_v29 = vunpack.i.h.bf16 %v2159_v23  ;;  %v2160_v34 = vunpack.i.l.bf16 %v2159_v23 }
 0x11a   : > { %v404_v31 = vrot.slane %v402_v24, 7  ;;  %v348_v32 = vrot.slane %v346_v25, 7 }
 0x11b   : > { %v2164_v30 = vpop.trf.xlu1 }
 0x11c   : > { %v2168_v33 = vunpack.i.h.bf16 %v2164_v30  ;;  %v2165_v35 = vunpack.i.l.bf16 %v2164_v30  ;;  %v407_v36 = vor.u32 %v405_v28, %v404_v31  ;;  %v351_v37 = vor.u32 %v349_v26, %v348_v32 }
 0x11d   : > { %v520_v38 = vsel %vm2337_vm2, %v404_v31, 0  ;;  %v512_v43 = vsel %vm2337_vm2, %v348_v32, 0 }
 0x11e   : > { %v323_v39 = vpack.c.bf16 %v2168_v33, %v2163_v29  ;;  %v2345_v41 = vsel %vm2337_vm2, 0, %v407_v36  ;;  %v2349_v42 = vsel %vm2337_vm2, 0, %v351_v37  ;;  %v331_v44 = vpack.c.bf16 %v2165_v35, %v2160_v34 }
 0x11f   : > { %v2169_v40 = vpop.trf.xlu1  ;;  %v813_v45 = vrot.slane %v2345_v41, 1  ;;  %v814_v46 = vrot.slane %v520_v38, 1  ;;  %v789_v47 = vrot.slane %v2349_v42, 1  ;;  %v790_v48 = vrot.slane %v512_v43, 1 }
 0x120   : > { %v640_v49 = vshll.u32 %v2345_v41, 16  ;;  %v645_v50 = vshll.u32 %v520_v38, 16  ;;  %v356_v51 = vshll.u32 %v323_v39, 16  ;;  %v544_v54 = vshll.u32 %v2349_v42, 16 }
 0x121   : > { %v815_v52 = vsel %vm785_vm3, %v813_v45, %v814_v46  ;;  %v549_v55 = vshll.u32 %v512_v43, 16  ;;  %v638_v56 = vshrl.u32 %v2345_v41, 16  ;;  %v542_v57 = vshrl.u32 %v2349_v42, 16 }
 0x122   : > { %852 = vrot.lane.b32.xlu0 %v815_v52, %s2281_s28  ;;  %v642_v58 = vrot.slane %v640_v49, 1  ;;  %v546_v59 = vrot.slane %v544_v54, 1  ;;  %v409_v60 = vshrl.u32 %v331_v44, 16  ;;  %v353_v61 = vshrl.u32 %v323_v39, 16  ;;  %v2390_v39 = vld [vmem:[%s3110_s3 + $0x14] ss:$0 sps:$4 sm:$0xff]  }
 0x123   : > { %v2174_v53 = vpop.trf.xlu1  ;;  %v2173_v62 = vunpack.i.h.bf16 %v2169_v40  ;;  %v791_v0 = vsel %vm785_vm3, %v789_v47, %v790_v48  ;;  %v647_v2 = vrot.slane %v645_v50, 1  ;;  %v412_v8 = vshll.u32 %v331_v44, 16  ;;  %2131 = vmatprep.subr.msk.bf16.mxu1 %vm1006_vm5, %v2390_v39  ;;  %2130 = vmatprep.subr.msk.bf16.mxu0 %vm1006_vm5, %v2390_v39 }
 0x124   : > { %v2178_v63 = vunpack.i.h.bf16 %v2174_v53  ;;  %v643_v3 = vor.u32 %v642_v58, %v638_v56  ;;  %v547_v5 = vor.u32 %v546_v59, %v542_v57  ;;  %v411_v6 = vrot.slane %v409_v60, 7 }
 0x125   : > { %v355_v7 = vrot.slane %v353_v61, 7  ;;  %v2170_v9 = vunpack.i.l.bf16 %v2169_v40  ;;  %v2175_v10 = vunpack.i.l.bf16 %v2174_v53  ;;  %v551_v12 = vrot.slane %v549_v55, 1 }
 0x126   : > { %836 = vrot.lane.b32.xlu0 %v791_v0, %s2281_s28  ;;  %v648_v11 = vsel %vm528_vm4, %v643_v3, %v647_v2  ;;  %v2364_v13 = vpack.c.bf16 %v2178_v63, %v2173_v62  ;;  %v414_v14 = vor.u32 %v412_v8, %v411_v6  ;;  %v521_v15 = vsel %vm2337_vm2, %v411_v6, 0 }
 0x127   : > { %v2179_v4 = vpop.trf.xlu1  ;;  %739 = vrot.lane.b32.xlu1 %v648_v11, %s2282_s29  ;;  %v358_v16 = vor.u32 %v356_v51, %v355_v7  ;;  %v552_v17 = vsel %vm528_vm4, %v547_v5, %v551_v12  ;;  %v332_v19 = vpack.c.bf16 %v2175_v10, %v2170_v9  ;;  %v513_v23 = vsel %vm2337_vm2, %v355_v7, 0 }
 0x128   : > { %v363_v20 = vshll.u32 %v2364_v13, 16  ;;  %v2374_v21 = vsel %vm2337_vm2, 0, %v414_v14  ;;  %v657_v24 = vshll.u32 %v521_v15, 16  ;;  %v2183_v25 = vunpack.i.h.bf16 %v2179_v4 }
 0x129   : > { %v2378_v22 = vsel %vm2337_vm2, 0, %v358_v16  ;;  %v2180_v26 = vunpack.i.l.bf16 %v2179_v4  ;;  %v816_v28 = vrot.slane %v2374_v21, 1  ;;  %v817_v29 = vrot.slane %v521_v15, 1 }
 0x12a   : > { %723 = vrot.lane.b32.xlu0 %v552_v17, %s2282_s29  ;;  %v652_v33 = vshll.u32 %v2374_v21, 16  ;;  %v556_v34 = vshll.u32 %v2378_v22, 16  ;;  %v419_v35 = vshll.u32 %v332_v19, 16  ;;  %v792_v37 = vrot.slane %v2378_v22, 1 }
 0x12b   : > { %v2184_v18 = vpop.trf.xlu1  ;;  %v818_v36 = vsel %vm785_vm3, %v816_v28, %v817_v29  ;;  %v793_v38 = vrot.slane %v513_v23, 1  ;;  %v659_v40 = vrot.slane %v657_v24, 1  ;;  %v561_v43 = vshll.u32 %v513_v23, 16 }
 0x12c   : > { %v2188_v30 = vunpack.i.h.bf16 %v2184_v18  ;;  %v2185_v31 = vunpack.i.l.bf16 %v2184_v18  ;;  %v654_v44 = vrot.slane %v652_v33, 1  ;;  %v558_v45 = vrot.slane %v556_v34, 1 }
 0x12d   : > { %v416_v46 = vshrl.u32 %v332_v19, 16  ;;  %v360_v47 = vshrl.u32 %v2364_v13, 16  ;;  %v650_v51 = vshrl.u32 %v2374_v21, 16  ;;  %v794_v52 = vsel %vm785_vm3, %v792_v37, %v793_v38 }
 0x12e   : > { %854 = vrot.lane.b32.xlu0 %v818_v36, %s2281_s28  ;;  %v2394_v48 = vpack.c.bf16 %v2188_v30, %v2183_v25  ;;  %v333_v49 = vpack.c.bf16 %v2185_v31, %v2180_v26  ;;  %v554_v53 = vshrl.u32 %v2378_v22, 16  ;;  %v563_v2 = vrot.slane %v561_v43, 1 }
 0x12f   : > { %v2189_v32 = vpop.trf.xlu1  ;;  %v655_v56 = vor.u32 %v654_v44, %v650_v51  ;;  %v418_v57 = vrot.slane %v416_v46, 7  ;;  %v362_v61 = vrot.slane %v360_v47, 7 }
 0x130   : > { %v2193_v54 = vunpack.i.h.bf16 %v2189_v32  ;;  %v2190_v58 = vunpack.i.l.bf16 %v2189_v32  ;;  %v559_v60 = vor.u32 %v558_v45, %v554_v53  ;;  %v370_v62 = vshll.u32 %v2394_v48, 16 }
 0x131   : > { %v426_v63 = vshll.u32 %v333_v49, 16  ;;  %v421_v3 = vor.u32 %v419_v35, %v418_v57  ;;  %v660_v4 = vsel %vm528_vm4, %v655_v56, %v659_v40  ;;  %v522_v5 = vsel %vm2337_vm2, %v418_v57, 0 }
 0x132   : > { %838 = vrot.lane.b32.xlu0 %v794_v52, %s2281_s28  ;;  %v423_v6 = vshrl.u32 %v333_v49, 16  ;;  %v367_v9 = vshrl.u32 %v2394_v48, 16  ;;  %v564_v12 = vsel %vm528_vm4, %v559_v60, %v563_v2  ;;  %v365_v13 = vor.u32 %v363_v20, %v362_v61 }
 0x133   : > { %v2194_v50 = vpop.trf.xlu1  ;;  %v2415_v8 = vsel %vm2337_vm2, 0, %v421_v3  ;;  %v820_v16 = vrot.slane %v522_v5, 1  ;;  %v514_v17 = vsel %vm2337_vm2, %v362_v61, 0  ;;  %v669_v23 = vshll.u32 %v522_v5, 16 }
 0x134   : > { %v2198_v55 = vunpack.i.h.bf16 %v2194_v50  ;;  %v2195_v59 = vunpack.i.l.bf16 %v2194_v50  ;;  %v819_v15 = vrot.slane %v2415_v8, 1  ;;  %v664_v18 = vshll.u32 %v2415_v8, 16 }
 0x135   : > { %v2432_v24 = vsel %vm2337_vm2, 0, %v365_v13  ;;  %v662_v20 = vshrl.u32 %v2415_v8, 16  ;;  %v425_v26 = vrot.slane %v423_v6, 7  ;;  %v573_v30 = vshll.u32 %v514_v17, 16 }
 0x136   : > { %v2410_v7 = vpack.c.bf16 %v2198_v55, %v2193_v54  ;;  %741 = vrot.lane.b32.xlu0 %v660_v4, %s2282_s29  ;;  %v2418_v10 = vpack.c.bf16 %v2195_v59, %v2190_v58  ;;  %v666_v25 = vrot.slane %v664_v18, 1  ;;  %v369_v31 = vrot.slane %v367_v9, 7 }
 0x137   : > { %v2405_v0 = vpop.trf.xlu1  ;;  %v795_v34 = vrot.slane %v2432_v24, 1  ;;  %v796_v35 = vrot.slane %v514_v17, 1  ;;  %v568_v36 = vshll.u32 %v2432_v24, 16  ;;  %v821_v38 = vsel %vm785_vm3, %v819_v15, %v820_v16 }
 0x138   : > { %v2203_v11 = vunpack.i.h.bf16 %v2405_v0  ;;  %v433_v28 = vshll.u32 %v2418_v10, 16  ;;  %v2200_v32 = vunpack.i.l.bf16 %v2405_v0  ;;  %v671_v40 = vrot.slane %v669_v23, 1 }
 0x139   : > { %v667_v43 = vor.u32 %v666_v25, %v662_v20  ;;  %v566_v44 = vshrl.u32 %v2432_v24, 16  ;;  %v428_v45 = vor.u32 %v426_v63, %v425_v26  ;;  %v575_v48 = vrot.slane %v573_v30, 1 }
 0x13a   : > { %725 = vrot.lane.b32.xlu0 %v564_v12, %s2282_s29  ;;  %v797_v51 = vsel %vm785_vm3, %v795_v34, %v796_v35  ;;  %v570_v53 = vrot.slane %v568_v36, 1  ;;  %v372_v54 = vor.u32 %v370_v62, %v369_v31  ;;  %v523_v58 = vsel %vm2337_vm2, %v425_v26, 0 }
 0x13b   : > { %v2422_v14 = vpop.trf.xlu1  ;;  %v2447_v57 = vsel %vm2337_vm2, 0, %v428_v45  ;;  %v2453_v60 = vsel %vm2337_vm2, %v369_v31, 0  ;;  %v672_v62 = vsel %vm528_vm4, %v667_v43, %v671_v40  ;;  %v823_v12 = vrot.slane %v523_v58, 1 }
 0x13c   : > { %v2208_v19 = vunpack.i.h.bf16 %v2422_v14  ;;  %v2205_v37 = vunpack.i.l.bf16 %v2422_v14  ;;  %v822_v2 = vrot.slane %v2447_v57, 1  ;;  %v571_v4 = vor.u32 %v570_v53, %v566_v44 }
 0x13d   : > { %v2465_v9 = vsel %vm2337_vm2, 0, %v372_v54  ;;  %v799_v15 = vrot.slane %v2453_v60, 1  ;;  %v676_v30 = vshll.u32 %v2447_v57, 16  ;;  %v681_v34 = vshll.u32 %v523_v58, 16 }
 0x13e   : > { %v327_v29 = vpack.c.bf16 %v2208_v19, %v2203_v11  ;;  %856 = vrot.lane.b32.xlu0 %v821_v38, %s2281_s28  ;;  %v798_v13 = vrot.slane %v2465_v9, 1  ;;  %v576_v26 = vsel %vm528_vm4, %v571_v4, %v575_v48  ;;  %v674_v38 = vshrl.u32 %v2447_v57, 16 }
 0x13f   : > { %v2209_v33 = vpop.trf.xlu1  ;;  %v678_v40 = vrot.slane %v676_v30, 1  ;;  %v824_v44 = vsel %vm785_vm3, %v822_v2, %v823_v12  ;;  %v683_v53 = vrot.slane %v681_v34, 1  ;;  %v578_v54 = vshrl.u32 %v2465_v9, 16 }
 0x140   : > { %v2213_v46 = vunpack.i.h.bf16 %v2209_v33  ;;  %v2210_v47 = vunpack.i.l.bf16 %v2209_v33  ;;  %v381_v49 = vshrl.u32 %v327_v29, 16  ;;  %v384_v50 = vshll.u32 %v327_v29, 16 }
 0x141   : > { %v679_v58 = vor.u32 %v678_v40, %v674_v38  ;;  %v580_v2 = vshll.u32 %v2465_v9, 16  ;;  %v374_v12 = vshrl.u32 %v2410_v7, 16  ;;  %v335_v30 = vpack.c.bf16 %v2205_v37, %v2200_v32 }
 0x142   : > { %840 = vrot.lane.b32.xlu0 %v797_v51, %s2281_s28  ;;  %v383_v59 = vrot.slane %v381_v49, 7 }
 0x143   : > { %v2214_v52 = vpop.trf.xlu1 }
 0x144   : > { %v2218_v55 = vunpack.i.h.bf16 %v2214_v52  ;;  %v2215_v56 = vunpack.i.l.bf16 %v2214_v52  ;;  %v386_v5 = vor.u32 %v384_v50, %v383_v59  ;;  %v2461_v6 = vsel %vm2337_vm2, %v383_v59, 0 }
 0x145   : > { %v805_v23 = vrot.slane %v2461_v6, 1 }
 0x146   : > { %v328_v61 = vpack.c.bf16 %v2218_v55, %v2213_v46  ;;  %v336_v63 = vpack.c.bf16 %v2215_v56, %v2210_v47  ;;  %743 = vrot.lane.b32.xlu0 %v672_v62, %s2282_s29  ;;  %v2472_v17 = vsel %vm2337_vm2, 0, %v386_v5  ;;  %v800_v47 = vsel %vm785_vm3, %v798_v13, %v799_v15 }
 0x147   : > { %v2457_v3 = vpop.trf.xlu1  ;;  %v804_v19 = vrot.slane %v2472_v17, 1  ;;  %v430_v5 = vshrl.u32 %v2418_v10, 16 }
 0x148   : > { %v388_v11 = vshrl.u32 %v328_v61, 16  ;;  %v391_v16 = vshll.u32 %v328_v61, 16  ;;  %v2223_v18 = vunpack.i.h.bf16 %v2457_v3  ;;  %v444_v20 = vshrl.u32 %v336_v63, 16 }
 0x149   : > { %v447_v25 = vshll.u32 %v336_v63, 16  ;;  %v806_v35 = vsel %vm785_vm3, %v804_v19, %v805_v23  ;;  %v377_v19 = vshll.u32 %v2410_v7, 16  ;;  %v432_v23 = vrot.slane %v430_v5, 7 }
 0x14a   : > { %v390_v31 = vrot.slane %v388_v11, 7  ;;  %727 = vrot.lane.b32.xlu0 %v576_v26, %s2282_s29  ;;  %v446_v36 = vrot.slane %v444_v20, 7  ;;  %846 = vrot.lane.b32.xlu1 %v806_v35, %s2281_s28  ;;  %v341_v26 = vrot.slane %v2280_v1, 7  ;;  %v684_v7 = vsel %vm528_vm4, %v679_v58, %v683_v53 }
 0x14b   : > { %v2478_v29 = vpop.trf.xlu1  ;;  %v524_v0 = vsel %vm2337_vm2, %v432_v23, 0 }
 0x14c   : > { %v2228_v33 = vunpack.i.h.bf16 %v2478_v29  ;;  %v393_v45 = vor.u32 %v391_v16, %v390_v31  ;;  %v2489_v46 = vsel %vm2337_vm2, %v390_v31, 0  ;;  %v449_v48 = vor.u32 %v447_v25, %v446_v36 }
 0x14d   : > { %v2494_v49 = vsel %vm2337_vm2, %v446_v36, 0  ;;  %v621_v50 = vshll.u32 %v2489_v46, 16  ;;  %v582_v16 = vrot.slane %v580_v2, 1  ;;  %v2546_v37 = vsel %vm2337_vm2, 0, %v341_v26 }
 0x14e   : > { %v329_v43 = vpack.c.bf16 %v2228_v33, %v2223_v18  ;;  %v832_v52 = vrot.slane %v2494_v49, 1  ;;  %858 = vrot.lane.b32.xlu0 %v824_v44, %s2281_s28  ;;  %v2502_v56 = vsel %vm2337_vm2, 0, %v449_v48  ;;  %v2506_v59 = vsel %vm2337_vm2, 0, %v393_v45 }
 0x14f   : > { %v831_v61 = vrot.slane %v2502_v56, 1  ;;  %v614_v63 = vshrl.u32 %v2506_v59, 16  ;;  %v616_v62 = vshll.u32 %v2506_v59, 16  ;;  %v623_v4 = vrot.slane %v621_v50, 1 }
 0x150   : > { %v395_v51 = vshrl.u32 %v329_v43, 16  ;;  %v398_v55 = vshll.u32 %v329_v43, 16  ;;  %v585_v18 = vshll.u32 %v2453_v60, 16  ;;  %v376_v60 = vrot.slane %v374_v12, 7 }
 0x151   : > { %v833_v13 = vsel %vm785_vm3, %v831_v61, %v832_v52  ;;  %v618_v15 = vrot.slane %v616_v62, 1  ;;  %v435_v33 = vor.u32 %v433_v28, %v432_v23  ;;  %v583_v1 = vor.u32 %v582_v16, %v578_v54 }
 0x152   : > { %v397_v11 = vrot.slane %v395_v51, 7  ;;  %842 = vrot.lane.b32.xlu0 %v800_v47, %s2281_s28  ;;  %864 = vrot.lane.b32.xlu1 %v833_v13, %s2281_s28  ;;  %v587_v38 = vrot.slane %v585_v18, 1  ;;  %v379_v32 = vor.u32 %v377_v19, %v376_v60  ;;  %v2550_v40 = vsel %vm2337_vm2, %v341_v26, 0 }
 0x153   : > { %v619_v31 = vor.u32 %v618_v15, %v614_v63  ;;  %v2540_v10 = vsel %vm2337_vm2, 0, %v435_v33  ;;  %v437_v43 = vshrl.u32 %v335_v30, 16  ;;  %v440_v44 = vshll.u32 %v335_v30, 16 }
 0x154   : > { %v400_v20 = vor.u32 %v398_v55, %v397_v11  ;;  %v519_v25 = vsel %vm2337_vm2, %v397_v11, 0  ;;  %v688_v48 = vshll.u32 %v2540_v10, 16  ;;  %v588_v50 = vsel %vm528_vm4, %v583_v1, %v587_v38  ;;  %v2267_v38 = vld [vmem:[%s3110_s3 + $0xc] sm:$0xff]  }
 0x155   : > { %v633_v35 = vshll.u32 %v519_v25, 16  ;;  %v624_v36 = vsel %vm528_vm4, %v619_v31, %v623_v4  ;;  %v825_v51 = vrot.slane %v2540_v10, 1  ;;  %v826_v52 = vrot.slane %v524_v0, 1 }
 0x156   : > { %v2531_v34 = vsel %vm2337_vm2, 0, %v400_v20  ;;  %745 = vrot.lane.b32.xlu0 %v684_v7, %s2282_s29  ;;  %735 = vrot.lane.b32.xlu1 %v624_v36, %s2282_s29  ;;  %v811_v53 = vrot.slane %v519_v25, 1  ;;  %v2558_v55 = vsel %vm2337_vm2, 0, %v379_v32  ;;  %v516_v58 = vsel %vm2337_vm2, %v376_v60, 0 }
 0x157   : > { %v626_v14 = vshrl.u32 %v2531_v34, 16  ;;  %v628_v28 = vshll.u32 %v2531_v34, 16  ;;  %v635_v47 = vrot.slane %v633_v35, 1  ;;  %v810_v61 = vrot.slane %v2531_v34, 1 }
 0x158   : > { %v787_v63 = vrot.slane %v2550_v40, 1  ;;  %v439_v62 = vrot.slane %v437_v43, 7  ;;  %v786_v2 = vrot.slane %v2546_v37, 1  ;;  %v686_v5 = vshrl.u32 %v2540_v10, 16 }
 0x159   : > { %v630_v45 = vrot.slane %v628_v28, 1  ;;  %v690_v11 = vrot.slane %v688_v48, 1  ;;  %v693_v12 = vshll.u32 %v524_v0, 16  ;;  %v827_v13 = vsel %vm785_vm3, %v825_v51, %v826_v52 }
 0x15a   : > { %729 = vrot.lane.b32.xlu0 %v588_v50, %s2282_s29  ;;  %v801_v15 = vrot.slane %v2558_v55, 1  ;;  %v802_v16 = vrot.slane %v516_v58, 1  ;;  %v592_v18 = vshll.u32 %v2558_v55, 16  ;;  %v2220_v19 = vunpack.i.l.bf16 %v2457_v3  ;;  %v2268_v3 = vld [vmem:[%s3110_s3 + $0x8] ss:$0 sps:$4 sm:$0xff]  }
 0x15b   : > { %v631_v54 = vor.u32 %v630_v45, %v626_v14  ;;  %v2225_v23 = vunpack.i.l.bf16 %v2478_v29  ;;  %v812_v20 = vsel %vm785_vm3, %v810_v61, %v811_v53  ;;  %v442_v25 = vor.u32 %v440_v44, %v439_v62  ;;  %v2269_v29 = vld [vmem:[%s3110_s3 + $0x20] ss:$0 sps:$4 sm:$0xff]  }
 0x15c   : > { %v691_v26 = vor.u32 %v690_v11, %v686_v5  ;;  %v695_v30 = vrot.slane %v693_v12, 1  ;;  %v597_v31 = vshll.u32 %v516_v58, 16  ;;  %v803_v60 = vsel %vm785_vm3, %v801_v15, %v802_v16 }
 0x15d   : > { %v636_v4 = vsel %vm528_vm4, %v631_v54, %v635_v47  ;;  %v590_v7 = vshrl.u32 %v2558_v55, 16  ;;  %v594_v33 = vrot.slane %v592_v18, 1  ;;  %v337_v35 = vpack.c.bf16 %v2225_v23, %v2220_v19 }
 0x15e   : > { %737 = vrot.lane.b32.xlu1 %v636_v4, %s2282_s29  ;;  %860 = vrot.lane.b32.xlu0 %v827_v13, %s2281_s28  ;;  %v2587_v36 = vsel %vm2337_vm2, 0, %v442_v25  ;;  %v788_v1 = vsel %vm785_vm3, %v786_v2, %v787_v63  ;;  %v696_v0 = vsel %vm528_vm4, %v691_v26, %v695_v30  ;;  %v599_v14 = vrot.slane %v597_v31, 1 }
 0x15f   : > { %v525_v28 = vsel %vm2337_vm2, %v439_v62, 0  ;;  %v1008_v32 = vsel %vm1006_vm5, %v2390_v39, 0  ;;  %v595_v43 = vor.u32 %v594_v33, %v590_v7  ;;  %v700_v44 = vshll.u32 %v2587_v36, 16 }
 0x160   : > { %2128 = vmatpush3.bf16.msra.mxu1 %v1008_v32  ;;  %v2601_v45 = vsel %vm1006_vm5, %v2268_v3, 0  ;;  %v2604_v47 = vsel %vm1006_vm5, %v2269_v29, 0  ;;  %v451_v48 = vshrl.u32 %v337_v35, 16  ;;  %2019 = vmatpush3.bf16.msra.mxu0 %v1008_v32  ;;  %v829_v50 = vrot.slane %v525_v28, 1 }
 0x161   : > { %2127 = vmatprep.subr.bf16.mxu1 %v2267_v38  ;;  %v705_v51 = vshll.u32 %v525_v28, 16  ;;  %v604_v39 = vshll.u32 %v2472_v17, 16  ;;  %2020 = vmatprep.subr.bf16.mxu0 %v2267_v38  ;;  %v600_v52 = vsel %vm528_vm4, %v595_v43, %v599_v14  ;;  %v828_v53 = vrot.slane %v2587_v36, 1 }
 0x162   : > { %850 = vrot.lane.b32.xlu1 %v812_v20, %s2281_s28  ;;  %844 = vrot.lane.b32.xlu0 %v803_v60, %s2281_s28  ;;  %v698_v54 = vshrl.u32 %v2587_v36, 16  ;;  %v702_v58 = vrot.slane %v700_v44, 1  ;;  %v454_v61 = vshll.u32 %v337_v35, 16  ;;  %v453_v63 = vrot.slane %v451_v48, 7 }
 0x163   : > { %v602_v62 = vshrl.u32 %v2472_v17, 16  ;;  %v606_v2 = vrot.slane %v604_v39, 1  ;;  %v712_v4 = vshll.u32 %v2502_v56, 16  ;;  %v830_v5 = vsel %vm785_vm3, %v828_v53, %v829_v50 }
 0x164   : > { %2129 = vmatpush3.bf16.msra.mxu1 %v2267_v38  ;;  %2021 = vmatpush3.bf16.msra.mxu0 %v2267_v38  ;;  %v703_v11 = vor.u32 %v702_v58, %v698_v54  ;;  %v707_v12 = vrot.slane %v705_v51, 1  ;;  %v609_v13 = vshll.u32 %v2461_v6, 16  ;;  %v456_v15 = vor.u32 %v454_v61, %v453_v63 }
 0x165   : > { %2132 = vmatprep.subr.msk.bf16.mxu1 %vm1006_vm5, %v2268_v3  ;;  %2133 = vmatprep.subr.msk.bf16.mxu0 %vm1006_vm5, %v2269_v29  ;;  %v710_v16 = vshrl.u32 %v2502_v56, 16  ;;  %v714_v18 = vrot.slane %v712_v4, 1  ;;  %v717_v19 = vshll.u32 %v2494_v49, 16  ;;  %v607_v20 = vor.u32 %v606_v2, %v602_v62 }
 0x166   : > { %834 = vrot.lane.b32.xlu1 %v788_v1, %s2281_s28  ;;  %747 = vrot.lane.b32.xlu0 %v696_v0, %s2282_s29  ;;  %v708_v23 = vsel %vm528_vm4, %v703_v11, %v707_v12  ;;  %v611_v25 = vrot.slane %v609_v13, 1  ;;  %v2625_v26 = vsel %vm2337_vm2, 0, %v456_v15  ;;  %v527_v60 = vsel %vm2337_vm2, %v453_v63, 0  ;;  %v2270_v12 = vld [vmem:[%s3110_s3] sm:$0xff]  }
 0x167   : > { %v715_v30 = vor.u32 %v714_v18, %v710_v16  ;;  %v719_v6 = vrot.slane %v717_v19, 1  ;;  %v938_v7 = vshll.u32 %v2625_v26, 16  ;;  %v952_v33 = vrot.slane %v527_v60, 1 }
 0x168   : > { %v612_v31 = vsel %vm528_vm4, %v607_v20, %v611_v25  ;;  %v951_v3 = vrot.slane %v2625_v26, 1  ;;  %v936_v29 = vshrl.u32 %v2625_v26, 16  ;;  %v943_v1 = vshll.u32 %v527_v60, 16 }
 0x169   : > { %v720_v49 = vsel %vm528_vm4, %v715_v30, %v719_v6  ;;  %v940_v35 = vrot.slane %v938_v7, 1  ;;  %v532_v38 = vshll.u32 %v2546_v37, 16  ;;  %v530_v28 = vshrl.u32 %v2546_v37, 16 }
 0x16a   : > { %731 = vrot.lane.b32.xlu0 %v600_v52, %s2282_s29  ;;  %v953_v27 = vsel %vm785_vm3, %v951_v3, %v952_v33  ;;  %v945_v14 = vrot.slane %v943_v1, 1  ;;  %v537_v43 = vshll.u32 %v2550_v40, 16  ;;  %v807_v48 = vrot.slane %v2506_v59, 1 }
 0x16b   : > { %v941_v0 = vor.u32 %v940_v35, %v936_v29  ;;  %v534_v32 = vrot.slane %v532_v38, 1  ;;  %v808_v50 = vrot.slane %v2489_v46, 1 }
 0x16c   : > { %v539_v51 = vrot.slane %v537_v43, 1 }
 0x16d   : > { %v946_v44 = vsel %vm528_vm4, %v941_v0, %v945_v14  ;;  %v535_v39 = vor.u32 %v534_v32, %v530_v28  ;;  %v809_v52 = vsel %vm785_vm3, %v807_v48, %v808_v50 }
 0x16e   : > { %862 = vrot.lane.b32.xlu0 %v830_v5, %s2281_s28 }
 0x16f   : > { %v540_v53 = vsel %vm528_vm4, %v535_v39, %v539_v51 }
 0x172   : > { %749 = vrot.lane.b32.xlu0 %v708_v23, %s2282_s29 }
 0x176   : > { %733 = vrot.lane.b32.xlu0 %v612_v31, %s2282_s29 }
 0x17a   : > { %751 = vrot.lane.b32.xlu0 %v720_v49, %s2282_s29 }
 0x17e   : > { %954 = vrot.lane.b32.xlu0 %v953_v27, %s2281_s28 }
 0x182   : > { %947 = vrot.lane.b32.xlu0 %v946_v44, %s2282_s29 }
 0x186   : > { %848 = vrot.lane.b32.xlu0 %v809_v52, %s2281_s28 }
 0x18a   : > { %721 = vrot.lane.b32.xlu0 %v540_v53, %s2282_s29 }
 0x194   : > { %v853_v54 = vpop.permute.xlu0 %852 }
 0x198   : > { %v837_v40 = vpop.permute.xlu0 %836 }
 0x199   : > { %v740_v58 = vpop.permute.xlu1 %739 }
 0x19a   : > { %v886_v46 = vsel %vm866_vm6, %v2345_v41, %v740_v58 }
 0x19b   : > { %v2652_v61 = vsel %vm899_vm7, %v886_v46, %v853_v54 }
 0x19c   : > { %v724_v63 = vpop.permute.xlu0 %723  ;;  %2038 = vmatprep.mubr.msk.bf16.mxu1 %vm973_vm8, %v2652_v61 }
 0x19d   : > { %v870_v62 = vsel %vm866_vm6, %v2349_v42, %v724_v63 }
 0x19e   : > { %v2659_v2 = vsel %vm899_vm7, %v870_v62, %v837_v40 }
 0x19f   : > { %2022 = vmatprep.mubr.msk.bf16.mxu0 %vm973_vm8, %v2659_v2 }
 0x1a0   : > { %v855_v4 = vpop.permute.xlu0 %854 }
 0x1a4   : > { %v839_v5 = vpop.permute.xlu0 %838 }
 0x1a8   : > { %v742_v11 = vpop.permute.xlu0 %741 }
 0x1a9   : > { %v888_v41 = vsel %vm866_vm6, %v2374_v21, %v742_v11  ;;  %v2271_v21 = vld [vmem:[%s3110_s3 + $0x18] sm:$0xff]  }
 0x1aa   : > { %v2669_v13 = vsel %vm899_vm7, %v888_v41, %v855_v4 }
 0x1ab   : > { %2039 = vmatmul.mubr.msk.bf16.vlgmr.msra.gmra.mxu1 %vm973_vm8, %v2669_v13 }
 0x1ac   : > { %v726_v42 = vpop.permute.xlu0 %725  ;;  %2055 = vmatpush3.bf16.msra.mxu1 %v2601_v45 }
 0x1ad   : > { %v872_v15 = vsel %vm866_vm6, %v2378_v22, %v726_v42  ;;  %2056 = vmatprep.subr.bf16.mxu1 %v2270_v12 }
 0x1ae   : > { %v2680_v16 = vsel %vm899_vm7, %v872_v15, %v839_v5 }
 0x1af   : > { %2023 = vmatmul.mubr.msk.bf16.vlgmr.msra.gmra.mxu0 %vm973_vm8, %v2680_v16 }
 0x1b0   : > { %v857_v18 = vpop.permute.xlu0 %856  ;;  %2091 = vmatpush3.bf16.msra.mxu0 %v2604_v47  ;;  %2057 = vmatpush3.bf16.msra.mxu1 %v2270_v12 }
 0x1b1   : > { %2092 = vmatprep.subr.bf16.mxu0 %v2271_v21 }
 0x1b4   : > { %v841_v45 = vpop.permute.xlu0 %840  ;;  %2093 = vmatpush3.bf16.msra.mxu0 %v2271_v21 }
 0x1b8   : > { %v744_v19 = vpop.permute.xlu0 %743 }
 0x1b9   : > { %v890_v22 = vsel %vm866_vm6, %v2415_v8, %v744_v19 }
 0x1ba   : > { %v2688_v23 = vsel %vm899_vm7, %v890_v22, %v857_v18 }
 0x1bb   : > { %2042 = vmatprep.mubr.msk.bf16.mxu1 %vm973_vm8, %v2688_v23 }
 0x1bc   : > { %v728_v20 = vpop.permute.xlu0 %727  ;;  %v847_v0 = vpop.permute.xlu1 %846 }
 0x1bd   : > { %v874_v25 = vsel %vm866_vm6, %v2432_v24, %v728_v20 }
 0x1be   : > { %v907_v47 = vsel %vm899_vm7, %v874_v25, %v841_v45 }
 0x1bf   : > { %2026 = vmatprep.mubr.msk.bf16.mxu0 %vm973_vm8, %v907_v47 }
 0x1c0   : > { %v859_v30 = vpop.permute.xlu0 %858 }
 0x1c4   : > { %v843_v6 = vpop.permute.xlu0 %842  ;;  %v865_v32 = vpop.permute.xlu1 %864 }
 0x1c8   : > { %v746_v31 = vpop.permute.xlu0 %745  ;;  %v736_v50 = vpop.permute.xlu1 %735 }
 0x1c9   : > { %v892_v8 = vsel %vm866_vm6, %v2447_v57, %v746_v31  ;;  %v882_v58 = vsel %vm866_vm6, %v2506_v59, %v736_v50 }
 0x1ca   : > { %v2699_v60 = vsel %vm899_vm7, %v892_v8, %v859_v30 }
 0x1cb   : > { %2043 = vmatmul.mubr.msk.bf16.gmra.mxu1 %vm973_vm8, %v2699_v60 }
 0x1cc   : > { %v730_v7 = vpop.permute.xlu0 %729 }
 0x1cd   : > { %v876_v24 = vsel %vm866_vm6, %v2465_v9, %v730_v7 }
 0x1ce   : > { %v909_v49 = vsel %vm899_vm7, %v876_v24, %v843_v6 }
 0x1cf   : > { %2027 = vmatmul.mubr.msk.bf16.gmra.mxu0 %vm973_vm8, %v909_v49 }
 0x1d0   : > { %v861_v33 = vpop.permute.xlu0 %860  ;;  %v738_v52 = vpop.permute.xlu1 %737 }
 0x1d4   : > { %v845_v3 = vpop.permute.xlu0 %844  ;;  %v851_v40 = vpop.permute.xlu1 %850 }
 0x1d8   : > { %v748_v29 = vpop.permute.xlu0 %747 }
 0x1d9   : > { %v894_v57 = vsel %vm866_vm6, %v2540_v10, %v748_v29 }
 0x1da   : > { %v2710_v35 = vsel %vm899_vm7, %v894_v57, %v861_v33 }
 0x1db   : > { %2046 = vmatprep.mubr.msk.bf16.mxu1 %vm973_vm8, %v2710_v35 }
 0x1dc   : > { %v732_v1 = vpop.permute.xlu0 %731 }
 0x1dd   : > { %v878_v9 = vsel %vm866_vm6, %v2558_v55, %v732_v1 }
 0x1de   : > { %v911_v38 = vsel %vm899_vm7, %v878_v9, %v845_v3 }
 0x1df   : > { %2030 = vmatprep.mubr.msk.bf16.mxu0 %vm973_vm8, %v911_v38 }
 0x1e0   : > { %v863_v27 = vpop.permute.xlu0 %862 }
 0x1e4   : > { %v750_v14 = vpop.permute.xlu0 %749 }
 0x1e5   : > { %v896_v10 = vsel %vm866_vm6, %v2587_v36, %v750_v14 }
 0x1e6   : > { %v929_v28 = vsel %vm899_vm7, %v896_v10, %v863_v27 }
 0x1e7   : > { %2047 = vmatmul.mubr.msk.bf16.gmra.mxu1 %vm973_vm8, %v929_v28 }
 0x1e8   : > { %v734_v43 = vpop.permute.xlu0 %733 }
 0x1e9   : > { %v880_v44 = vsel %vm866_vm6, %v2472_v17, %v734_v43 }
 0x1ea   : > { %v913_v55 = vsel %vm899_vm7, %v880_v44, %v847_v0 }
 0x1eb   : > { %2031 = vmatmul.mubr.msk.bf16.gmra.mxu0 %vm973_vm8, %v913_v55 }
 0x1ec   : > { %v752_v48 = vpop.permute.xlu0 %751 }
 0x1ed   : > { %v898_v51 = vsel %vm866_vm6, %v2502_v56, %v752_v48  ;;  %v884_v56 = vsel %vm866_vm6, %v2531_v34, %v738_v52 }
 0x1ee   : > { %v931_v36 = vsel %vm899_vm7, %v898_v51, %v865_v32  ;;  %v917_v62 = vsel %vm899_vm7, %v884_v56, %v851_v40 }
 0x1ef   : > { %2050 = vmatprep.mubr.msk.bf16.mxu1 %vm973_vm8, %v931_v36 }
 0x1f0   : > { %v955_v39 = vpop.permute.xlu0 %954 }
 0x1f4   : > { %v948_v53 = vpop.permute.xlu0 %947 }
 0x1f5   : > { %v957_v54 = vsel %vm866_vm6, %v2625_v26, %v948_v53  ;;  %v835_v26 = vpop.permute.xlu1 %834 }
 0x1f6   : > { %v959_v17 = vsel %vm899_vm7, %v957_v54, %v955_v39 }
 0x1f7   : > { %2051 = vmatmul.mubr.msk.bf16.gmra.mxu1 %vm973_vm8, %v959_v17 }
 0x1f8   : > { %v849_v46 = vpop.permute.xlu0 %848 }
 0x1f9   : > { %v915_v63 = vsel %vm899_vm7, %v882_v58, %v849_v46 }
 0x1fa   : > { %2034 = vmatprep.mubr.msk.bf16.mxu0 %vm973_vm8, %v915_v63 }
 0x1fb   : > { %2035 = vmatmul.mubr.msk.bf16.gmra.mxu0 %vm973_vm8, %v917_v62 }
 0x1fc   : > { %v722_v4 = vpop.permute.xlu0 %721  ;;  %2094 = vmatprep.mubr.msk.bf16.mxu0 %vm973_vm8, %v2680_v16 }
 0x1fd   : > { %v868_v59 = vsel %vm866_vm6, %v2546_v37, %v722_v4 }
 0x1fe   : > { %v901_v5 = vsel %vm899_vm7, %v868_v59, %v835_v26 }
 0x1ff   : > { %2058 = vmatprep.mubr.msk.bf16.mxu1 %vm973_vm8, %v901_v5 }
 0x200   : > { %2059 = vmatmul.mubr.msk.bf16.vlgmr.msra.gmra.mxu1 %vm973_vm8, %v2659_v2 }
 0x201   : > { %2062 = vmatprep.mubr.msk.bf16.mxu1 %vm973_vm8, %v2680_v16 }
 0x203   : > { %2095 = vmatmul.mubr.msk.bf16.vlgmr.msra.gmra.mxu0 %vm973_vm8, %v907_v47 }
 0x204   : > { %2098 = vmatprep.mubr.msk.bf16.mxu0 %vm973_vm8, %v909_v49 }
 0x208   : > { %2063 = vmatmul.mubr.msk.bf16.gmra.mxu1 %vm973_vm8, %v907_v47 }
 0x209   : > { %2066 = vmatprep.mubr.msk.bf16.mxu1 %vm973_vm8, %v909_v49 }
 0x20b   : > { %2099 = vmatmul.mubr.msk.bf16.gmra.mxu0 %vm973_vm8, %v911_v38 }
 0x20c   : > { %2102 = vmatprep.mubr.msk.bf16.mxu0 %vm973_vm8, %v913_v55 }
 0x210   : > { %2067 = vmatmul.mubr.msk.bf16.gmra.mxu1 %vm973_vm8, %v911_v38 }
 0x211   : > { %2070 = vmatprep.mubr.msk.bf16.mxu1 %vm973_vm8, %v913_v55 }
 0x213   : > { %2103 = vmatmul.mubr.msk.bf16.gmra.mxu0 %vm973_vm8, %v915_v63 }
 0x214   : > { %2106 = vmatprep.mubr.msk.bf16.mxu0 %vm973_vm8, %v917_v62 }
 0x218   : > { %2071 = vmatmul.mubr.msk.bf16.gmra.mxu1 %vm973_vm8, %v915_v63 }
 0x219   : > { %2074 = vmatprep.mubr.msk.bf16.mxu1 %vm973_vm8, %v917_v62 }
 0x21b   : > { %2107 = vmatmul.mubr.msk.bf16.gmra.mxu0 %vm973_vm8, %v2652_v61 }
 0x21c   : > { %2110 = vmatprep.mubr.msk.bf16.mxu0 %vm973_vm8, %v2669_v13 }
 0x220   : > { %2075 = vmatmul.mubr.msk.bf16.gmra.mxu1 %vm973_vm8, %v2652_v61 }
 0x221   : > { %2078 = vmatprep.mubr.msk.bf16.mxu1 %vm973_vm8, %v2669_v13 }
 0x223   : > { %2111 = vmatmul.mubr.msk.bf16.gmra.mxu0 %vm973_vm8, %v2688_v23 }
 0x224   : > { %2114 = vmatprep.mubr.msk.bf16.mxu0 %vm973_vm8, %v2699_v60 }
 0x228   : > { %2079 = vmatmul.mubr.msk.bf16.gmra.mxu1 %vm973_vm8, %v2688_v23 }
 0x229   : > { %2082 = vmatprep.mubr.msk.bf16.mxu1 %vm973_vm8, %v2699_v60 }
 0x22b   : > { %2115 = vmatmul.mubr.msk.bf16.gmra.mxu0 %vm973_vm8, %v2710_v35 }
 0x22c   : > { %2118 = vmatprep.mubr.msk.bf16.mxu0 %vm973_vm8, %v929_v28 }
 0x230   : > { %2083 = vmatmul.mubr.msk.bf16.gmra.mxu1 %vm973_vm8, %v2710_v35 }
 0x231   : > { %2086 = vmatprep.mubr.msk.bf16.mxu1 %vm973_vm8, %v929_v28 }
 0x233   : > { %2119 = vmatmul.mubr.msk.bf16.gmra.mxu0 %vm973_vm8, %v931_v36 }
 0x234   : > { %2122 = vmatprep.mubr.msk.bf16.mxu0 %vm973_vm8, %v959_v17 }
 0x238   : > { %2087 = vmatmul.mubr.msk.bf16.gmra.mxu1 %vm973_vm8, %v931_v36 }
 0x23b   : > { %2123 = vmatmul.mubr.msk.bf16.gmra.mxu0 %vm973_vm8, %v901_v5 }
 0x26b   : > { %v2790_v34 = vpop.f32.mrf.mxu1 }
 0x26d   : > { %v2792_v37 = vpop.f32.mrf.mxu1 }
 0x26f   : > { %v2024_v61 = vpop.f32.mrf.mxu0  ;;  %v2794_v2 = vpop.f32.mrf.mxu1 }
 0x271   : > { %v1044_v11 = vpop.f32.mrf.mxu0  ;;  %v2796_v41 = vpop.f32.mrf.mxu1 }
 0x273   : > { %v2025_v12 = vpop.f32.mrf.mxu0 }
 0x275   : > { %v1047_v42 = vpop.f32.mrf.mxu0 }
 0x28b   : > { %v2798_v13 = vpop.f32.mrf.mxu1 }
 0x28d   : > { %v2800_v15 = vpop.f32.mrf.mxu1 }
 0x28f   : > { %v2028_v21 = vpop.f32.mrf.mxu0  ;;  %v2802_v16 = vpop.f32.mrf.mxu1 }
 0x291   : > { %v1060_v18 = vpop.f32.mrf.mxu0  ;;  %v2804_v45 = vpop.f32.mrf.mxu1 }
 0x293   : > { %v2029_v19 = vpop.f32.mrf.mxu0 }
 0x295   : > { %v1063_v23 = vpop.f32.mrf.mxu0 }
 0x2a7   : > { %v2806_v22 = vpop.f32.mrf.mxu1 }
 0x2a9   : > { %v2808_v20 = vpop.f32.mrf.mxu1 }
 0x2ab   : > { %v2810_v25 = vpop.f32.mrf.mxu0  ;;  %v2812_v47 = vpop.f32.mrf.mxu1 }
 0x2ad   : > { %v2814_v30 = vpop.f32.mrf.mxu0  ;;  %v2816_v6 = vpop.f32.mrf.mxu1 }
 0x2af   : > { %v2818_v31 = vpop.f32.mrf.mxu0 }
 0x2b1   : > { %v2822_v60 = vpop.f32.mrf.mxu0 }
 0x2b7   : > { %v2820_v8 = vpop.f32.mrf.mxu1 }
 0x2b9   : > { %v2824_v7 = vpop.f32.mrf.mxu1 }
 0x2bb   : > { %v2826_v24 = vpop.f32.mrf.mxu0  ;;  %v2828_v49 = vpop.f32.mrf.mxu1 }
 0x2bd   : > { %v2830_v33 = vpop.f32.mrf.mxu0  ;;  %v2832_v3 = vpop.f32.mrf.mxu1 }
 0x2bf   : > { %v2834_v29 = vpop.f32.mrf.mxu0 }
 0x2c0   : > { %v2060_v57 = vpop.f32.mrf.mxu1 }
 0x2c1   : > { %v2836_v35 = vpop.f32.mrf.mxu0  ;;  %v1228_v27 = vadd.f32 %v2060_v57, %v2024_v61 }
 0x2c2   : > { %v1219_v1 = vpop.f32.mrf.mxu1 }
 0x2c3   : > { %v1220_v9 = vadd.f32 %v1219_v1, %v1044_v11  ;;  %v2096_v38 = vpop.f32.mrf.mxu0 }
 0x2c4   : > { %v2061_v0 = vpop.f32.mrf.mxu1  ;;  %v2840_v55 = vadd.f32 %v2096_v38, %v1228_v27 }
 0x2c5   : > { %v1396_v14 = vpop.f32.mrf.mxu0  ;;  %v1231_v10 = vadd.f32 %v2061_v0, %v2025_v12 }
 0x2c6   : > { %v2838_v28 = vadd.f32 %v1396_v14, %v1220_v9  ;;  %v1222_v32 = vpop.f32.mrf.mxu1  ;;  %v1626_v40 = vmul.f32 %v2840_v55, %v2840_v55  ;;  %v1558_v62 = vsel %vm866_vm6, %v2840_v55, 0.0 }
 0x2c7   : > { %v1223_v43 = vadd.f32 %v1222_v32, %v1047_v42  ;;  %v2097_v44 = vpop.f32.mrf.mxu0 }
 0x2c8   : > { %v2064_v48 = vpop.f32.mrf.mxu1  ;;  %v1624_v50 = vmul.f32 %v2838_v28, %v2838_v28  ;;  %v2844_v36 = vadd.f32 %v2097_v44, %v1231_v10  ;;  %v1555_v58 = vsel %vm866_vm6, %v2838_v28, 0.0  ;;  %v1659_v38 = vsel %vm866_vm6, %v1626_v40, 0.0 }
 0x2c9   : > { %v1399_v51 = vpop.f32.mrf.mxu0  ;;  %v1244_v53 = vadd.f32 %v2064_v48, %v2028_v21 }
 0x2ca   : > { %v2846_v39 = vadd.f32 %v1399_v51, %v1223_v43  ;;  %v1235_v52 = vpop.f32.mrf.mxu1  ;;  %v1656_v26 = vsel %vm866_vm6, %v1624_v50, 0.0  ;;  %v1627_v5 = vmul.f32 %v2844_v36, %v2844_v36  ;;  %v1560_v27 = vsel %vm866_vm6, %v2844_v36, 0.0 }
 0x2cb   : > { %v1236_v54 = vadd.f32 %v1235_v52, %v1060_v18  ;;  %v2100_v17 = vpop.f32.mrf.mxu0 }
 0x2cc   : > { %v1556_v46 = vsel %vm866_vm6, %v2846_v39, 0.0  ;;  %v1625_v56 = vmul.f32 %v2846_v39, %v2846_v39  ;;  %v2065_v63 = vpop.f32.mrf.mxu1  ;;  %v2864_v57 = vadd.f32 %v2100_v17, %v1244_v53  ;;  %v1661_v43 = vsel %vm866_vm6, %v1627_v5, 0.0 }
 0x2cd   : > { %v1557_v4 = vadd.f32 %v1556_v46, %v1555_v58  ;;  %v1412_v59 = vpop.f32.mrf.mxu0  ;;  %v1247_v11 = vadd.f32 %v2065_v63, %v2029_v19 }
 0x2ce   : > { %v1657_v61 = vsel %vm866_vm6, %v1625_v56, 0.0  ;;  %v2862_v12 = vadd.f32 %v1412_v59, %v1236_v54  ;;  %v1238_v42 = vpop.f32.mrf.mxu1  ;;  %v1630_v51 = vmul.f32 %v2864_v57, %v2864_v57 }
 0x2cf   : > { %v1559_v21 = vadd.f32 %v1558_v62, %v1557_v4  ;;  %v1658_v18 = vadd.f32 %v1657_v61, %v1656_v26  ;;  %v1239_v1 = vadd.f32 %v1238_v42, %v1063_v23  ;;  %v2101_v9 = vpop.f32.mrf.mxu0  ;;  %v1566_v62 = vsel %vm866_vm6, %v2864_v57, 0.0 }
 0x2d0   : > { %v1628_v0 = vmul.f32 %v2862_v12, %v2862_v12  ;;  %v2068_v14 = vpop.f32.mrf.mxu1  ;;  %v1562_v44 = vsel %vm866_vm6, %v2862_v12, 0.0  ;;  %v2874_v48 = vadd.f32 %v2101_v9, %v1247_v11  ;;  %v1667_v9 = vsel %vm866_vm6, %v1630_v51, 0.0 }
 0x2d1   : > { %v1660_v10 = vadd.f32 %v1659_v38, %v1658_v18  ;;  %v1561_v19 = vadd.f32 %v1560_v27, %v1559_v21  ;;  %v1415_v32 = vpop.f32.mrf.mxu0  ;;  %v1260_v58 = vadd.f32 %v2068_v14, %v2810_v25 }
 0x2d2   : > { %v2876_v23 = vadd.f32 %v1415_v32, %v1239_v1  ;;  %v1251_v50 = vpop.f32.mrf.mxu1  ;;  %v1663_v40 = vsel %vm866_vm6, %v1628_v0, 0.0  ;;  %v1568_v38 = vsel %vm866_vm6, %v2874_v48, 0.0 }
 0x2d3   : > { %v1563_v52 = vadd.f32 %v1562_v44, %v1561_v19  ;;  %v1662_v53 = vadd.f32 %v1661_v43, %v1660_v10  ;;  %v1252_v54 = vadd.f32 %v1251_v50, %v2814_v30  ;;  %v2104_v17 = vpop.f32.mrf.mxu0  ;;  %v1631_v30 = vmul.f32 %v2874_v48, %v2874_v48 }
 0x2d4   : > { %v1564_v46 = vsel %vm866_vm6, %v2876_v23, 0.0  ;;  %v1629_v56 = vmul.f32 %v2876_v23, %v2876_v23  ;;  %v2069_v63 = vpop.f32.mrf.mxu1  ;;  %v2899_v27 = vadd.f32 %v2104_v17, %v1260_v58 }
 0x2d5   : > { %v1664_v26 = vadd.f32 %v1663_v40, %v1662_v53  ;;  %v1565_v4 = vadd.f32 %v1564_v46, %v1563_v52  ;;  %v1428_v59 = vpop.f32.mrf.mxu0  ;;  %v1263_v25 = vadd.f32 %v2069_v63, %v2818_v31  ;;  %v1669_v32 = vsel %vm866_vm6, %v1631_v30, 0.0 }
 0x2d6   : > { %v1665_v5 = vsel %vm866_vm6, %v1629_v56, 0.0  ;;  %v2893_v61 = vadd.f32 %v1428_v59, %v1252_v54  ;;  %v1254_v11 = vpop.f32.mrf.mxu1  ;;  %v1634_v40 = vmul.f32 %v2899_v27, %v2899_v27 }
 0x2d7   : > { %v1567_v42 = vadd.f32 %v1566_v62, %v1565_v4  ;;  %v1666_v21 = vadd.f32 %v1665_v5, %v1664_v26  ;;  %v1255_v18 = vadd.f32 %v1254_v11, %v2822_v60  ;;  %v2105_v1 = vpop.f32.mrf.mxu0  ;;  %v1574_v62 = vsel %vm866_vm6, %v2899_v27, 0.0 }
 0x2d8   : > { %v1632_v0 = vmul.f32 %v2893_v61, %v2893_v61  ;;  %v2072_v14 = vpop.f32.mrf.mxu1  ;;  %v1570_v60 = vsel %vm866_vm6, %v2893_v61, 0.0  ;;  %v2906_v43 = vadd.f32 %v2105_v1, %v1263_v25 }
 0x2d9   : > { %v1668_v31 = vadd.f32 %v1667_v9, %v1666_v21  ;;  %v1569_v10 = vadd.f32 %v1568_v38, %v1567_v42  ;;  %v1431_v19 = vpop.f32.mrf.mxu0  ;;  %v1276_v53 = vadd.f32 %v2072_v14, %v2826_v24  ;;  %v1675_v9 = vsel %vm866_vm6, %v1634_v40, 0.0 }
 0x2da   : > { %v2908_v44 = vadd.f32 %v1431_v19, %v1255_v18  ;;  %v1267_v50 = vpop.f32.mrf.mxu1  ;;  %v1671_v58 = vsel %vm866_vm6, %v1632_v0, 0.0  ;;  %v1576_v38 = vsel %vm866_vm6, %v2906_v43, 0.0 }
 0x2db   : > { %v1571_v51 = vadd.f32 %v1570_v60, %v1569_v10  ;;  %v1670_v52 = vadd.f32 %v1669_v32, %v1668_v31  ;;  %v1268_v54 = vadd.f32 %v1267_v50, %v2830_v33  ;;  %v2108_v17 = vpop.f32.mrf.mxu0  ;;  %v1635_v33 = vmul.f32 %v2906_v43, %v2906_v43 }
 0x2dc   : > { %v1572_v46 = vsel %vm866_vm6, %v2908_v44, 0.0  ;;  %v1633_v56 = vmul.f32 %v2908_v44, %v2908_v44  ;;  %v2073_v63 = vpop.f32.mrf.mxu1  ;;  %v2927_v21 = vadd.f32 %v2108_v17, %v1276_v53 }
 0x2dd   : > { %v1672_v26 = vadd.f32 %v1671_v58, %v1670_v52  ;;  %v1573_v24 = vadd.f32 %v1572_v46, %v1571_v51  ;;  %v1444_v4 = vpop.f32.mrf.mxu0  ;;  %v1279_v30 = vadd.f32 %v2073_v63, %v2834_v29  ;;  %v1677_v19 = vsel %vm866_vm6, %v1635_v33, 0.0 }
 0x2de   : > { %v1673_v59 = vsel %vm866_vm6, %v1633_v56, 0.0  ;;  %v2925_v5 = vadd.f32 %v1444_v4, %v1268_v54  ;;  %v1270_v25 = vpop.f32.mrf.mxu1  ;;  %v1638_v51 = vmul.f32 %v2927_v21, %v2927_v21  ;;  %v1582_v4 = vsel %vm866_vm6, %v2927_v21, 0.0 }
 0x2df   : > { %v1575_v11 = vadd.f32 %v1574_v62, %v1573_v24  ;;  %v1674_v42 = vadd.f32 %v1673_v59, %v1672_v26  ;;  %v1271_v18 = vadd.f32 %v1270_v25, %v2836_v35  ;;  %v2109_v1 = vpop.f32.mrf.mxu0 }
 0x2e0   : > { %v1636_v0 = vmul.f32 %v2925_v5, %v2925_v5  ;;  %v2076_v14 = vpop.f32.mrf.mxu1  ;;  %v1578_v32 = vsel %vm866_vm6, %v2925_v5, 0.0  ;;  %v2938_v60 = vadd.f32 %v2109_v1, %v1279_v30  ;;  %v1683_v1 = vsel %vm866_vm6, %v1638_v51, 0.0 }
 0x2e1   : > { %v1676_v29 = vadd.f32 %v1675_v9, %v1674_v42  ;;  %v1577_v31 = vadd.f32 %v1576_v38, %v1575_v11  ;;  %v1447_v10 = vpop.f32.mrf.mxu0  ;;  %v1292_v58 = vadd.f32 %v2076_v14, %v2790_v34 }
 0x2e2   : > { %v2940_v35 = vadd.f32 %v1447_v10, %v1271_v18  ;;  %v1283_v50 = vpop.f32.mrf.mxu1  ;;  %v1679_v40 = vsel %vm866_vm6, %v1636_v0, 0.0  ;;  %v1584_v9 = vsel %vm866_vm6, %v2938_v60, 0.0 }
 0x2e3   : > { %v1579_v52 = vadd.f32 %v1578_v32, %v1577_v31  ;;  %v1678_v53 = vadd.f32 %v1677_v19, %v1676_v29  ;;  %v1284_v54 = vadd.f32 %v1283_v50, %v2792_v37  ;;  %v2112_v17 = vpop.f32.mrf.mxu0  ;;  %v1639_v37 = vmul.f32 %v2938_v60, %v2938_v60 }
 0x2e4   : > { %v1580_v46 = vsel %vm866_vm6, %v2940_v35, 0.0  ;;  %v1637_v56 = vmul.f32 %v2940_v35, %v2940_v35  ;;  %v2077_v63 = vpop.f32.mrf.mxu1  ;;  %v2961_v38 = vadd.f32 %v2112_v17, %v1292_v58 }
 0x2e5   : > { %v1680_v62 = vadd.f32 %v1679_v40, %v1678_v53  ;;  %v1581_v26 = vadd.f32 %v1580_v46, %v1579_v52  ;;  %v1460_v24 = vpop.f32.mrf.mxu0  ;;  %v1295_v34 = vadd.f32 %v2077_v63, %v2794_v2  ;;  %v1685_v2 = vsel %vm866_vm6, %v1639_v37, 0.0 }
 0x2e6   : > { %v1681_v33 = vsel %vm866_vm6, %v1637_v56, 0.0  ;;  %v1286_v59 = vpop.f32.mrf.mxu1  ;;  %v1539_v11 = vadd.f32 %v1460_v24, %v1284_v54  ;;  %v1642_v54 = vmul.f32 %v2961_v38, %v2961_v38 }
 0x2e7   : > { %v1583_v30 = vadd.f32 %v1582_v4, %v1581_v26  ;;  %v1682_v25 = vadd.f32 %v1681_v33, %v1680_v62  ;;  %v1287_v42 = vadd.f32 %v1286_v59, %v2796_v41  ;;  %v2113_v18 = vpop.f32.mrf.mxu0  ;;  %v1590_v4 = vsel %vm866_vm6, %v2961_v38, 0.0 }
 0x2e8   : > { %v2080_v0 = vpop.f32.mrf.mxu1  ;;  %v1640_v31 = vmul.f32 %v1539_v11, %v1539_v11  ;;  %v1586_v19 = vsel %vm866_vm6, %v1539_v11, 0.0  ;;  %v2965_v32 = vadd.f32 %v2113_v18, %v1295_v34  ;;  %v2229_v58 = vpack.i.bf16 %v1539_v11, %v2838_v28 }
 0x2e9   : > { %v1684_v14 = vadd.f32 %v1683_v1, %v1682_v25  ;;  %v1585_v29 = vadd.f32 %v1584_v9, %v1583_v30  ;;  %v1463_v10 = vpop.f32.mrf.mxu0  ;;  %v1308_v63 = vadd.f32 %v2080_v0, %v2798_v13  ;;  %v1691_v1 = vsel %vm866_vm6, %v1642_v54, 0.0 }
 0x2ea   : > { %v1299_v41 = vpop.f32.mrf.mxu1  ;;  %v1540_v51 = vadd.f32 %v1463_v10, %v1287_v42  ;;  %v1687_v17 = vsel %vm866_vm6, %v1640_v31, 0.0  ;;  %v1643_v37 = vmul.f32 %v2965_v32, %v2965_v32  ;;  %2230 = vxpose.xlu0.b32.start [1/16] (narrow) %v2229_v58, 8 }
 0x2eb   : > { %v1587_v50 = vadd.f32 %v1586_v19, %v1585_v29  ;;  %v1686_v52 = vadd.f32 %v1685_v2, %v1684_v14  ;;  %v2116_v53 = vpop.f32.mrf.mxu0  ;;  %v1300_v40 = vadd.f32 %v1299_v41, %v2800_v15 }
 0x2ec   : > { %v2081_v46 = vpop.f32.mrf.mxu1  ;;  %v1588_v62 = vsel %vm866_vm6, %v1540_v51, 0.0  ;;  %v1641_v26 = vmul.f32 %v1540_v51, %v1540_v51  ;;  %v2231_v33 = vpack.i.bf16 %v1540_v51, %v2846_v39  ;;  %v1592_v39 = vsel %vm866_vm6, %v2965_v32, 0.0 }
 0x2ed   : > { %v1688_v56 = vadd.f32 %v1687_v17, %v1686_v52  ;;  %v1476_v24 = vpop.f32.mrf.mxu0  ;;  %v1589_v34 = vadd.f32 %v1588_v62, %v1587_v50  ;;  %v1311_v59 = vadd.f32 %v2081_v46, %v2802_v16  ;;  %v2987_v9 = vadd.f32 %v2116_v53, %v1308_v63 }
 0x2ee   : > { %v1302_v15 = vpop.f32.mrf.mxu1  ;;  %v1689_v28 = vsel %vm866_vm6, %v1641_v26, 0.0  ;;  %v2981_v13 = vadd.f32 %v1476_v24, %v1300_v40  ;;  %v2233_v16 = vpack.i.bf16 %v2961_v38, %v2840_v55  ;;  %2232 = vxpose.xlu0.b32.cont [2/16] (narrow) %v2231_v33, 8  ;;  %v1693_v2 = vsel %vm866_vm6, %v1643_v37, 0.0 }
 0x2ef   : > { %v1303_v30 = vadd.f32 %v1302_v15, %v2804_v45  ;;  %v2117_v25 = vpop.f32.mrf.mxu0  ;;  %v1591_v11 = vadd.f32 %v1590_v4, %v1589_v34  ;;  %v1690_v42 = vadd.f32 %v1689_v28, %v1688_v56  ;;  %v1646_v17 = vmul.f32 %v2987_v9, %v2987_v9 }
 0x2f0   : > { %v2084_v18 = vpop.f32.mrf.mxu1  ;;  %v1644_v0 = vmul.f32 %v2981_v13, %v2981_v13  ;;  %v1594_v19 = vsel %vm866_vm6, %v2981_v13, 0.0  ;;  %v2998_v41 = vadd.f32 %v2117_v25, %v1311_v59  ;;  %v2235_v24 = vpack.i.bf16 %v2965_v32, %v2844_v36 }
 0x2f1   : > { %v1479_v14 = vpop.f32.mrf.mxu0  ;;  %v1692_v29 = vadd.f32 %v1691_v1, %v1690_v42  ;;  %v1593_v45 = vadd.f32 %v1592_v39, %v1591_v11  ;;  %v1324_v50 = vadd.f32 %v2084_v18, %v2806_v22  ;;  %v1598_v4 = vsel %vm866_vm6, %v2987_v9, 0.0 }
 0x2f2   : > { %v2993_v31 = vadd.f32 %v1479_v14, %v1303_v30  ;;  %v1315_v10 = vpop.f32.mrf.mxu1  ;;  %v1695_v40 = vsel %vm866_vm6, %v1644_v0, 0.0  ;;  %2234 = vxpose.xlu0.b32.cont [3/16] (narrow) %v2233_v16, 8  ;;  %v1647_v37 = vmul.f32 %v2998_v41, %v2998_v41  ;;  %v1699_v30 = vsel %vm866_vm6, %v1646_v17, 0.0 }
 0x2f3   : > { %v2120_v52 = vpop.f32.mrf.mxu0  ;;  %v1595_v51 = vadd.f32 %v1594_v19, %v1593_v45  ;;  %v1694_v53 = vadd.f32 %v1693_v2, %v1692_v29  ;;  %v1316_v58 = vadd.f32 %v1315_v10, %v2808_v20  ;;  %v1600_v36 = vsel %vm866_vm6, %v2998_v41, 0.0 }
 0x2f4   : > { %v1596_v55 = vsel %vm866_vm6, %v2993_v31, 0.0  ;;  %v1645_v38 = vmul.f32 %v2993_v31, %v2993_v31  ;;  %v2085_v54 = vpop.f32.mrf.mxu1  ;;  %v3019_v28 = vadd.f32 %v2120_v52, %v1324_v50  ;;  %v2237_v39 = vpack.i.bf16 %v2981_v13, %v2862_v12 }
 0x2f5   : > { %v1492_v46 = vpop.f32.mrf.mxu0  ;;  %v1696_v56 = vadd.f32 %v1695_v40, %v1694_v53  ;;  %v1597_v63 = vadd.f32 %v1596_v55, %v1595_v51  ;;  %v1327_v62 = vadd.f32 %v2085_v54, %v2812_v47 }
 0x2f6   : > { %v1697_v22 = vsel %vm866_vm6, %v1645_v38, 0.0  ;;  %v1318_v26 = vpop.f32.mrf.mxu1  ;;  %v3017_v33 = vadd.f32 %v1492_v46, %v1316_v58  ;;  %2236 = vxpose.xlu0.b32.cont [4/16] (narrow) %v2235_v24, 8  ;;  %v1650_v29 = vmul.f32 %v3019_v28, %v3019_v28  ;;  %v1606_v53 = vsel %vm866_vm6, %v3019_v28, 0.0 }
 0x2f7   : > { %v2121_v20 = vpop.f32.mrf.mxu0  ;;  %v1599_v34 = vadd.f32 %v1598_v4, %v1597_v63  ;;  %v1698_v15 = vadd.f32 %v1697_v22, %v1696_v56  ;;  %v1319_v59 = vadd.f32 %v1318_v26, %v2816_v6  ;;  %v1701_v6 = vsel %vm866_vm6, %v1647_v37, 0.0 }
 0x2f8   : > { %v2088_v47 = vpop.f32.mrf.mxu1  ;;  %v1648_v32 = vmul.f32 %v3017_v33, %v3017_v33  ;;  %v3027_v18 = vadd.f32 %v2121_v20, %v1327_v62  ;;  %v1602_v0 = vsel %vm866_vm6, %v3017_v33, 0.0  ;;  %v2239_v56 = vpack.i.bf16 %v2993_v31, %v2876_v23 }
 0x2f9   : > { %v1495_v25 = vpop.f32.mrf.mxu0  ;;  %v1700_v11 = vadd.f32 %v1699_v30, %v1698_v15  ;;  %v1601_v42 = vadd.f32 %v1600_v36, %v1599_v34  ;;  %v1340_v12 = vadd.f32 %v2088_v47, %v2820_v8  ;;  %v1707_v62 = vsel %vm866_vm6, %v1650_v29, 0.0 }
 0x2fa   : > { %v1331_v1 = vpop.f32.mrf.mxu1  ;;  %v3034_v14 = vadd.f32 %v1495_v25, %v1319_v59  ;;  %v1703_v50 = vsel %vm866_vm6, %v1648_v32, 0.0  ;;  %v1651_v38 = vmul.f32 %v3027_v18, %v3027_v18  ;;  %2238 = vxpose.xlu0.b32.cont [5/16] (narrow) %v2237_v39, 8  ;;  %v1608_v26 = vsel %vm866_vm6, %v3027_v18, 0.0 }
 0x2fb   : > { %v2124_v16 = vpop.f32.mrf.mxu0  ;;  %v1603_v45 = vadd.f32 %v1602_v0, %v1601_v42  ;;  %v1702_v10 = vadd.f32 %v1701_v6, %v1700_v11  ;;  %v1332_v2 = vadd.f32 %v1331_v1, %v2824_v7  ;;  %v2241_v15 = vpack.i.bf16 %v2987_v9, %v2864_v57 }
 0x2fc   : > { %v2089_v19 = vpop.f32.mrf.mxu1  ;;  %v1604_v13 = vsel %vm866_vm6, %v3034_v14, 0.0  ;;  %v1649_v52 = vmul.f32 %v3034_v14, %v3034_v14  ;;  %v3059_v24 = vadd.f32 %v2124_v16, %v1340_v12  ;;  %v1709_v34 = vsel %vm866_vm6, %v1651_v38, 0.0 }
 0x2fd   : > { %v1508_v51 = vpop.f32.mrf.mxu0  ;;  %v1704_v55 = vadd.f32 %v1703_v50, %v1702_v10  ;;  %v1605_v7 = vadd.f32 %v1604_v13, %v1603_v45  ;;  %v1343_v8 = vadd.f32 %v2089_v19, %v2828_v49  ;;  %v2243_v57 = vpack.i.bf16 %v2998_v41, %v2874_v48 }
 0x2fe   : > { %v1334_v54 = vpop.f32.mrf.mxu1  ;;  %v1705_v17 = vsel %vm866_vm6, %v1649_v52, 0.0  ;;  %v3051_v40 = vadd.f32 %v1508_v51, %v1332_v2  ;;  %2240 = vxpose.xlu0.b32.cont [6/16] (narrow) %v2239_v56, 8  ;;  %v1654_v30 = vmul.f32 %v3059_v24, %v3059_v24  ;;  %v1614_v1 = vsel %vm866_vm6, %v3059_v24, 0.0 }
 0x2ff   : > { %v1335_v58 = vadd.f32 %v1334_v54, %v2832_v3  ;;  %v2125_v46 = vpop.f32.mrf.mxu0  ;;  %v1607_v22 = vadd.f32 %v1606_v53, %v1605_v7  ;;  %v1706_v63 = vadd.f32 %v1705_v17, %v1704_v55  ;;  %v2245_v19 = vpack.i.bf16 %v3017_v33, %v2893_v61 }
 0x300   : > { %v1652_v49 = vmul.f32 %v3051_v40, %v3051_v40  ;;  %v1610_v23 = vsel %vm866_vm6, %v3051_v40, 0.0  ;;  %v1554_v31 = vadd.f32 %v2125_v46, %v1343_v8  ;;  %v1715_v16 = vsel %vm866_vm6, %v1654_v30, 0.0 }
 0x301   : > { %v1511_v4 = vpop.f32.mrf.mxu0  ;;  %v1708_v37 = vadd.f32 %v1707_v62, %v1706_v63  ;;  %v1609_v20 = vadd.f32 %v1608_v26, %v1607_v22  ;;  %v2247_v48 = vpack.i.bf16 %v3034_v14, %v2908_v44  ;;  %v2249_v38 = vpack.i.bf16 %v3019_v28, %v2899_v27 }
 0x302   : > { %v1552_v3 = vadd.f32 %v1511_v4, %v1335_v58  ;;  %v1711_v36 = vsel %vm866_vm6, %v1652_v49, 0.0  ;;  %2242 = vxpose.xlu0.b32.cont [7/16] (narrow) %v2241_v15, 8  ;;  %v1655_v39 = vmul.f32 %v1554_v31, %v1554_v31  ;;  %v1616_v29 = vsel %vm866_vm6, %v1554_v31, 0.0 }
 0x303   : > { %v1611_v59 = vadd.f32 %v1610_v23, %v1609_v20  ;;  %v1710_v47 = vadd.f32 %v1709_v34, %v1708_v37  ;;  %v2251_v44 = vpack.i.bf16 %v3027_v18, %v2906_v43  ;;  %v2253_v27 = vpack.i.bf16 %v3051_v40, %v2925_v5 }
 0x304   : > { %v1612_v32 = vsel %vm866_vm6, %v1552_v3, 0.0  ;;  %v1653_v25 = vmul.f32 %v1552_v3, %v1552_v3  ;;  %v1717_v2 = vsel %vm866_vm6, %v1655_v39, 0.0  ;;  %v2255_v28 = vpack.i.bf16 %v1552_v3, %v2940_v35 }
 0x305   : > { %v1712_v11 = vadd.f32 %v1711_v36, %v1710_v47  ;;  %v1613_v42 = vadd.f32 %v1612_v32, %v1611_v59  ;;  %v2257_v8 = vpack.i.bf16 %v3059_v24, %v2927_v21  ;;  %v2259_v43 = vpack.i.bf16 %v1554_v31, %v2938_v60 }
 0x306   : > { %v1713_v6 = vsel %vm866_vm6, %v1653_v25, 0.0  ;;  %2244 = vxpose.xlu0.b32.cont [8/16] (narrow) %v2243_v57, 8 }
 0x307   : > { %v1615_v9 = vadd.f32 %v1614_v1, %v1613_v42  ;;  %v1714_v0 = vadd.f32 %v1713_v6, %v1712_v11 }
 0x309   : > { %v1617_v45 = vadd.f32 %v1616_v29, %v1615_v9  ;;  %v1716_v10 = vadd.f32 %v1715_v16, %v1714_v0 }
 0x30a   : > { %2246 = vxpose.xlu0.b32.cont [9/16] (narrow) %v2245_v19, 8 }
 0x30b   : > { %v1618_v50 = vrot.slane %v1617_v45, 4  ;;  %v1718_v12 = vadd.f32 %v1717_v2, %v1716_v10 }
 0x30d   : > { %v1619_v13 = vadd.f32 %v1618_v50, %v1617_v45  ;;  %v1719_v52 = vrot.slane %v1718_v12, 4 }
 0x30e   : > { %2248 = vxpose.xlu0.b32.cont [10/16] (narrow) %v2247_v48, 8 }
 0x30f   : > { %v1620_v41 = vrot.slane %v1619_v13, 2  ;;  %v1720_v51 = vadd.f32 %v1719_v52, %v1718_v12 }
 0x311   : > { %v1621_v53 = vadd.f32 %v1620_v41, %v1619_v13  ;;  %v1721_v55 = vrot.slane %v1720_v51, 2 }
 0x312   : > { %2250 = vxpose.xlu0.b32.cont [11/16] (narrow) %v2249_v38, 8 }
 0x313   : > { %v1622_v7 = vrot.slane %v1621_v53, 1  ;;  %v1722_v54 = vadd.f32 %v1721_v55, %v1720_v51 }
 0x315   : > { %v1723_v61 = vrot.slane %v1722_v54, 1  ;;  %v1623_v33 = vadd.f32 %v1622_v7, %v1621_v53 }
 0x316   : > { %2252 = vxpose.xlu0.b32.cont [12/16] (narrow) %v2251_v44, 8 }
 0x317   : > { %v1724_v14 = vadd.f32 %v1723_v61, %v1722_v54 }
 0x319   : > { %v1726_v17 = vsel %vm491_vm0, %v1623_v33, %v1724_v14 }
 0x31a   : > { %1728 = vst.msk [vmem:[%s235_s22] sm:$0x3] %vm1727_vm9, %v1726_v17  ;;  %2254 = vxpose.xlu0.b32.cont [13/16] (narrow) %v2253_v27, 8 }
 0x31e   : > { %2256 = vxpose.xlu0.b32.cont [14/16] (narrow) %v2255_v28, 8 }
 0x322   : > { %2258 = vxpose.xlu0.b32.cont [15/16] (narrow) %v2257_v8, 8 }
 0x326   : > { %2260 = vxpose.xlu0.b32.end [16/16] (narrow) %v2259_v43, 8 }
 0x366   : > { %v2261_v18 = vpop.trf.xlu0 }
 0x367   : > { %v2265_v58 = vunpack.i.h.bf16 %v2261_v18  ;;  %v2262_v46 = vunpack.i.l.bf16 %v2261_v18 }
 0x369   : > { %v1963_v5 = vpack.c.bf16 %v2265_v58, %v2262_v46 }
 0x36b   : > { %1801 = vst [vmem:[%s231_s26] sm:$0xff] %v1963_v5 }
 0x36c PF: > { %s16_s18 = sadd.s32 1, %s2278_s18  }
 0x36d   : > { %p13_p4 = scmp.ge.s32.totalorder %s16_s18, 4  }
 0x36f   :  { %15 = sbr.rel (!%p13_p4) target bundleno = 1 (0x1), region = 80 }

</bundles_post_ra>
